<compile_context>
chip_gen: v7x
topology: tpu7x:2x2x1
jax: 0.10.0
libtpu: 0.0.40
codegen_flags: <defaults>
</compile_context>

<pallas_src>
import functools

import jax
import jax.numpy as jnp
from jax import lax
from jax.experimental import pallas as pl
from jax.experimental.pallas import tpu as pltpu

# ----------------------------- model hyper-parameters -----------------------------
ENCODED_DIM = 64                       # userInputParams['encodedDimension']
FOURIER_DIM = ENCODED_DIM // 2 + 1     # int(encodedDimension / 2 + 1) = 33
FOURIER_PAD = 64                       # lane/sublane-friendly padded fourier width
NUM_MODEL_LAYERS = 64
GOLDEN_RATIO = 8
NUM_SPECIFIC_LAYERS = NUM_MODEL_LAYERS // GOLDEN_RATIO + 1   # 9
NUM_LAYER_SEQ = NUM_MODEL_LAYERS + NUM_SPECIFIC_LAYERS        # 73 interleaved layers
NUM_BASIC_EMOTIONS = 4
NUM_EMOTIONS = 6
NUM_EXPERIMENTS = 16

BATCH = 2
NUM_SIGNALS = 4
MAX_SEQ_LEN = 16
NUM_CHANNELS = 2                       # [timeChannel, signalChannel]

ROW_PAD = 8                            # pad rows to a sublane multiple (safety)


# --------------------------------- Pallas kernel -----------------------------------
def _layer_stack_kernel(x_ref, w_ref, b_ref, out_ref):
    """Applies the full interleaved layer sequence in ONE kernel invocation:
         acc <- (bf16(acc) @ W_l) + b_l    for l = 0..L-1   (fully unrolled, f32 acc)
       The binary row-validity mask is applied once OUTSIDE the kernel (equivalent).
    """
    num_layers = w_ref.shape[0]
    acc = x_ref[...]                                       # (R, Fp) f32
    # Fully unrolled static loop: static w_ref[l]/b_ref[l] slices are zero-cost views;
    # the scheduler overlaps next-layer weight loads and the bias add with the matmul.
    for l in range(num_layers):
        acc = jnp.dot(acc.astype(jnp.bfloat16), w_ref[l],   # (R,Fp)@(Fp,Fp) on the MXU
                      preferred_element_type=jnp.float32) + b_ref[l]
    out_ref[...] = acc


@jax.jit
def run_layer_stack(x, layer_w, layer_b):
    """x: (R, Fp) f32;  layer_w: (L, Fp, Fp) bf16;  layer_b: (L, 1, Fp) f32."""
    R, Fp = x.shape
    L = layer_w.shape[0]
    return pl.pallas_call(
        _layer_stack_kernel,
        out_shape=jax.ShapeDtypeStruct((R, Fp), jnp.float32),
        grid=(1,),                                          # single invocation
        in_specs=[
            pl.BlockSpec((R, Fp), lambda i: (0, 0)),        # full activation slab
            pl.BlockSpec((L, Fp, Fp), lambda i: (0, 0, 0)), # all weights resident (bf16)
            pl.BlockSpec((L, 1, Fp), lambda i: (0, 0, 0)),  # all biases resident (f32)
        ],
        out_specs=pl.BlockSpec((R, Fp), lambda i: (0, 0)),
    )(x, layer_w, layer_b)


# ------------------------------- parameter building --------------------------------
def build_params(key):
    kp, ksw, ksb, kqw, kqb = jax.random.split(key, 5)
    F, Fp = FOURIER_DIM, FOURIER_PAD

    # physiological profile embedding table: (numExperiments, encodedDimension)
    physio_profiles = 0.1 * jax.random.normal(kp, (NUM_EXPERIMENTS, ENCODED_DIM),
                                              dtype=jnp.float32)

    eye = jnp.eye(F, dtype=jnp.float32)
    shared_w = 0.97 * eye[None] + 0.01 * jax.random.normal(
        ksw, (NUM_MODEL_LAYERS, F, F), dtype=jnp.float32)
    shared_b = 0.01 * jax.random.normal(ksb, (NUM_MODEL_LAYERS, F), dtype=jnp.float32)
    spec_w = 0.97 * eye[None] + 0.01 * jax.random.normal(
        kqw, (NUM_SPECIFIC_LAYERS, F, F), dtype=jnp.float32)
    spec_b = 0.01 * jax.random.normal(kqb, (NUM_SPECIFIC_LAYERS, F), dtype=jnp.float32)

    # Flatten the interleaved specific/shared layer sequence exactly as in forward():
    seq_w, seq_b = [], []
    spec_counter = 0
    for layer_ind in range(NUM_MODEL_LAYERS):
        if layer_ind % GOLDEN_RATIO == 0:
            seq_w.append(spec_w[spec_counter]); seq_b.append(spec_b[spec_counter])
            spec_counter += 1
        seq_w.append(shared_w[layer_ind]); seq_b.append(shared_b[layer_ind])
    seq_w.append(spec_w[spec_counter]); seq_b.append(spec_b[spec_counter])

    layer_w = jnp.stack(seq_w)                 # (73, F, F)
    layer_b = jnp.stack(seq_b)                 # (73, F)
    assert layer_w.shape[0] == NUM_LAYER_SEQ

    # Zero-pad the fourier dim 33 -> 64: padded lanes contribute exactly zero.
    layer_w_p = jnp.zeros((NUM_LAYER_SEQ, Fp, Fp), jnp.float32).at[:, :F, :F].set(layer_w)
    layer_b_p = jnp.zeros((NUM_LAYER_SEQ, 1, Fp), jnp.float32).at[:, 0, :F].set(layer_b)

    return {"physioProfiles": physio_profiles,
            "layerW": layer_w_p.astype(jnp.bfloat16),   # bf16 MXU inputs
            "layerB": layer_b_p}                         # f32 bias (VPU add)


# ----------------------------------- forward ---------------------------------------
def emotion_model_head_forward(params, signal_data, signal_identifiers, metadata):
    B, S, L, C = signal_data.shape
    assert C == NUM_CHANNELS
    E, F, Fp = ENCODED_DIM, FOURIER_DIM, FOURIER_PAD

    signal_data = signal_data.astype(jnp.float32)
    signal_identifiers = signal_identifiers.astype(jnp.int32)

    timepoints = signal_data[..., 0]                               # (B, S, L)
    datapoints = signal_data[..., 1]                               # (B, S, L)
    # Exact-zero equality matches the PyTorch module (brittle under f64->f32 casts).
    missing_data_mask = (datapoints == 0) & (timepoints == 0)      # (B, S, L) bool
    valid_signal_mask = ~jnp.all(missing_data_mask, axis=-1)[..., None]   # (B, S, 1) bool
    valid_f = valid_signal_mask.astype(jnp.float32)                # strictly binary {0,1}

    # batchInds = signalIdentifiers[..., batchIndexSI][:, 0]
    batch_inds = signal_identifiers[..., 0][:, 0]                  # (B,)
    physiological_profile = jnp.take(params["physioProfiles"], batch_inds, axis=0)  # (B, E)

    # forwardFFT (done in XLA; no clean Pallas FFT)
    fft = jnp.fft.rfft(physiological_profile, axis=-1)             # (B, F) complex64
    fourier_mag = valid_f * jnp.repeat(jnp.abs(fft)[:, None, :], S, axis=1)
    fourier_phase = valid_f * jnp.repeat(jnp.angle(fft)[:, None, :], S, axis=1)

    physio_fourier = jnp.concatenate([fourier_mag, fourier_phase], axis=1)   # (B, 2S, F)
    valid_fourier_mask = jnp.concatenate([valid_f, valid_f], axis=1)         # (B, 2S, 1)

    # ---- Pallas hot path: 73 layer applications over the fourier slab ----
    R = B * 2 * S
    x = jnp.zeros((R, Fp), jnp.float32).at[:, :F].set(physio_fourier.reshape(R, F))
    row_mask = valid_fourier_mask.reshape(R, 1).astype(jnp.float32)

    pad_rows = (-R) % ROW_PAD
    if pad_rows:
        x = jnp.pad(x, ((0, pad_rows), (0, 0)))
        row_mask = jnp.pad(row_mask, ((0, pad_rows), (0, 0)))

    meta = run_layer_stack(x, params["layerW"], params["layerB"])
    # Binary row mask applied once after the affine stack (== per-layer masking).
    meta = (row_mask * meta)[:R, :F].reshape(B, 2 * S, F)

    mag_out, phase_out = meta[:, :S], meta[:, S:]

    # backwardFFT
    cplx = mag_out.astype(jnp.complex64) * jnp.exp(1j * phase_out.astype(jnp.complex64))
    recon = jnp.fft.irfft(cplx, n=E, axis=-1)                      # (B, S, E)
    reconstructed_signal_data = valid_f * recon

    general_encoding_loss = jnp.zeros((B,), dtype=jnp.float32)
    activity_profile = jnp.zeros((B, E), dtype=jnp.float32)
    basic_emotion_profile = jnp.zeros((B, NUM_BASIC_EMOTIONS, E), dtype=jnp.float32)
    emotion_profile = jnp.zeros((B, NUM_EMOTIONS, E), dtype=jnp.float32)
    # TODO(synk): emotionPrediction branch (specific/sharedEmotionModel) not in source.

    return (missing_data_mask, reconstructed_signal_data, general_encoding_loss,
            physiological_profile, activity_profile, basic_emotion_profile,
            emotion_profile)


# ------------------------- pure-JAX reference for the hot path ----------------------
def layer_stack_reference(x, row_mask, layer_w_bf16, layer_b):
    """Per-layer-masked reference matching the PyTorch loop semantics, using the same
       bf16-input / f32-accumulate matmul path as the kernel."""
    def body(l, acc):
        y = jnp.dot(acc.astype(jnp.bfloat16), layer_w_bf16[l],
                    preferred_element_type=jnp.float32) + layer_b[l]
        return row_mask * y
    return lax.fori_loop(0, layer_w_bf16.shape[0], body, x)


# ------------------------------------- main -----------------------------------------
if __name__ == "__main__":
    key = jax.random.PRNGKey(0)
    k_params, k_data, k_ids, k_meta, k_drop = jax.random.split(key, 5)

    params = build_params(k_params)

    # signalData: (B, numSignals, maxSequenceLength, numChannels=2)
    signal_data = jax.random.normal(
        k_data, (BATCH, NUM_SIGNALS, MAX_SEQ_LEN, NUM_CHANNELS), dtype=jnp.float32)
    # randomly zero out some (time, data) pairs -> missing samples
    drop = jax.random.bernoulli(k_drop, 0.2, (BATCH, NUM_SIGNALS, MAX_SEQ_LEN))
    signal_data = signal_data * (~drop)[..., None]
    # make the last signal of batch 0 fully missing -> exercises validSignalMask
    signal_data = signal_data.at[0, -1].set(0.0)

    # signalIdentifiers: (B, numSignals, 2) ints; channel 0 = batch index (experiment id)
    batch_ids = jax.random.randint(k_ids, (BATCH,), 0, NUM_EXPERIMENTS)
    signal_identifiers = jnp.stack(
        [jnp.broadcast_to(batch_ids[:, None], (BATCH, NUM_SIGNALS)),
         jnp.broadcast_to(jnp.arange(NUM_SIGNALS)[None, :], (BATCH, NUM_SIGNALS))],
        axis=-1).astype(jnp.int32)

    metadata = jax.random.normal(k_meta, (BATCH, 4), dtype=jnp.float32)

    outputs = emotion_model_head_forward(params, signal_data, signal_identifiers, metadata)
    outputs = jax.block_until_ready(outputs)

    (missing_mask, recon, enc_loss, physio, act_prof, basic_emo, emo) = outputs
    assert missing_mask.shape == (BATCH, NUM_SIGNALS, MAX_SEQ_LEN)
    assert recon.shape == (BATCH, NUM_SIGNALS, ENCODED_DIM)
    assert enc_loss.shape == (BATCH,)
    assert physio.shape == (BATCH, ENCODED_DIM)
    assert act_prof.shape == (BATCH, ENCODED_DIM)
    assert basic_emo.shape == (BATCH, NUM_BASIC_EMOTIONS, ENCODED_DIM)
    assert emo.shape == (BATCH, NUM_EMOTIONS, ENCODED_DIM)
    assert bool(jnp.all(jnp.isfinite(recon)))

    # Correctness check of the Pallas hot path against a pure-JAX reference that applies
    # the (binary) row mask every layer, matching the original module's loop semantics.
    B, S = BATCH, NUM_SIGNALS
    sd32 = signal_data.astype(jnp.float32)
    miss = (sd32[..., 1] == 0) & (sd32[..., 0] == 0)
    vmask = (~jnp.all(miss, axis=-1))[..., None].astype(jnp.float32)      # (B, S, 1)
    prof = jnp.take(params["physioProfiles"], batch_ids, axis=0)
    fft = jnp.fft.rfft(prof, axis=-1)
    mag = vmask * jnp.repeat(jnp.abs(fft)[:, None, :], S, axis=1)
    phs = vmask * jnp.repeat(jnp.angle(fft)[:, None, :], S, axis=1)
    slab = jnp.concatenate([mag, phs], axis=1).reshape(B * 2 * S, FOURIER_DIM)
    x_pad = jnp.zeros((B * 2 * S, FOURIER_PAD), jnp.float32).at[:, :FOURIER_DIM].set(slab)
    rmask = jnp.concatenate([vmask, vmask], axis=1).reshape(B * 2 * S, 1)
    # mask is strictly binary {0,1}; end-application below is exactly equivalent.
    assert bool(jnp.all((rmask == 0.0) | (rmask == 1.0)))

    ref = layer_stack_reference(x_pad, rmask, params["layerW"], params["layerB"])
    got = rmask * run_layer_stack(x_pad, params["layerW"], params["layerB"])
    assert bool(jnp.allclose(got[:, :FOURIER_DIM], ref[:, :FOURIER_DIM],
                             rtol=1e-2, atol=1e-2))

    print("KERNEL_OK")
</pallas_src>

<mosaic_0001>
module attributes {stable_mosaic.version = 11 : i64} {
  func.func @_layer_stack_kernel(%arg0: i32, %arg1: memref<16x64xf32, #tpu.memory_space<vmem>>, %arg2: memref<73x64x64xbf16, #tpu.memory_space<vmem>>, %arg3: memref<73x1x64xf32, #tpu.memory_space<vmem>>, %arg4: memref<16x64xf32, #tpu.memory_space<vmem>>) attributes {dimension_semantics = [#tpu.dimension_semantics<arbitrary>], iteration_bounds = array<i64: 1>, scalar_prefetch = 0 : i64, scratch_operands = 0 : i64, tpu.core_type = #tpu.core_type<tc>, window_params = [{pipeline_mode = #tpu.pipeline_mode<synchronous>, transform_indices = @transform_0, window_bounds = array<i64: 16, 64>}, {pipeline_mode = #tpu.pipeline_mode<synchronous>, transform_indices = @transform_1, window_bounds = array<i64: 73, 64, 64>}, {pipeline_mode = #tpu.pipeline_mode<synchronous>, transform_indices = @transform_2, window_bounds = array<i64: 73, 1, 64>}, {pipeline_mode = #tpu.pipeline_mode<synchronous>, transform_indices = @transform_3, window_bounds = array<i64: 16, 64>}]} {
    %c0 = arith.constant 0 : index
    %c0_0 = arith.constant 0 : index
    %0 = vector.load %arg1[%c0, %c0_0] : memref<16x64xf32, #tpu.memory_space<vmem>>, vector<16x64xf32>
    %1 = arith.truncf %0 : vector<16x64xf32> to vector<16x64xbf16>
    %c0_1 = arith.constant 0 : index
    %c0_2 = arith.constant 0 : index
    %c0_3 = arith.constant 0 : index
    %2 = vector.load %arg2[%c0_1, %c0_2, %c0_3] : memref<73x64x64xbf16, #tpu.memory_space<vmem>>, vector<1x64x64xbf16>
    %3 = vector.shape_cast %2 : vector<1x64x64xbf16> to vector<64x64xbf16>
    %cst = arith.constant dense<0.000000e+00> : vector<16x64xf32>
    %4 = tpu.matmul %1, %3, %cst {dimension_numbers = #tpu.dot_dimension_numbers<[1], [0], [0], [1], [0, 0, 1, 1], [], []>} : vector<16x64xbf16>, vector<64x64xbf16>, vector<16x64xf32> -> vector<16x64xf32>
    %c0_4 = arith.constant 0 : index
    %c0_5 = arith.constant 0 : index
    %c0_6 = arith.constant 0 : index
    %5 = vector.load %arg3[%c0_4, %c0_5, %c0_6] : memref<73x1x64xf32, #tpu.memory_space<vmem>>, vector<1x1x64xf32>
    %6 = vector.shape_cast %5 : vector<1x1x64xf32> to vector<1x64xf32>
    %7 = vector.broadcast %6 : vector<1x64xf32> to vector<16x64xf32>
    %8 = arith.addf %4, %7 : vector<16x64xf32>
    %9 = arith.truncf %8 : vector<16x64xf32> to vector<16x64xbf16>
    %c1 = arith.constant 1 : index
    %c0_7 = arith.constant 0 : index
    %c0_8 = arith.constant 0 : index
    %10 = vector.load %arg2[%c1, %c0_7, %c0_8] : memref<73x64x64xbf16, #tpu.memory_space<vmem>>, vector<1x64x64xbf16>
    %11 = vector.shape_cast %10 : vector<1x64x64xbf16> to vector<64x64xbf16>
    %cst_9 = arith.constant dense<0.000000e+00> : vector<16x64xf32>
    %12 = tpu.matmul %9, %11, %cst_9 {dimension_numbers = #tpu.dot_dimension_numbers<[1], [0], [0], [1], [0, 0, 1, 1], [], []>} : vector<16x64xbf16>, vector<64x64xbf16>, vector<16x64xf32> -> vector<16x64xf32>
    %c1_10 = arith.constant 1 : index
    %c0_11 = arith.constant 0 : index
    %c0_12 = arith.constant 0 : index
    %13 = vector.load %arg3[%c1_10, %c0_11, %c0_12] : memref<73x1x64xf32, #tpu.memory_space<vmem>>, vector<1x1x64xf32>
    %14 = vector.shape_cast %13 : vector<1x1x64xf32> to vector<1x64xf32>
    %15 = vector.broadcast %14 : vector<1x64xf32> to vector<16x64xf32>
    %16 = arith.addf %12, %15 : vector<16x64xf32>
    %17 = arith.truncf %16 : vector<16x64xf32> to vector<16x64xbf16>
    %c2 = arith.constant 2 : index
    %c0_13 = arith.constant 0 : index
    %c0_14 = arith.constant 0 : index
    %18 = vector.load %arg2[%c2, %c0_13, %c0_14] : memref<73x64x64xbf16, #tpu.memory_space<vmem>>, vector<1x64x64xbf16>
    %19 = vector.shape_cast %18 : vector<1x64x64xbf16> to vector<64x64xbf16>
    %cst_15 = arith.constant dense<0.000000e+00> : vector<16x64xf32>
    %20 = tpu.matmul %17, %19, %cst_15 {dimension_numbers = #tpu.dot_dimension_numbers<[1], [0], [0], [1], [0, 0, 1, 1], [], []>} : vector<16x64xbf16>, vector<64x64xbf16>, vector<16x64xf32> -> vector<16x64xf32>
    %c2_16 = arith.constant 2 : index
    %c0_17 = arith.constant 0 : index
    %c0_18 = arith.constant 0 : index
    %21 = vector.load %arg3[%c2_16, %c0_17, %c0_18] : memref<73x1x64xf32, #tpu.memory_space<vmem>>, vector<1x1x64xf32>
    %22 = vector.shape_cast %21 : vector<1x1x64xf32> to vector<1x64xf32>
    %23 = vector.broadcast %22 : vector<1x64xf32> to vector<16x64xf32>
    %24 = arith.addf %20, %23 : vector<16x64xf32>
    %25 = arith.truncf %24 : vector<16x64xf32> to vector<16x64xbf16>
    %c3 = arith.constant 3 : index
    %c0_19 = arith.constant 0 : index
    %c0_20 = arith.constant 0 : index
    %26 = vector.load %arg2[%c3, %c0_19, %c0_20] : memref<73x64x64xbf16, #tpu.memory_space<vmem>>, vector<1x64x64xbf16>
    %27 = vector.shape_cast %26 : vector<1x64x64xbf16> to vector<64x64xbf16>
    %cst_21 = arith.constant dense<0.000000e+00> : vector<16x64xf32>
    %28 = tpu.matmul %25, %27, %cst_21 {dimension_numbers = #tpu.dot_dimension_numbers<[1], [0], [0], [1], [0, 0, 1, 1], [], []>} : vector<16x64xbf16>, vector<64x64xbf16>, vector<16x64xf32> -> vector<16x64xf32>
    %c3_22 = arith.constant 3 : index
    %c0_23 = arith.constant 0 : index
    %c0_24 = arith.constant 0 : index
    %29 = vector.load %arg3[%c3_22, %c0_23, %c0_24] : memref<73x1x64xf32, #tpu.memory_space<vmem>>, vector<1x1x64xf32>
    %30 = vector.shape_cast %29 : vector<1x1x64xf32> to vector<1x64xf32>
    %31 = vector.broadcast %30 : vector<1x64xf32> to vector<16x64xf32>
    %32 = arith.addf %28, %31 : vector<16x64xf32>
    %33 = arith.truncf %32 : vector<16x64xf32> to vector<16x64xbf16>
    %c4 = arith.constant 4 : index
    %c0_25 = arith.constant 0 : index
    %c0_26 = arith.constant 0 : index
    %34 = vector.load %arg2[%c4, %c0_25, %c0_26] : memref<73x64x64xbf16, #tpu.memory_space<vmem>>, vector<1x64x64xbf16>
    %35 = vector.shape_cast %34 : vector<1x64x64xbf16> to vector<64x64xbf16>
    %cst_27 = arith.constant dense<0.000000e+00> : vector<16x64xf32>
    %36 = tpu.matmul %33, %35, %cst_27 {dimension_numbers = #tpu.dot_dimension_numbers<[1], [0], [0], [1], [0, 0, 1, 1], [], []>} : vector<16x64xbf16>, vector<64x64xbf16>, vector<16x64xf32> -> vector<16x64xf32>
    %c4_28 = arith.constant 4 : index
    %c0_29 = arith.constant 0 : index
    %c0_30 = arith.constant 0 : index
    %37 = vector.load %arg3[%c4_28, %c0_29, %c0_30] : memref<73x1x64xf32, #tpu.memory_space<vmem>>, vector<1x1x64xf32>
    %38 = vector.shape_cast %37 : vector<1x1x64xf32> to vector<1x64xf32>
    %39 = vector.broadcast %38 : vector<1x64xf32> to vector<16x64xf32>
    %40 = arith.addf %36, %39 : vector<16x64xf32>
    %41 = arith.truncf %40 : vector<16x64xf32> to vector<16x64xbf16>
    %c5 = arith.constant 5 : index
    %c0_31 = arith.constant 0 : index
    %c0_32 = arith.constant 0 : index
    %42 = vector.load %arg2[%c5, %c0_31, %c0_32] : memref<73x64x64xbf16, #tpu.memory_space<vmem>>, vector<1x64x64xbf16>
    %43 = vector.shape_cast %42 : vector<1x64x64xbf16> to vector<64x64xbf16>
    %cst_33 = arith.constant dense<0.000000e+00> : vector<16x64xf32>
    %44 = tpu.matmul %41, %43, %cst_33 {dimension_numbers = #tpu.dot_dimension_numbers<[1], [0], [0], [1], [0, 0, 1, 1], [], []>} : vector<16x64xbf16>, vector<64x64xbf16>, vector<16x64xf32> -> vector<16x64xf32>
    %c5_34 = arith.constant 5 : index
    %c0_35 = arith.constant 0 : index
    %c0_36 = arith.constant 0 : index
    %45 = vector.load %arg3[%c5_34, %c0_35, %c0_36] : memref<73x1x64xf32, #tpu.memory_space<vmem>>, vector<1x1x64xf32>
    %46 = vector.shape_cast %45 : vector<1x1x64xf32> to vector<1x64xf32>
    %47 = vector.broadcast %46 : vector<1x64xf32> to vector<16x64xf32>
    %48 = arith.addf %44, %47 : vector<16x64xf32>
    %49 = arith.truncf %48 : vector<16x64xf32> to vector<16x64xbf16>
    %c6 = arith.constant 6 : index
    %c0_37 = arith.constant 0 : index
    %c0_38 = arith.constant 0 : index
    %50 = vector.load %arg2[%c6, %c0_37, %c0_38] : memref<73x64x64xbf16, #tpu.memory_space<vmem>>, vector<1x64x64xbf16>
    %51 = vector.shape_cast %50 : vector<1x64x64xbf16> to vector<64x64xbf16>
    %cst_39 = arith.constant dense<0.000000e+00> : vector<16x64xf32>
    %52 = tpu.matmul %49, %51, %cst_39 {dimension_numbers = #tpu.dot_dimension_numbers<[1], [0], [0], [1], [0, 0, 1, 1], [], []>} : vector<16x64xbf16>, vector<64x64xbf16>, vector<16x64xf32> -> vector<16x64xf32>
    %c6_40 = arith.constant 6 : index
    %c0_41 = arith.constant 0 : index
    %c0_42 = arith.constant 0 : index
    %53 = vector.load %arg3[%c6_40, %c0_41, %c0_42] : memref<73x1x64xf32, #tpu.memory_space<vmem>>, vector<1x1x64xf32>
    %54 = vector.shape_cast %53 : vector<1x1x64xf32> to vector<1x64xf32>
    %55 = vector.broadcast %54 : vector<1x64xf32> to vector<16x64xf32>
    %56 = arith.addf %52, %55 : vector<16x64xf32>
    %57 = arith.truncf %56 : vector<16x64xf32> to vector<16x64xbf16>
    %c7 = arith.constant 7 : index
    %c0_43 = arith.constant 0 : index
    %c0_44 = arith.constant 0 : index
    %58 = vector.load %arg2[%c7, %c0_43, %c0_44] : memref<73x64x64xbf16, #tpu.memory_space<vmem>>, vector<1x64x64xbf16>
    %59 = vector.shape_cast %58 : vector<1x64x64xbf16> to vector<64x64xbf16>
    %cst_45 = arith.constant dense<0.000000e+00> : vector<16x64xf32>
    %60 = tpu.matmul %57, %59, %cst_45 {dimension_numbers = #tpu.dot_dimension_numbers<[1], [0], [0], [1], [0, 0, 1, 1], [], []>} : vector<16x64xbf16>, vector<64x64xbf16>, vector<16x64xf32> -> vector<16x64xf32>
    %c7_46 = arith.constant 7 : index
    %c0_47 = arith.constant 0 : index
    %c0_48 = arith.constant 0 : index
    %61 = vector.load %arg3[%c7_46, %c0_47, %c0_48] : memref<73x1x64xf32, #tpu.memory_space<vmem>>, vector<1x1x64xf32>
    %62 = vector.shape_cast %61 : vector<1x1x64xf32> to vector<1x64xf32>
    %63 = vector.broadcast %62 : vector<1x64xf32> to vector<16x64xf32>
    %64 = arith.addf %60, %63 : vector<16x64xf32>
    %65 = arith.truncf %64 : vector<16x64xf32> to vector<16x64xbf16>
    %c8 = arith.constant 8 : index
    %c0_49 = arith.constant 0 : index
    %c0_50 = arith.constant 0 : index
    %66 = vector.load %arg2[%c8, %c0_49, %c0_50] : memref<73x64x64xbf16, #tpu.memory_space<vmem>>, vector<1x64x64xbf16>
    %67 = vector.shape_cast %66 : vector<1x64x64xbf16> to vector<64x64xbf16>
    %cst_51 = arith.constant dense<0.000000e+00> : vector<16x64xf32>
    %68 = tpu.matmul %65, %67, %cst_51 {dimension_numbers = #tpu.dot_dimension_numbers<[1], [0], [0], [1], [0, 0, 1, 1], [], []>} : vector<16x64xbf16>, vector<64x64xbf16>, vector<16x64xf32> -> vector<16x64xf32>
    %c8_52 = arith.constant 8 : index
    %c0_53 = arith.constant 0 : index
    %c0_54 = arith.constant 0 : index
    %69 = vector.load %arg3[%c8_52, %c0_53, %c0_54] : memref<73x1x64xf32, #tpu.memory_space<vmem>>, vector<1x1x64xf32>
    %70 = vector.shape_cast %69 : vector<1x1x64xf32> to vector<1x64xf32>
    %71 = vector.broadcast %70 : vector<1x64xf32> to vector<16x64xf32>
    %72 = arith.addf %68, %71 : vector<16x64xf32>
    %73 = arith.truncf %72 : vector<16x64xf32> to vector<16x64xbf16>
    %c9 = arith.constant 9 : index
    %c0_55 = arith.constant 0 : index
    %c0_56 = arith.constant 0 : index
    %74 = vector.load %arg2[%c9, %c0_55, %c0_56] : memref<73x64x64xbf16, #tpu.memory_space<vmem>>, vector<1x64x64xbf16>
    %75 = vector.shape_cast %74 : vector<1x64x64xbf16> to vector<64x64xbf16>
    %cst_57 = arith.constant dense<0.000000e+00> : vector<16x64xf32>
    %76 = tpu.matmul %73, %75, %cst_57 {dimension_numbers = #tpu.dot_dimension_numbers<[1], [0], [0], [1], [0, 0, 1, 1], [], []>} : vector<16x64xbf16>, vector<64x64xbf16>, vector<16x64xf32> -> vector<16x64xf32>
    %c9_58 = arith.constant 9 : index
    %c0_59 = arith.constant 0 : index
    %c0_60 = arith.constant 0 : index
    %77 = vector.load %arg3[%c9_58, %c0_59, %c0_60] : memref<73x1x64xf32, #tpu.memory_space<vmem>>, vector<1x1x64xf32>
    %78 = vector.shape_cast %77 : vector<1x1x64xf32> to vector<1x64xf32>
    %79 = vector.broadcast %78 : vector<1x64xf32> to vector<16x64xf32>
    %80 = arith.addf %76, %79 : vector<16x64xf32>
    %81 = arith.truncf %80 : vector<16x64xf32> to vector<16x64xbf16>
    %c10 = arith.constant 10 : index
    %c0_61 = arith.constant 0 : index
    %c0_62 = arith.constant 0 : index
    %82 = vector.load %arg2[%c10, %c0_61, %c0_62] : memref<73x64x64xbf16, #tpu.memory_space<vmem>>, vector<1x64x64xbf16>
    %83 = vector.shape_cast %82 : vector<1x64x64xbf16> to vector<64x64xbf16>
    %cst_63 = arith.constant dense<0.000000e+00> : vector<16x64xf32>
    %84 = tpu.matmul %81, %83, %cst_63 {dimension_numbers = #tpu.dot_dimension_numbers<[1], [0], [0], [1], [0, 0, 1, 1], [], []>} : vector<16x64xbf16>, vector<64x64xbf16>, vector<16x64xf32> -> vector<16x64xf32>
    %c10_64 = arith.constant 10 : index
    %c0_65 = arith.constant 0 : index
    %c0_66 = arith.constant 0 : index
    %85 = vector.load %arg3[%c10_64, %c0_65, %c0_66] : memref<73x1x64xf32, #tpu.memory_space<vmem>>, vector<1x1x64xf32>
    %86 = vector.shape_cast %85 : vector<1x1x64xf32> to vector<1x64xf32>
    %87 = vector.broadcast %86 : vector<1x64xf32> to vector<16x64xf32>
    %88 = arith.addf %84, %87 : vector<16x64xf32>
    %89 = arith.truncf %88 : vector<16x64xf32> to vector<16x64xbf16>
    %c11 = arith.constant 11 : index
    %c0_67 = arith.constant 0 : index
    %c0_68 = arith.constant 0 : index
    %90 = vector.load %arg2[%c11, %c0_67, %c0_68] : memref<73x64x64xbf16, #tpu.memory_space<vmem>>, vector<1x64x64xbf16>
    %91 = vector.shape_cast %90 : vector<1x64x64xbf16> to vector<64x64xbf16>
    %cst_69 = arith.constant dense<0.000000e+00> : vector<16x64xf32>
    %92 = tpu.matmul %89, %91, %cst_69 {dimension_numbers = #tpu.dot_dimension_numbers<[1], [0], [0], [1], [0, 0, 1, 1], [], []>} : vector<16x64xbf16>, vector<64x64xbf16>, vector<16x64xf32> -> vector<16x64xf32>
    %c11_70 = arith.constant 11 : index
    %c0_71 = arith.constant 0 : index
    %c0_72 = arith.constant 0 : index
    %93 = vector.load %arg3[%c11_70, %c0_71, %c0_72] : memref<73x1x64xf32, #tpu.memory_space<vmem>>, vector<1x1x64xf32>
    %94 = vector.shape_cast %93 : vector<1x1x64xf32> to vector<1x64xf32>
    %95 = vector.broadcast %94 : vector<1x64xf32> to vector<16x64xf32>
    %96 = arith.addf %92, %95 : vector<16x64xf32>
    %97 = arith.truncf %96 : vector<16x64xf32> to vector<16x64xbf16>
    %c12 = arith.constant 12 : index
    %c0_73 = arith.constant 0 : index
    %c0_74 = arith.constant 0 : index
    %98 = vector.load %arg2[%c12, %c0_73, %c0_74] : memref<73x64x64xbf16, #tpu.memory_space<vmem>>, vector<1x64x64xbf16>
    %99 = vector.shape_cast %98 : vector<1x64x64xbf16> to vector<64x64xbf16>
    %cst_75 = arith.constant dense<0.000000e+00> : vector<16x64xf32>
    %100 = tpu.matmul %97, %99, %cst_75 {dimension_numbers = #tpu.dot_dimension_numbers<[1], [0], [0], [1], [0, 0, 1, 1], [], []>} : vector<16x64xbf16>, vector<64x64xbf16>, vector<16x64xf32> -> vector<16x64xf32>
    %c12_76 = arith.constant 12 : index
    %c0_77 = arith.constant 0 : index
    %c0_78 = arith.constant 0 : index
    %101 = vector.load %arg3[%c12_76, %c0_77, %c0_78] : memref<73x1x64xf32, #tpu.memory_space<vmem>>, vector<1x1x64xf32>
    %102 = vector.shape_cast %101 : vector<1x1x64xf32> to vector<1x64xf32>
    %103 = vector.broadcast %102 : vector<1x64xf32> to vector<16x64xf32>
    %104 = arith.addf %100, %103 : vector<16x64xf32>
    %105 = arith.truncf %104 : vector<16x64xf32> to vector<16x64xbf16>
    %c13 = arith.constant 13 : index
    %c0_79 = arith.constant 0 : index
    %c0_80 = arith.constant 0 : index
    %106 = vector.load %arg2[%c13, %c0_79, %c0_80] : memref<73x64x64xbf16, #tpu.memory_space<vmem>>, vector<1x64x64xbf16>
    %107 = vector.shape_cast %106 : vector<1x64x64xbf16> to vector<64x64xbf16>
    %cst_81 = arith.constant dense<0.000000e+00> : vector<16x64xf32>
    %108 = tpu.matmul %105, %107, %cst_81 {dimension_numbers = #tpu.dot_dimension_numbers<[1], [0], [0], [1], [0, 0, 1, 1], [], []>} : vector<16x64xbf16>, vector<64x64xbf16>, vector<16x64xf32> -> vector<16x64xf32>
    %c13_82 = arith.constant 13 : index
    %c0_83 = arith.constant 0 : index
    %c0_84 = arith.constant 0 : index
    %109 = vector.load %arg3[%c13_82, %c0_83, %c0_84] : memref<73x1x64xf32, #tpu.memory_space<vmem>>, vector<1x1x64xf32>
    %110 = vector.shape_cast %109 : vector<1x1x64xf32> to vector<1x64xf32>
    %111 = vector.broadcast %110 : vector<1x64xf32> to vector<16x64xf32>
    %112 = arith.addf %108, %111 : vector<16x64xf32>
    %113 = arith.truncf %112 : vector<16x64xf32> to vector<16x64xbf16>
    %c14 = arith.constant 14 : index
    %c0_85 = arith.constant 0 : index
    %c0_86 = arith.constant 0 : index
    %114 = vector.load %arg2[%c14, %c0_85, %c0_86] : memref<73x64x64xbf16, #tpu.memory_space<vmem>>, vector<1x64x64xbf16>
    %115 = vector.shape_cast %114 : vector<1x64x64xbf16> to vector<64x64xbf16>
    %cst_87 = arith.constant dense<0.000000e+00> : vector<16x64xf32>
    %116 = tpu.matmul %113, %115, %cst_87 {dimension_numbers = #tpu.dot_dimension_numbers<[1], [0], [0], [1], [0, 0, 1, 1], [], []>} : vector<16x64xbf16>, vector<64x64xbf16>, vector<16x64xf32> -> vector<16x64xf32>
    %c14_88 = arith.constant 14 : index
    %c0_89 = arith.constant 0 : index
    %c0_90 = arith.constant 0 : index
    %117 = vector.load %arg3[%c14_88, %c0_89, %c0_90] : memref<73x1x64xf32, #tpu.memory_space<vmem>>, vector<1x1x64xf32>
    %118 = vector.shape_cast %117 : vector<1x1x64xf32> to vector<1x64xf32>
    %119 = vector.broadcast %118 : vector<1x64xf32> to vector<16x64xf32>
    %120 = arith.addf %116, %119 : vector<16x64xf32>
    %121 = arith.truncf %120 : vector<16x64xf32> to vector<16x64xbf16>
    %c15 = arith.constant 15 : index
    %c0_91 = arith.constant 0 : index
    %c0_92 = arith.constant 0 : index
    %122 = vector.load %arg2[%c15, %c0_91, %c0_92] : memref<73x64x64xbf16, #tpu.memory_space<vmem>>, vector<1x64x64xbf16>
    %123 = vector.shape_cast %122 : vector<1x64x64xbf16> to vector<64x64xbf16>
    %cst_93 = arith.constant dense<0.000000e+00> : vector<16x64xf32>
    %124 = tpu.matmul %121, %123, %cst_93 {dimension_numbers = #tpu.dot_dimension_numbers<[1], [0], [0], [1], [0, 0, 1, 1], [], []>} : vector<16x64xbf16>, vector<64x64xbf16>, vector<16x64xf32> -> vector<16x64xf32>
    %c15_94 = arith.constant 15 : index
    %c0_95 = arith.constant 0 : index
    %c0_96 = arith.constant 0 : index
    %125 = vector.load %arg3[%c15_94, %c0_95, %c0_96] : memref<73x1x64xf32, #tpu.memory_space<vmem>>, vector<1x1x64xf32>
    %126 = vector.shape_cast %125 : vector<1x1x64xf32> to vector<1x64xf32>
    %127 = vector.broadcast %126 : vector<1x64xf32> to vector<16x64xf32>
    %128 = arith.addf %124, %127 : vector<16x64xf32>
    %129 = arith.truncf %128 : vector<16x64xf32> to vector<16x64xbf16>
    %c16 = arith.constant 16 : index
    %c0_97 = arith.constant 0 : index
    %c0_98 = arith.constant 0 : index
    %130 = vector.load %arg2[%c16, %c0_97, %c0_98] : memref<73x64x64xbf16, #tpu.memory_space<vmem>>, vector<1x64x64xbf16>
    %131 = vector.shape_cast %130 : vector<1x64x64xbf16> to vector<64x64xbf16>
    %cst_99 = arith.constant dense<0.000000e+00> : vector<16x64xf32>
    %132 = tpu.matmul %129, %131, %cst_99 {dimension_numbers = #tpu.dot_dimension_numbers<[1], [0], [0], [1], [0, 0, 1, 1], [], []>} : vector<16x64xbf16>, vector<64x64xbf16>, vector<16x64xf32> -> vector<16x64xf32>
    %c16_100 = arith.constant 16 : index
    %c0_101 = arith.constant 0 : index
    %c0_102 = arith.constant 0 : index
    %133 = vector.load %arg3[%c16_100, %c0_101, %c0_102] : memref<73x1x64xf32, #tpu.memory_space<vmem>>, vector<1x1x64xf32>
    %134 = vector.shape_cast %133 : vector<1x1x64xf32> to vector<1x64xf32>
    %135 = vector.broadcast %134 : vector<1x64xf32> to vector<16x64xf32>
    %136 = arith.addf %132, %135 : vector<16x64xf32>
    %137 = arith.truncf %136 : vector<16x64xf32> to vector<16x64xbf16>
    %c17 = arith.constant 17 : index
    %c0_103 = arith.constant 0 : index
    %c0_104 = arith.constant 0 : index
    %138 = vector.load %arg2[%c17, %c0_103, %c0_104] : memref<73x64x64xbf16, #tpu.memory_space<vmem>>, vector<1x64x64xbf16>
    %139 = vector.shape_cast %138 : vector<1x64x64xbf16> to vector<64x64xbf16>
    %cst_105 = arith.constant dense<0.000000e+00> : vector<16x64xf32>
    %140 = tpu.matmul %137, %139, %cst_105 {dimension_numbers = #tpu.dot_dimension_numbers<[1], [0], [0], [1], [0, 0, 1, 1], [], []>} : vector<16x64xbf16>, vector<64x64xbf16>, vector<16x64xf32> -> vector<16x64xf32>
    %c17_106 = arith.constant 17 : index
    %c0_107 = arith.constant 0 : index
    %c0_108 = arith.constant 0 : index
    %141 = vector.load %arg3[%c17_106, %c0_107, %c0_108] : memref<73x1x64xf32, #tpu.memory_space<vmem>>, vector<1x1x64xf32>
    %142 = vector.shape_cast %141 : vector<1x1x64xf32> to vector<1x64xf32>
    %143 = vector.broadcast %142 : vector<1x64xf32> to vector<16x64xf32>
    %144 = arith.addf %140, %143 : vector<16x64xf32>
    %145 = arith.truncf %144 : vector<16x64xf32> to vector<16x64xbf16>
    %c18 = arith.constant 18 : index
    %c0_109 = arith.constant 0 : index
    %c0_110 = arith.constant 0 : index
    %146 = vector.load %arg2[%c18, %c0_109, %c0_110] : memref<73x64x64xbf16, #tpu.memory_space<vmem>>, vector<1x64x64xbf16>
    %147 = vector.shape_cast %146 : vector<1x64x64xbf16> to vector<64x64xbf16>
    %cst_111 = arith.constant dense<0.000000e+00> : vector<16x64xf32>
    %148 = tpu.matmul %145, %147, %cst_111 {dimension_numbers = #tpu.dot_dimension_numbers<[1], [0], [0], [1], [0, 0, 1, 1], [], []>} : vector<16x64xbf16>, vector<64x64xbf16>, vector<16x64xf32> -> vector<16x64xf32>
    %c18_112 = arith.constant 18 : index
    %c0_113 = arith.constant 0 : index
    %c0_114 = arith.constant 0 : index
    %149 = vector.load %arg3[%c18_112, %c0_113, %c0_114] : memref<73x1x64xf32, #tpu.memory_space<vmem>>, vector<1x1x64xf32>
    %150 = vector.shape_cast %149 : vector<1x1x64xf32> to vector<1x64xf32>
    %151 = vector.broadcast %150 : vector<1x64xf32> to vector<16x64xf32>
    %152 = arith.addf %148, %151 : vector<16x64xf32>
    %153 = arith.truncf %152 : vector<16x64xf32> to vector<16x64xbf16>
    %c19 = arith.constant 19 : index
    %c0_115 = arith.constant 0 : index
    %c0_116 = arith.constant 0 : index
    %154 = vector.load %arg2[%c19, %c0_115, %c0_116] : memref<73x64x64xbf16, #tpu.memory_space<vmem>>, vector<1x64x64xbf16>
    %155 = vector.shape_cast %154 : vector<1x64x64xbf16> to vector<64x64xbf16>
    %cst_117 = arith.constant dense<0.000000e+00> : vector<16x64xf32>
    %156 = tpu.matmul %153, %155, %cst_117 {dimension_numbers = #tpu.dot_dimension_numbers<[1], [0], [0], [1], [0, 0, 1, 1], [], []>} : vector<16x64xbf16>, vector<64x64xbf16>, vector<16x64xf32> -> vector<16x64xf32>
    %c19_118 = arith.constant 19 : index
    %c0_119 = arith.constant 0 : index
    %c0_120 = arith.constant 0 : index
    %157 = vector.load %arg3[%c19_118, %c0_119, %c0_120] : memref<73x1x64xf32, #tpu.memory_space<vmem>>, vector<1x1x64xf32>
    %158 = vector.shape_cast %157 : vector<1x1x64xf32> to vector<1x64xf32>
    %159 = vector.broadcast %158 : vector<1x64xf32> to vector<16x64xf32>
    %160 = arith.addf %156, %159 : vector<16x64xf32>
    %161 = arith.truncf %160 : vector<16x64xf32> to vector<16x64xbf16>
    %c20 = arith.constant 20 : index
    %c0_121 = arith.constant 0 : index
    %c0_122 = arith.constant 0 : index
    %162 = vector.load %arg2[%c20, %c0_121, %c0_122] : memref<73x64x64xbf16, #tpu.memory_space<vmem>>, vector<1x64x64xbf16>
    %163 = vector.shape_cast %162 : vector<1x64x64xbf16> to vector<64x64xbf16>
    %cst_123 = arith.constant dense<0.000000e+00> : vector<16x64xf32>
    %164 = tpu.matmul %161, %163, %cst_123 {dimension_numbers = #tpu.dot_dimension_numbers<[1], [0], [0], [1], [0, 0, 1, 1], [], []>} : vector<16x64xbf16>, vector<64x64xbf16>, vector<16x64xf32> -> vector<16x64xf32>
    %c20_124 = arith.constant 20 : index
    %c0_125 = arith.constant 0 : index
    %c0_126 = arith.constant 0 : index
    %165 = vector.load %arg3[%c20_124, %c0_125, %c0_126] : memref<73x1x64xf32, #tpu.memory_space<vmem>>, vector<1x1x64xf32>
    %166 = vector.shape_cast %165 : vector<1x1x64xf32> to vector<1x64xf32>
    %167 = vector.broadcast %166 : vector<1x64xf32> to vector<16x64xf32>
    %168 = arith.addf %164, %167 : vector<16x64xf32>
    %169 = arith.truncf %168 : vector<16x64xf32> to vector<16x64xbf16>
    %c21 = arith.constant 21 : index
    %c0_127 = arith.constant 0 : index
    %c0_128 = arith.constant 0 : index
    %170 = vector.load %arg2[%c21, %c0_127, %c0_128] : memref<73x64x64xbf16, #tpu.memory_space<vmem>>, vector<1x64x64xbf16>
    %171 = vector.shape_cast %170 : vector<1x64x64xbf16> to vector<64x64xbf16>
    %cst_129 = arith.constant dense<0.000000e+00> : vector<16x64xf32>
    %172 = tpu.matmul %169, %171, %cst_129 {dimension_numbers = #tpu.dot_dimension_numbers<[1], [0], [0], [1], [0, 0, 1, 1], [], []>} : vector<16x64xbf16>, vector<64x64xbf16>, vector<16x64xf32> -> vector<16x64xf32>
    %c21_130 = arith.constant 21 : index
    %c0_131 = arith.constant 0 : index
    %c0_132 = arith.constant 0 : index
    %173 = vector.load %arg3[%c21_130, %c0_131, %c0_132] : memref<73x1x64xf32, #tpu.memory_space<vmem>>, vector<1x1x64xf32>
    %174 = vector.shape_cast %173 : vector<1x1x64xf32> to vector<1x64xf32>
    %175 = vector.broadcast %174 : vector<1x64xf32> to vector<16x64xf32>
    %176 = arith.addf %172, %175 : vector<16x64xf32>
    %177 = arith.truncf %176 : vector<16x64xf32> to vector<16x64xbf16>
    %c22 = arith.constant 22 : index
    %c0_133 = arith.constant 0 : index
    %c0_134 = arith.constant 0 : index
    %178 = vector.load %arg2[%c22, %c0_133, %c0_134] : memref<73x64x64xbf16, #tpu.memory_space<vmem>>, vector<1x64x64xbf16>
    %179 = vector.shape_cast %178 : vector<1x64x64xbf16> to vector<64x64xbf16>
    %cst_135 = arith.constant dense<0.000000e+00> : vector<16x64xf32>
    %180 = tpu.matmul %177, %179, %cst_135 {dimension_numbers = #tpu.dot_dimension_numbers<[1], [0], [0], [1], [0, 0, 1, 1], [], []>} : vector<16x64xbf16>, vector<64x64xbf16>, vector<16x64xf32> -> vector<16x64xf32>
    %c22_136 = arith.constant 22 : index
    %c0_137 = arith.constant 0 : index
    %c0_138 = arith.constant 0 : index
    %181 = vector.load %arg3[%c22_136, %c0_137, %c0_138] : memref<73x1x64xf32, #tpu.memory_space<vmem>>, vector<1x1x64xf32>
    %182 = vector.shape_cast %181 : vector<1x1x64xf32> to vector<1x64xf32>
    %183 = vector.broadcast %182 : vector<1x64xf32> to vector<16x64xf32>
    %184 = arith.addf %180, %183 : vector<16x64xf32>
    %185 = arith.truncf %184 : vector<16x64xf32> to vector<16x64xbf16>
    %c23 = arith.constant 23 : index
    %c0_139 = arith.constant 0 : index
    %c0_140 = arith.constant 0 : index
    %186 = vector.load %arg2[%c23, %c0_139, %c0_140] : memref<73x64x64xbf16, #tpu.memory_space<vmem>>, vector<1x64x64xbf16>
    %187 = vector.shape_cast %186 : vector<1x64x64xbf16> to vector<64x64xbf16>
    %cst_141 = arith.constant dense<0.000000e+00> : vector<16x64xf32>
    %188 = tpu.matmul %185, %187, %cst_141 {dimension_numbers = #tpu.dot_dimension_numbers<[1], [0], [0], [1], [0, 0, 1, 1], [], []>} : vector<16x64xbf16>, vector<64x64xbf16>, vector<16x64xf32> -> vector<16x64xf32>
    %c23_142 = arith.constant 23 : index
    %c0_143 = arith.constant 0 : index
    %c0_144 = arith.constant 0 : index
    %189 = vector.load %arg3[%c23_142, %c0_143, %c0_144] : memref<73x1x64xf32, #tpu.memory_space<vmem>>, vector<1x1x64xf32>
    %190 = vector.shape_cast %189 : vector<1x1x64xf32> to vector<1x64xf32>
    %191 = vector.broadcast %190 : vector<1x64xf32> to vector<16x64xf32>
    %192 = arith.addf %188, %191 : vector<16x64xf32>
    %193 = arith.truncf %192 : vector<16x64xf32> to vector<16x64xbf16>
    %c24 = arith.constant 24 : index
    %c0_145 = arith.constant 0 : index
    %c0_146 = arith.constant 0 : index
    %194 = vector.load %arg2[%c24, %c0_145, %c0_146] : memref<73x64x64xbf16, #tpu.memory_space<vmem>>, vector<1x64x64xbf16>
    %195 = vector.shape_cast %194 : vector<1x64x64xbf16> to vector<64x64xbf16>
    %cst_147 = arith.constant dense<0.000000e+00> : vector<16x64xf32>
    %196 = tpu.matmul %193, %195, %cst_147 {dimension_numbers = #tpu.dot_dimension_numbers<[1], [0], [0], [1], [0, 0, 1, 1], [], []>} : vector<16x64xbf16>, vector<64x64xbf16>, vector<16x64xf32> -> vector<16x64xf32>
    %c24_148 = arith.constant 24 : index
    %c0_149 = arith.constant 0 : index
    %c0_150 = arith.constant 0 : index
    %197 = vector.load %arg3[%c24_148, %c0_149, %c0_150] : memref<73x1x64xf32, #tpu.memory_space<vmem>>, vector<1x1x64xf32>
    %198 = vector.shape_cast %197 : vector<1x1x64xf32> to vector<1x64xf32>
    %199 = vector.broadcast %198 : vector<1x64xf32> to vector<16x64xf32>
    %200 = arith.addf %196, %199 : vector<16x64xf32>
    %201 = arith.truncf %200 : vector<16x64xf32> to vector<16x64xbf16>
    %c25 = arith.constant 25 : index
    %c0_151 = arith.constant 0 : index
    %c0_152 = arith.constant 0 : index
    %202 = vector.load %arg2[%c25, %c0_151, %c0_152] : memref<73x64x64xbf16, #tpu.memory_space<vmem>>, vector<1x64x64xbf16>
    %203 = vector.shape_cast %202 : vector<1x64x64xbf16> to vector<64x64xbf16>
    %cst_153 = arith.constant dense<0.000000e+00> : vector<16x64xf32>
    %204 = tpu.matmul %201, %203, %cst_153 {dimension_numbers = #tpu.dot_dimension_numbers<[1], [0], [0], [1], [0, 0, 1, 1], [], []>} : vector<16x64xbf16>, vector<64x64xbf16>, vector<16x64xf32> -> vector<16x64xf32>
    %c25_154 = arith.constant 25 : index
    %c0_155 = arith.constant 0 : index
    %c0_156 = arith.constant 0 : index
    %205 = vector.load %arg3[%c25_154, %c0_155, %c0_156] : memref<73x1x64xf32, #tpu.memory_space<vmem>>, vector<1x1x64xf32>
    %206 = vector.shape_cast %205 : vector<1x1x64xf32> to vector<1x64xf32>
    %207 = vector.broadcast %206 : vector<1x64xf32> to vector<16x64xf32>
    %208 = arith.addf %204, %207 : vector<16x64xf32>
    %209 = arith.truncf %208 : vector<16x64xf32> to vector<16x64xbf16>
    %c26 = arith.constant 26 : index
    %c0_157 = arith.constant 0 : index
    %c0_158 = arith.constant 0 : index
    %210 = vector.load %arg2[%c26, %c0_157, %c0_158] : memref<73x64x64xbf16, #tpu.memory_space<vmem>>, vector<1x64x64xbf16>
    %211 = vector.shape_cast %210 : vector<1x64x64xbf16> to vector<64x64xbf16>
    %cst_159 = arith.constant dense<0.000000e+00> : vector<16x64xf32>
    %212 = tpu.matmul %209, %211, %cst_159 {dimension_numbers = #tpu.dot_dimension_numbers<[1], [0], [0], [1], [0, 0, 1, 1], [], []>} : vector<16x64xbf16>, vector<64x64xbf16>, vector<16x64xf32> -> vector<16x64xf32>
    %c26_160 = arith.constant 26 : index
    %c0_161 = arith.constant 0 : index
    %c0_162 = arith.constant 0 : index
    %213 = vector.load %arg3[%c26_160, %c0_161, %c0_162] : memref<73x1x64xf32, #tpu.memory_space<vmem>>, vector<1x1x64xf32>
    %214 = vector.shape_cast %213 : vector<1x1x64xf32> to vector<1x64xf32>
    %215 = vector.broadcast %214 : vector<1x64xf32> to vector<16x64xf32>
    %216 = arith.addf %212, %215 : vector<16x64xf32>
    %217 = arith.truncf %216 : vector<16x64xf32> to vector<16x64xbf16>
    %c27 = arith.constant 27 : index
    %c0_163 = arith.constant 0 : index
    %c0_164 = arith.constant 0 : index
    %218 = vector.load %arg2[%c27, %c0_163, %c0_164] : memref<73x64x64xbf16, #tpu.memory_space<vmem>>, vector<1x64x64xbf16>
    %219 = vector.shape_cast %218 : vector<1x64x64xbf16> to vector<64x64xbf16>
    %cst_165 = arith.constant dense<0.000000e+00> : vector<16x64xf32>
    %220 = tpu.matmul %217, %219, %cst_165 {dimension_numbers = #tpu.dot_dimension_numbers<[1], [0], [0], [1], [0, 0, 1, 1], [], []>} : vector<16x64xbf16>, vector<64x64xbf16>, vector<16x64xf32> -> vector<16x64xf32>
    %c27_166 = arith.constant 27 : index
    %c0_167 = arith.constant 0 : index
    %c0_168 = arith.constant 0 : index
    %221 = vector.load %arg3[%c27_166, %c0_167, %c0_168] : memref<73x1x64xf32, #tpu.memory_space<vmem>>, vector<1x1x64xf32>
    %222 = vector.shape_cast %221 : vector<1x1x64xf32> to vector<1x64xf32>
    %223 = vector.broadcast %222 : vector<1x64xf32> to vector<16x64xf32>
    %224 = arith.addf %220, %223 : vector<16x64xf32>
    %225 = arith.truncf %224 : vector<16x64xf32> to vector<16x64xbf16>
    %c28 = arith.constant 28 : index
    %c0_169 = arith.constant 0 : index
    %c0_170 = arith.constant 0 : index
    %226 = vector.load %arg2[%c28, %c0_169, %c0_170] : memref<73x64x64xbf16, #tpu.memory_space<vmem>>, vector<1x64x64xbf16>
    %227 = vector.shape_cast %226 : vector<1x64x64xbf16> to vector<64x64xbf16>
    %cst_171 = arith.constant dense<0.000000e+00> : vector<16x64xf32>
    %228 = tpu.matmul %225, %227, %cst_171 {dimension_numbers = #tpu.dot_dimension_numbers<[1], [0], [0], [1], [0, 0, 1, 1], [], []>} : vector<16x64xbf16>, vector<64x64xbf16>, vector<16x64xf32> -> vector<16x64xf32>
    %c28_172 = arith.constant 28 : index
    %c0_173 = arith.constant 0 : index
    %c0_174 = arith.constant 0 : index
    %229 = vector.load %arg3[%c28_172, %c0_173, %c0_174] : memref<73x1x64xf32, #tpu.memory_space<vmem>>, vector<1x1x64xf32>
    %230 = vector.shape_cast %229 : vector<1x1x64xf32> to vector<1x64xf32>
    %231 = vector.broadcast %230 : vector<1x64xf32> to vector<16x64xf32>
    %232 = arith.addf %228, %231 : vector<16x64xf32>
    %233 = arith.truncf %232 : vector<16x64xf32> to vector<16x64xbf16>
    %c29 = arith.constant 29 : index
    %c0_175 = arith.constant 0 : index
    %c0_176 = arith.constant 0 : index
    %234 = vector.load %arg2[%c29, %c0_175, %c0_176] : memref<73x64x64xbf16, #tpu.memory_space<vmem>>, vector<1x64x64xbf16>
    %235 = vector.shape_cast %234 : vector<1x64x64xbf16> to vector<64x64xbf16>
    %cst_177 = arith.constant dense<0.000000e+00> : vector<16x64xf32>
    %236 = tpu.matmul %233, %235, %cst_177 {dimension_numbers = #tpu.dot_dimension_numbers<[1], [0], [0], [1], [0, 0, 1, 1], [], []>} : vector<16x64xbf16>, vector<64x64xbf16>, vector<16x64xf32> -> vector<16x64xf32>
    %c29_178 = arith.constant 29 : index
    %c0_179 = arith.constant 0 : index
    %c0_180 = arith.constant 0 : index
    %237 = vector.load %arg3[%c29_178, %c0_179, %c0_180] : memref<73x1x64xf32, #tpu.memory_space<vmem>>, vector<1x1x64xf32>
    %238 = vector.shape_cast %237 : vector<1x1x64xf32> to vector<1x64xf32>
    %239 = vector.broadcast %238 : vector<1x64xf32> to vector<16x64xf32>
    %240 = arith.addf %236, %239 : vector<16x64xf32>
    %241 = arith.truncf %240 : vector<16x64xf32> to vector<16x64xbf16>
    %c30 = arith.constant 30 : index
    %c0_181 = arith.constant 0 : index
    %c0_182 = arith.constant 0 : index
    %242 = vector.load %arg2[%c30, %c0_181, %c0_182] : memref<73x64x64xbf16, #tpu.memory_space<vmem>>, vector<1x64x64xbf16>
    %243 = vector.shape_cast %242 : vector<1x64x64xbf16> to vector<64x64xbf16>
    %cst_183 = arith.constant dense<0.000000e+00> : vector<16x64xf32>
    %244 = tpu.matmul %241, %243, %cst_183 {dimension_numbers = #tpu.dot_dimension_numbers<[1], [0], [0], [1], [0, 0, 1, 1], [], []>} : vector<16x64xbf16>, vector<64x64xbf16>, vector<16x64xf32> -> vector<16x64xf32>
    %c30_184 = arith.constant 30 : index
    %c0_185 = arith.constant 0 : index
    %c0_186 = arith.constant 0 : index
    %245 = vector.load %arg3[%c30_184, %c0_185, %c0_186] : memref<73x1x64xf32, #tpu.memory_space<vmem>>, vector<1x1x64xf32>
    %246 = vector.shape_cast %245 : vector<1x1x64xf32> to vector<1x64xf32>
    %247 = vector.broadcast %246 : vector<1x64xf32> to vector<16x64xf32>
    %248 = arith.addf %244, %247 : vector<16x64xf32>
    %249 = arith.truncf %248 : vector<16x64xf32> to vector<16x64xbf16>
    %c31 = arith.constant 31 : index
    %c0_187 = arith.constant 0 : index
    %c0_188 = arith.constant 0 : index
    %250 = vector.load %arg2[%c31, %c0_187, %c0_188] : memref<73x64x64xbf16, #tpu.memory_space<vmem>>, vector<1x64x64xbf16>
    %251 = vector.shape_cast %250 : vector<1x64x64xbf16> to vector<64x64xbf16>
    %cst_189 = arith.constant dense<0.000000e+00> : vector<16x64xf32>
    %252 = tpu.matmul %249, %251, %cst_189 {dimension_numbers = #tpu.dot_dimension_numbers<[1], [0], [0], [1], [0, 0, 1, 1], [], []>} : vector<16x64xbf16>, vector<64x64xbf16>, vector<16x64xf32> -> vector<16x64xf32>
    %c31_190 = arith.constant 31 : index
    %c0_191 = arith.constant 0 : index
    %c0_192 = arith.constant 0 : index
    %253 = vector.load %arg3[%c31_190, %c0_191, %c0_192] : memref<73x1x64xf32, #tpu.memory_space<vmem>>, vector<1x1x64xf32>
    %254 = vector.shape_cast %253 : vector<1x1x64xf32> to vector<1x64xf32>
    %255 = vector.broadcast %254 : vector<1x64xf32> to vector<16x64xf32>
    %256 = arith.addf %252, %255 : vector<16x64xf32>
    %257 = arith.truncf %256 : vector<16x64xf32> to vector<16x64xbf16>
    %c32 = arith.constant 32 : index
    %c0_193 = arith.constant 0 : index
    %c0_194 = arith.constant 0 : index
    %258 = vector.load %arg2[%c32, %c0_193, %c0_194] : memref<73x64x64xbf16, #tpu.memory_space<vmem>>, vector<1x64x64xbf16>
    %259 = vector.shape_cast %258 : vector<1x64x64xbf16> to vector<64x64xbf16>
    %cst_195 = arith.constant dense<0.000000e+00> : vector<16x64xf32>
    %260 = tpu.matmul %257, %259, %cst_195 {dimension_numbers = #tpu.dot_dimension_numbers<[1], [0], [0], [1], [0, 0, 1, 1], [], []>} : vector<16x64xbf16>, vector<64x64xbf16>, vector<16x64xf32> -> vector<16x64xf32>
    %c32_196 = arith.constant 32 : index
    %c0_197 = arith.constant 0 : index
    %c0_198 = arith.constant 0 : index
    %261 = vector.load %arg3[%c32_196, %c0_197, %c0_198] : memref<73x1x64xf32, #tpu.memory_space<vmem>>, vector<1x1x64xf32>
    %262 = vector.shape_cast %261 : vector<1x1x64xf32> to vector<1x64xf32>
    %263 = vector.broadcast %262 : vector<1x64xf32> to vector<16x64xf32>
    %264 = arith.addf %260, %263 : vector<16x64xf32>
    %265 = arith.truncf %264 : vector<16x64xf32> to vector<16x64xbf16>
    %c33 = arith.constant 33 : index
    %c0_199 = arith.constant 0 : index
    %c0_200 = arith.constant 0 : index
    %266 = vector.load %arg2[%c33, %c0_199, %c0_200] : memref<73x64x64xbf16, #tpu.memory_space<vmem>>, vector<1x64x64xbf16>
    %267 = vector.shape_cast %266 : vector<1x64x64xbf16> to vector<64x64xbf16>
    %cst_201 = arith.constant dense<0.000000e+00> : vector<16x64xf32>
    %268 = tpu.matmul %265, %267, %cst_201 {dimension_numbers = #tpu.dot_dimension_numbers<[1], [0], [0], [1], [0, 0, 1, 1], [], []>} : vector<16x64xbf16>, vector<64x64xbf16>, vector<16x64xf32> -> vector<16x64xf32>
    %c33_202 = arith.constant 33 : index
    %c0_203 = arith.constant 0 : index
    %c0_204 = arith.constant 0 : index
    %269 = vector.load %arg3[%c33_202, %c0_203, %c0_204] : memref<73x1x64xf32, #tpu.memory_space<vmem>>, vector<1x1x64xf32>
    %270 = vector.shape_cast %269 : vector<1x1x64xf32> to vector<1x64xf32>
    %271 = vector.broadcast %270 : vector<1x64xf32> to vector<16x64xf32>
    %272 = arith.addf %268, %271 : vector<16x64xf32>
    %273 = arith.truncf %272 : vector<16x64xf32> to vector<16x64xbf16>
    %c34 = arith.constant 34 : index
    %c0_205 = arith.constant 0 : index
    %c0_206 = arith.constant 0 : index
    %274 = vector.load %arg2[%c34, %c0_205, %c0_206] : memref<73x64x64xbf16, #tpu.memory_space<vmem>>, vector<1x64x64xbf16>
    %275 = vector.shape_cast %274 : vector<1x64x64xbf16> to vector<64x64xbf16>
    %cst_207 = arith.constant dense<0.000000e+00> : vector<16x64xf32>
    %276 = tpu.matmul %273, %275, %cst_207 {dimension_numbers = #tpu.dot_dimension_numbers<[1], [0], [0], [1], [0, 0, 1, 1], [], []>} : vector<16x64xbf16>, vector<64x64xbf16>, vector<16x64xf32> -> vector<16x64xf32>
    %c34_208 = arith.constant 34 : index
    %c0_209 = arith.constant 0 : index
    %c0_210 = arith.constant 0 : index
    %277 = vector.load %arg3[%c34_208, %c0_209, %c0_210] : memref<73x1x64xf32, #tpu.memory_space<vmem>>, vector<1x1x64xf32>
    %278 = vector.shape_cast %277 : vector<1x1x64xf32> to vector<1x64xf32>
    %279 = vector.broadcast %278 : vector<1x64xf32> to vector<16x64xf32>
    %280 = arith.addf %276, %279 : vector<16x64xf32>
    %281 = arith.truncf %280 : vector<16x64xf32> to vector<16x64xbf16>
    %c35 = arith.constant 35 : index
    %c0_211 = arith.constant 0 : index
    %c0_212 = arith.constant 0 : index
    %282 = vector.load %arg2[%c35, %c0_211, %c0_212] : memref<73x64x64xbf16, #tpu.memory_space<vmem>>, vector<1x64x64xbf16>
    %283 = vector.shape_cast %282 : vector<1x64x64xbf16> to vector<64x64xbf16>
    %cst_213 = arith.constant dense<0.000000e+00> : vector<16x64xf32>
    %284 = tpu.matmul %281, %283, %cst_213 {dimension_numbers = #tpu.dot_dimension_numbers<[1], [0], [0], [1], [0, 0, 1, 1], [], []>} : vector<16x64xbf16>, vector<64x64xbf16>, vector<16x64xf32> -> vector<16x64xf32>
    %c35_214 = arith.constant 35 : index
    %c0_215 = arith.constant 0 : index
    %c0_216 = arith.constant 0 : index
    %285 = vector.load %arg3[%c35_214, %c0_215, %c0_216] : memref<73x1x64xf32, #tpu.memory_space<vmem>>, vector<1x1x64xf32>
    %286 = vector.shape_cast %285 : vector<1x1x64xf32> to vector<1x64xf32>
    %287 = vector.broadcast %286 : vector<1x64xf32> to vector<16x64xf32>
    %288 = arith.addf %284, %287 : vector<16x64xf32>
    %289 = arith.truncf %288 : vector<16x64xf32> to vector<16x64xbf16>
    %c36 = arith.constant 36 : index
    %c0_217 = arith.constant 0 : index
    %c0_218 = arith.constant 0 : index
    %290 = vector.load %arg2[%c36, %c0_217, %c0_218] : memref<73x64x64xbf16, #tpu.memory_space<vmem>>, vector<1x64x64xbf16>
    %291 = vector.shape_cast %290 : vector<1x64x64xbf16> to vector<64x64xbf16>
    %cst_219 = arith.constant dense<0.000000e+00> : vector<16x64xf32>
    %292 = tpu.matmul %289, %291, %cst_219 {dimension_numbers = #tpu.dot_dimension_numbers<[1], [0], [0], [1], [0, 0, 1, 1], [], []>} : vector<16x64xbf16>, vector<64x64xbf16>, vector<16x64xf32> -> vector<16x64xf32>
    %c36_220 = arith.constant 36 : index
    %c0_221 = arith.constant 0 : index
    %c0_222 = arith.constant 0 : index
    %293 = vector.load %arg3[%c36_220, %c0_221, %c0_222] : memref<73x1x64xf32, #tpu.memory_space<vmem>>, vector<1x1x64xf32>
    %294 = vector.shape_cast %293 : vector<1x1x64xf32> to vector<1x64xf32>
    %295 = vector.broadcast %294 : vector<1x64xf32> to vector<16x64xf32>
    %296 = arith.addf %292, %295 : vector<16x64xf32>
    %297 = arith.truncf %296 : vector<16x64xf32> to vector<16x64xbf16>
    %c37 = arith.constant 37 : index
    %c0_223 = arith.constant 0 : index
    %c0_224 = arith.constant 0 : index
    %298 = vector.load %arg2[%c37, %c0_223, %c0_224] : memref<73x64x64xbf16, #tpu.memory_space<vmem>>, vector<1x64x64xbf16>
    %299 = vector.shape_cast %298 : vector<1x64x64xbf16> to vector<64x64xbf16>
    %cst_225 = arith.constant dense<0.000000e+00> : vector<16x64xf32>
    %300 = tpu.matmul %297, %299, %cst_225 {dimension_numbers = #tpu.dot_dimension_numbers<[1], [0], [0], [1], [0, 0, 1, 1], [], []>} : vector<16x64xbf16>, vector<64x64xbf16>, vector<16x64xf32> -> vector<16x64xf32>
    %c37_226 = arith.constant 37 : index
    %c0_227 = arith.constant 0 : index
    %c0_228 = arith.constant 0 : index
    %301 = vector.load %arg3[%c37_226, %c0_227, %c0_228] : memref<73x1x64xf32, #tpu.memory_space<vmem>>, vector<1x1x64xf32>
    %302 = vector.shape_cast %301 : vector<1x1x64xf32> to vector<1x64xf32>
    %303 = vector.broadcast %302 : vector<1x64xf32> to vector<16x64xf32>
    %304 = arith.addf %300, %303 : vector<16x64xf32>
    %305 = arith.truncf %304 : vector<16x64xf32> to vector<16x64xbf16>
    %c38 = arith.constant 38 : index
    %c0_229 = arith.constant 0 : index
    %c0_230 = arith.constant 0 : index
    %306 = vector.load %arg2[%c38, %c0_229, %c0_230] : memref<73x64x64xbf16, #tpu.memory_space<vmem>>, vector<1x64x64xbf16>
    %307 = vector.shape_cast %306 : vector<1x64x64xbf16> to vector<64x64xbf16>
    %cst_231 = arith.constant dense<0.000000e+00> : vector<16x64xf32>
    %308 = tpu.matmul %305, %307, %cst_231 {dimension_numbers = #tpu.dot_dimension_numbers<[1], [0], [0], [1], [0, 0, 1, 1], [], []>} : vector<16x64xbf16>, vector<64x64xbf16>, vector<16x64xf32> -> vector<16x64xf32>
    %c38_232 = arith.constant 38 : index
    %c0_233 = arith.constant 0 : index
    %c0_234 = arith.constant 0 : index
    %309 = vector.load %arg3[%c38_232, %c0_233, %c0_234] : memref<73x1x64xf32, #tpu.memory_space<vmem>>, vector<1x1x64xf32>
    %310 = vector.shape_cast %309 : vector<1x1x64xf32> to vector<1x64xf32>
    %311 = vector.broadcast %310 : vector<1x64xf32> to vector<16x64xf32>
    %312 = arith.addf %308, %311 : vector<16x64xf32>
    %313 = arith.truncf %312 : vector<16x64xf32> to vector<16x64xbf16>
    %c39 = arith.constant 39 : index
    %c0_235 = arith.constant 0 : index
    %c0_236 = arith.constant 0 : index
    %314 = vector.load %arg2[%c39, %c0_235, %c0_236] : memref<73x64x64xbf16, #tpu.memory_space<vmem>>, vector<1x64x64xbf16>
    %315 = vector.shape_cast %314 : vector<1x64x64xbf16> to vector<64x64xbf16>
    %cst_237 = arith.constant dense<0.000000e+00> : vector<16x64xf32>
    %316 = tpu.matmul %313, %315, %cst_237 {dimension_numbers = #tpu.dot_dimension_numbers<[1], [0], [0], [1], [0, 0, 1, 1], [], []>} : vector<16x64xbf16>, vector<64x64xbf16>, vector<16x64xf32> -> vector<16x64xf32>
    %c39_238 = arith.constant 39 : index
    %c0_239 = arith.constant 0 : index
    %c0_240 = arith.constant 0 : index
    %317 = vector.load %arg3[%c39_238, %c0_239, %c0_240] : memref<73x1x64xf32, #tpu.memory_space<vmem>>, vector<1x1x64xf32>
    %318 = vector.shape_cast %317 : vector<1x1x64xf32> to vector<1x64xf32>
    %319 = vector.broadcast %318 : vector<1x64xf32> to vector<16x64xf32>
    %320 = arith.addf %316, %319 : vector<16x64xf32>
    %321 = arith.truncf %320 : vector<16x64xf32> to vector<16x64xbf16>
    %c40 = arith.constant 40 : index
    %c0_241 = arith.constant 0 : index
    %c0_242 = arith.constant 0 : index
    %322 = vector.load %arg2[%c40, %c0_241, %c0_242] : memref<73x64x64xbf16, #tpu.memory_space<vmem>>, vector<1x64x64xbf16>
    %323 = vector.shape_cast %322 : vector<1x64x64xbf16> to vector<64x64xbf16>
    %cst_243 = arith.constant dense<0.000000e+00> : vector<16x64xf32>
    %324 = tpu.matmul %321, %323, %cst_243 {dimension_numbers = #tpu.dot_dimension_numbers<[1], [0], [0], [1], [0, 0, 1, 1], [], []>} : vector<16x64xbf16>, vector<64x64xbf16>, vector<16x64xf32> -> vector<16x64xf32>
    %c40_244 = arith.constant 40 : index
    %c0_245 = arith.constant 0 : index
    %c0_246 = arith.constant 0 : index
    %325 = vector.load %arg3[%c40_244, %c0_245, %c0_246] : memref<73x1x64xf32, #tpu.memory_space<vmem>>, vector<1x1x64xf32>
    %326 = vector.shape_cast %325 : vector<1x1x64xf32> to vector<1x64xf32>
    %327 = vector.broadcast %326 : vector<1x64xf32> to vector<16x64xf32>
    %328 = arith.addf %324, %327 : vector<16x64xf32>
    %329 = arith.truncf %328 : vector<16x64xf32> to vector<16x64xbf16>
    %c41 = arith.constant 41 : index
    %c0_247 = arith.constant 0 : index
    %c0_248 = arith.constant 0 : index
    %330 = vector.load %arg2[%c41, %c0_247, %c0_248] : memref<73x64x64xbf16, #tpu.memory_space<vmem>>, vector<1x64x64xbf16>
    %331 = vector.shape_cast %330 : vector<1x64x64xbf16> to vector<64x64xbf16>
    %cst_249 = arith.constant dense<0.000000e+00> : vector<16x64xf32>
    %332 = tpu.matmul %329, %331, %cst_249 {dimension_numbers = #tpu.dot_dimension_numbers<[1], [0], [0], [1], [0, 0, 1, 1], [], []>} : vector<16x64xbf16>, vector<64x64xbf16>, vector<16x64xf32> -> vector<16x64xf32>
    %c41_250 = arith.constant 41 : index
    %c0_251 = arith.constant 0 : index
    %c0_252 = arith.constant 0 : index
    %333 = vector.load %arg3[%c41_250, %c0_251, %c0_252] : memref<73x1x64xf32, #tpu.memory_space<vmem>>, vector<1x1x64xf32>
    %334 = vector.shape_cast %333 : vector<1x1x64xf32> to vector<1x64xf32>
    %335 = vector.broadcast %334 : vector<1x64xf32> to vector<16x64xf32>
    %336 = arith.addf %332, %335 : vector<16x64xf32>
    %337 = arith.truncf %336 : vector<16x64xf32> to vector<16x64xbf16>
    %c42 = arith.constant 42 : index
    %c0_253 = arith.constant 0 : index
    %c0_254 = arith.constant 0 : index
    %338 = vector.load %arg2[%c42, %c0_253, %c0_254] : memref<73x64x64xbf16, #tpu.memory_space<vmem>>, vector<1x64x64xbf16>
    %339 = vector.shape_cast %338 : vector<1x64x64xbf16> to vector<64x64xbf16>
    %cst_255 = arith.constant dense<0.000000e+00> : vector<16x64xf32>
    %340 = tpu.matmul %337, %339, %cst_255 {dimension_numbers = #tpu.dot_dimension_numbers<[1], [0], [0], [1], [0, 0, 1, 1], [], []>} : vector<16x64xbf16>, vector<64x64xbf16>, vector<16x64xf32> -> vector<16x64xf32>
    %c42_256 = arith.constant 42 : index
    %c0_257 = arith.constant 0 : index
    %c0_258 = arith.constant 0 : index
    %341 = vector.load %arg3[%c42_256, %c0_257, %c0_258] : memref<73x1x64xf32, #tpu.memory_space<vmem>>, vector<1x1x64xf32>
    %342 = vector.shape_cast %341 : vector<1x1x64xf32> to vector<1x64xf32>
    %343 = vector.broadcast %342 : vector<1x64xf32> to vector<16x64xf32>
    %344 = arith.addf %340, %343 : vector<16x64xf32>
    %345 = arith.truncf %344 : vector<16x64xf32> to vector<16x64xbf16>
    %c43 = arith.constant 43 : index
    %c0_259 = arith.constant 0 : index
    %c0_260 = arith.constant 0 : index
    %346 = vector.load %arg2[%c43, %c0_259, %c0_260] : memref<73x64x64xbf16, #tpu.memory_space<vmem>>, vector<1x64x64xbf16>
    %347 = vector.shape_cast %346 : vector<1x64x64xbf16> to vector<64x64xbf16>
    %cst_261 = arith.constant dense<0.000000e+00> : vector<16x64xf32>
    %348 = tpu.matmul %345, %347, %cst_261 {dimension_numbers = #tpu.dot_dimension_numbers<[1], [0], [0], [1], [0, 0, 1, 1], [], []>} : vector<16x64xbf16>, vector<64x64xbf16>, vector<16x64xf32> -> vector<16x64xf32>
    %c43_262 = arith.constant 43 : index
    %c0_263 = arith.constant 0 : index
    %c0_264 = arith.constant 0 : index
    %349 = vector.load %arg3[%c43_262, %c0_263, %c0_264] : memref<73x1x64xf32, #tpu.memory_space<vmem>>, vector<1x1x64xf32>
    %350 = vector.shape_cast %349 : vector<1x1x64xf32> to vector<1x64xf32>
    %351 = vector.broadcast %350 : vector<1x64xf32> to vector<16x64xf32>
    %352 = arith.addf %348, %351 : vector<16x64xf32>
    %353 = arith.truncf %352 : vector<16x64xf32> to vector<16x64xbf16>
    %c44 = arith.constant 44 : index
    %c0_265 = arith.constant 0 : index
    %c0_266 = arith.constant 0 : index
    %354 = vector.load %arg2[%c44, %c0_265, %c0_266] : memref<73x64x64xbf16, #tpu.memory_space<vmem>>, vector<1x64x64xbf16>
    %355 = vector.shape_cast %354 : vector<1x64x64xbf16> to vector<64x64xbf16>
    %cst_267 = arith.constant dense<0.000000e+00> : vector<16x64xf32>
    %356 = tpu.matmul %353, %355, %cst_267 {dimension_numbers = #tpu.dot_dimension_numbers<[1], [0], [0], [1], [0, 0, 1, 1], [], []>} : vector<16x64xbf16>, vector<64x64xbf16>, vector<16x64xf32> -> vector<16x64xf32>
    %c44_268 = arith.constant 44 : index
    %c0_269 = arith.constant 0 : index
    %c0_270 = arith.constant 0 : index
    %357 = vector.load %arg3[%c44_268, %c0_269, %c0_270] : memref<73x1x64xf32, #tpu.memory_space<vmem>>, vector<1x1x64xf32>
    %358 = vector.shape_cast %357 : vector<1x1x64xf32> to vector<1x64xf32>
    %359 = vector.broadcast %358 : vector<1x64xf32> to vector<16x64xf32>
    %360 = arith.addf %356, %359 : vector<16x64xf32>
    %361 = arith.truncf %360 : vector<16x64xf32> to vector<16x64xbf16>
    %c45 = arith.constant 45 : index
    %c0_271 = arith.constant 0 : index
    %c0_272 = arith.constant 0 : index
    %362 = vector.load %arg2[%c45, %c0_271, %c0_272] : memref<73x64x64xbf16, #tpu.memory_space<vmem>>, vector<1x64x64xbf16>
    %363 = vector.shape_cast %362 : vector<1x64x64xbf16> to vector<64x64xbf16>
    %cst_273 = arith.constant dense<0.000000e+00> : vector<16x64xf32>
    %364 = tpu.matmul %361, %363, %cst_273 {dimension_numbers = #tpu.dot_dimension_numbers<[1], [0], [0], [1], [0, 0, 1, 1], [], []>} : vector<16x64xbf16>, vector<64x64xbf16>, vector<16x64xf32> -> vector<16x64xf32>
    %c45_274 = arith.constant 45 : index
    %c0_275 = arith.constant 0 : index
    %c0_276 = arith.constant 0 : index
    %365 = vector.load %arg3[%c45_274, %c0_275, %c0_276] : memref<73x1x64xf32, #tpu.memory_space<vmem>>, vector<1x1x64xf32>
    %366 = vector.shape_cast %365 : vector<1x1x64xf32> to vector<1x64xf32>
    %367 = vector.broadcast %366 : vector<1x64xf32> to vector<16x64xf32>
    %368 = arith.addf %364, %367 : vector<16x64xf32>
    %369 = arith.truncf %368 : vector<16x64xf32> to vector<16x64xbf16>
    %c46 = arith.constant 46 : index
    %c0_277 = arith.constant 0 : index
    %c0_278 = arith.constant 0 : index
    %370 = vector.load %arg2[%c46, %c0_277, %c0_278] : memref<73x64x64xbf16, #tpu.memory_space<vmem>>, vector<1x64x64xbf16>
    %371 = vector.shape_cast %370 : vector<1x64x64xbf16> to vector<64x64xbf16>
    %cst_279 = arith.constant dense<0.000000e+00> : vector<16x64xf32>
    %372 = tpu.matmul %369, %371, %cst_279 {dimension_numbers = #tpu.dot_dimension_numbers<[1], [0], [0], [1], [0, 0, 1, 1], [], []>} : vector<16x64xbf16>, vector<64x64xbf16>, vector<16x64xf32> -> vector<16x64xf32>
    %c46_280 = arith.constant 46 : index
    %c0_281 = arith.constant 0 : index
    %c0_282 = arith.constant 0 : index
    %373 = vector.load %arg3[%c46_280, %c0_281, %c0_282] : memref<73x1x64xf32, #tpu.memory_space<vmem>>, vector<1x1x64xf32>
    %374 = vector.shape_cast %373 : vector<1x1x64xf32> to vector<1x64xf32>
    %375 = vector.broadcast %374 : vector<1x64xf32> to vector<16x64xf32>
    %376 = arith.addf %372, %375 : vector<16x64xf32>
    %377 = arith.truncf %376 : vector<16x64xf32> to vector<16x64xbf16>
    %c47 = arith.constant 47 : index
    %c0_283 = arith.constant 0 : index
    %c0_284 = arith.constant 0 : index
    %378 = vector.load %arg2[%c47, %c0_283, %c0_284] : memref<73x64x64xbf16, #tpu.memory_space<vmem>>, vector<1x64x64xbf16>
    %379 = vector.shape_cast %378 : vector<1x64x64xbf16> to vector<64x64xbf16>
    %cst_285 = arith.constant dense<0.000000e+00> : vector<16x64xf32>
    %380 = tpu.matmul %377, %379, %cst_285 {dimension_numbers = #tpu.dot_dimension_numbers<[1], [0], [0], [1], [0, 0, 1, 1], [], []>} : vector<16x64xbf16>, vector<64x64xbf16>, vector<16x64xf32> -> vector<16x64xf32>
    %c47_286 = arith.constant 47 : index
    %c0_287 = arith.constant 0 : index
    %c0_288 = arith.constant 0 : index
    %381 = vector.load %arg3[%c47_286, %c0_287, %c0_288] : memref<73x1x64xf32, #tpu.memory_space<vmem>>, vector<1x1x64xf32>
    %382 = vector.shape_cast %381 : vector<1x1x64xf32> to vector<1x64xf32>
    %383 = vector.broadcast %382 : vector<1x64xf32> to vector<16x64xf32>
    %384 = arith.addf %380, %383 : vector<16x64xf32>
    %385 = arith.truncf %384 : vector<16x64xf32> to vector<16x64xbf16>
    %c48 = arith.constant 48 : index
    %c0_289 = arith.constant 0 : index
    %c0_290 = arith.constant 0 : index
    %386 = vector.load %arg2[%c48, %c0_289, %c0_290] : memref<73x64x64xbf16, #tpu.memory_space<vmem>>, vector<1x64x64xbf16>
    %387 = vector.shape_cast %386 : vector<1x64x64xbf16> to vector<64x64xbf16>
    %cst_291 = arith.constant dense<0.000000e+00> : vector<16x64xf32>
    %388 = tpu.matmul %385, %387, %cst_291 {dimension_numbers = #tpu.dot_dimension_numbers<[1], [0], [0], [1], [0, 0, 1, 1], [], []>} : vector<16x64xbf16>, vector<64x64xbf16>, vector<16x64xf32> -> vector<16x64xf32>
    %c48_292 = arith.constant 48 : index
    %c0_293 = arith.constant 0 : index
    %c0_294 = arith.constant 0 : index
    %389 = vector.load %arg3[%c48_292, %c0_293, %c0_294] : memref<73x1x64xf32, #tpu.memory_space<vmem>>, vector<1x1x64xf32>
    %390 = vector.shape_cast %389 : vector<1x1x64xf32> to vector<1x64xf32>
    %391 = vector.broadcast %390 : vector<1x64xf32> to vector<16x64xf32>
    %392 = arith.addf %388, %391 : vector<16x64xf32>
    %393 = arith.truncf %392 : vector<16x64xf32> to vector<16x64xbf16>
    %c49 = arith.constant 49 : index
    %c0_295 = arith.constant 0 : index
    %c0_296 = arith.constant 0 : index
    %394 = vector.load %arg2[%c49, %c0_295, %c0_296] : memref<73x64x64xbf16, #tpu.memory_space<vmem>>, vector<1x64x64xbf16>
    %395 = vector.shape_cast %394 : vector<1x64x64xbf16> to vector<64x64xbf16>
    %cst_297 = arith.constant dense<0.000000e+00> : vector<16x64xf32>
    %396 = tpu.matmul %393, %395, %cst_297 {dimension_numbers = #tpu.dot_dimension_numbers<[1], [0], [0], [1], [0, 0, 1, 1], [], []>} : vector<16x64xbf16>, vector<64x64xbf16>, vector<16x64xf32> -> vector<16x64xf32>
    %c49_298 = arith.constant 49 : index
    %c0_299 = arith.constant 0 : index
    %c0_300 = arith.constant 0 : index
    %397 = vector.load %arg3[%c49_298, %c0_299, %c0_300] : memref<73x1x64xf32, #tpu.memory_space<vmem>>, vector<1x1x64xf32>
    %398 = vector.shape_cast %397 : vector<1x1x64xf32> to vector<1x64xf32>
    %399 = vector.broadcast %398 : vector<1x64xf32> to vector<16x64xf32>
    %400 = arith.addf %396, %399 : vector<16x64xf32>
    %401 = arith.truncf %400 : vector<16x64xf32> to vector<16x64xbf16>
    %c50 = arith.constant 50 : index
    %c0_301 = arith.constant 0 : index
    %c0_302 = arith.constant 0 : index
    %402 = vector.load %arg2[%c50, %c0_301, %c0_302] : memref<73x64x64xbf16, #tpu.memory_space<vmem>>, vector<1x64x64xbf16>
    %403 = vector.shape_cast %402 : vector<1x64x64xbf16> to vector<64x64xbf16>
    %cst_303 = arith.constant dense<0.000000e+00> : vector<16x64xf32>
    %404 = tpu.matmul %401, %403, %cst_303 {dimension_numbers = #tpu.dot_dimension_numbers<[1], [0], [0], [1], [0, 0, 1, 1], [], []>} : vector<16x64xbf16>, vector<64x64xbf16>, vector<16x64xf32> -> vector<16x64xf32>
    %c50_304 = arith.constant 50 : index
    %c0_305 = arith.constant 0 : index
    %c0_306 = arith.constant 0 : index
    %405 = vector.load %arg3[%c50_304, %c0_305, %c0_306] : memref<73x1x64xf32, #tpu.memory_space<vmem>>, vector<1x1x64xf32>
    %406 = vector.shape_cast %405 : vector<1x1x64xf32> to vector<1x64xf32>
    %407 = vector.broadcast %406 : vector<1x64xf32> to vector<16x64xf32>
    %408 = arith.addf %404, %407 : vector<16x64xf32>
    %409 = arith.truncf %408 : vector<16x64xf32> to vector<16x64xbf16>
    %c51 = arith.constant 51 : index
    %c0_307 = arith.constant 0 : index
    %c0_308 = arith.constant 0 : index
    %410 = vector.load %arg2[%c51, %c0_307, %c0_308] : memref<73x64x64xbf16, #tpu.memory_space<vmem>>, vector<1x64x64xbf16>
    %411 = vector.shape_cast %410 : vector<1x64x64xbf16> to vector<64x64xbf16>
    %cst_309 = arith.constant dense<0.000000e+00> : vector<16x64xf32>
    %412 = tpu.matmul %409, %411, %cst_309 {dimension_numbers = #tpu.dot_dimension_numbers<[1], [0], [0], [1], [0, 0, 1, 1], [], []>} : vector<16x64xbf16>, vector<64x64xbf16>, vector<16x64xf32> -> vector<16x64xf32>
    %c51_310 = arith.constant 51 : index
    %c0_311 = arith.constant 0 : index
    %c0_312 = arith.constant 0 : index
    %413 = vector.load %arg3[%c51_310, %c0_311, %c0_312] : memref<73x1x64xf32, #tpu.memory_space<vmem>>, vector<1x1x64xf32>
    %414 = vector.shape_cast %413 : vector<1x1x64xf32> to vector<1x64xf32>
    %415 = vector.broadcast %414 : vector<1x64xf32> to vector<16x64xf32>
    %416 = arith.addf %412, %415 : vector<16x64xf32>
    %417 = arith.truncf %416 : vector<16x64xf32> to vector<16x64xbf16>
    %c52 = arith.constant 52 : index
    %c0_313 = arith.constant 0 : index
    %c0_314 = arith.constant 0 : index
    %418 = vector.load %arg2[%c52, %c0_313, %c0_314] : memref<73x64x64xbf16, #tpu.memory_space<vmem>>, vector<1x64x64xbf16>
    %419 = vector.shape_cast %418 : vector<1x64x64xbf16> to vector<64x64xbf16>
    %cst_315 = arith.constant dense<0.000000e+00> : vector<16x64xf32>
    %420 = tpu.matmul %417, %419, %cst_315 {dimension_numbers = #tpu.dot_dimension_numbers<[1], [0], [0], [1], [0, 0, 1, 1], [], []>} : vector<16x64xbf16>, vector<64x64xbf16>, vector<16x64xf32> -> vector<16x64xf32>
    %c52_316 = arith.constant 52 : index
    %c0_317 = arith.constant 0 : index
    %c0_318 = arith.constant 0 : index
    %421 = vector.load %arg3[%c52_316, %c0_317, %c0_318] : memref<73x1x64xf32, #tpu.memory_space<vmem>>, vector<1x1x64xf32>
    %422 = vector.shape_cast %421 : vector<1x1x64xf32> to vector<1x64xf32>
    %423 = vector.broadcast %422 : vector<1x64xf32> to vector<16x64xf32>
    %424 = arith.addf %420, %423 : vector<16x64xf32>
    %425 = arith.truncf %424 : vector<16x64xf32> to vector<16x64xbf16>
    %c53 = arith.constant 53 : index
    %c0_319 = arith.constant 0 : index
    %c0_320 = arith.constant 0 : index
    %426 = vector.load %arg2[%c53, %c0_319, %c0_320] : memref<73x64x64xbf16, #tpu.memory_space<vmem>>, vector<1x64x64xbf16>
    %427 = vector.shape_cast %426 : vector<1x64x64xbf16> to vector<64x64xbf16>
    %cst_321 = arith.constant dense<0.000000e+00> : vector<16x64xf32>
    %428 = tpu.matmul %425, %427, %cst_321 {dimension_numbers = #tpu.dot_dimension_numbers<[1], [0], [0], [1], [0, 0, 1, 1], [], []>} : vector<16x64xbf16>, vector<64x64xbf16>, vector<16x64xf32> -> vector<16x64xf32>
    %c53_322 = arith.constant 53 : index
    %c0_323 = arith.constant 0 : index
    %c0_324 = arith.constant 0 : index
    %429 = vector.load %arg3[%c53_322, %c0_323, %c0_324] : memref<73x1x64xf32, #tpu.memory_space<vmem>>, vector<1x1x64xf32>
    %430 = vector.shape_cast %429 : vector<1x1x64xf32> to vector<1x64xf32>
    %431 = vector.broadcast %430 : vector<1x64xf32> to vector<16x64xf32>
    %432 = arith.addf %428, %431 : vector<16x64xf32>
    %433 = arith.truncf %432 : vector<16x64xf32> to vector<16x64xbf16>
    %c54 = arith.constant 54 : index
    %c0_325 = arith.constant 0 : index
    %c0_326 = arith.constant 0 : index
    %434 = vector.load %arg2[%c54, %c0_325, %c0_326] : memref<73x64x64xbf16, #tpu.memory_space<vmem>>, vector<1x64x64xbf16>
    %435 = vector.shape_cast %434 : vector<1x64x64xbf16> to vector<64x64xbf16>
    %cst_327 = arith.constant dense<0.000000e+00> : vector<16x64xf32>
    %436 = tpu.matmul %433, %435, %cst_327 {dimension_numbers = #tpu.dot_dimension_numbers<[1], [0], [0], [1], [0, 0, 1, 1], [], []>} : vector<16x64xbf16>, vector<64x64xbf16>, vector<16x64xf32> -> vector<16x64xf32>
    %c54_328 = arith.constant 54 : index
    %c0_329 = arith.constant 0 : index
    %c0_330 = arith.constant 0 : index
    %437 = vector.load %arg3[%c54_328, %c0_329, %c0_330] : memref<73x1x64xf32, #tpu.memory_space<vmem>>, vector<1x1x64xf32>
    %438 = vector.shape_cast %437 : vector<1x1x64xf32> to vector<1x64xf32>
    %439 = vector.broadcast %438 : vector<1x64xf32> to vector<16x64xf32>
    %440 = arith.addf %436, %439 : vector<16x64xf32>
    %441 = arith.truncf %440 : vector<16x64xf32> to vector<16x64xbf16>
    %c55 = arith.constant 55 : index
    %c0_331 = arith.constant 0 : index
    %c0_332 = arith.constant 0 : index
    %442 = vector.load %arg2[%c55, %c0_331, %c0_332] : memref<73x64x64xbf16, #tpu.memory_space<vmem>>, vector<1x64x64xbf16>
    %443 = vector.shape_cast %442 : vector<1x64x64xbf16> to vector<64x64xbf16>
    %cst_333 = arith.constant dense<0.000000e+00> : vector<16x64xf32>
    %444 = tpu.matmul %441, %443, %cst_333 {dimension_numbers = #tpu.dot_dimension_numbers<[1], [0], [0], [1], [0, 0, 1, 1], [], []>} : vector<16x64xbf16>, vector<64x64xbf16>, vector<16x64xf32> -> vector<16x64xf32>
    %c55_334 = arith.constant 55 : index
    %c0_335 = arith.constant 0 : index
    %c0_336 = arith.constant 0 : index
    %445 = vector.load %arg3[%c55_334, %c0_335, %c0_336] : memref<73x1x64xf32, #tpu.memory_space<vmem>>, vector<1x1x64xf32>
    %446 = vector.shape_cast %445 : vector<1x1x64xf32> to vector<1x64xf32>
    %447 = vector.broadcast %446 : vector<1x64xf32> to vector<16x64xf32>
    %448 = arith.addf %444, %447 : vector<16x64xf32>
    %449 = arith.truncf %448 : vector<16x64xf32> to vector<16x64xbf16>
    %c56 = arith.constant 56 : index
    %c0_337 = arith.constant 0 : index
    %c0_338 = arith.constant 0 : index
    %450 = vector.load %arg2[%c56, %c0_337, %c0_338] : memref<73x64x64xbf16, #tpu.memory_space<vmem>>, vector<1x64x64xbf16>
    %451 = vector.shape_cast %450 : vector<1x64x64xbf16> to vector<64x64xbf16>
    %cst_339 = arith.constant dense<0.000000e+00> : vector<16x64xf32>
    %452 = tpu.matmul %449, %451, %cst_339 {dimension_numbers = #tpu.dot_dimension_numbers<[1], [0], [0], [1], [0, 0, 1, 1], [], []>} : vector<16x64xbf16>, vector<64x64xbf16>, vector<16x64xf32> -> vector<16x64xf32>
    %c56_340 = arith.constant 56 : index
    %c0_341 = arith.constant 0 : index
    %c0_342 = arith.constant 0 : index
    %453 = vector.load %arg3[%c56_340, %c0_341, %c0_342] : memref<73x1x64xf32, #tpu.memory_space<vmem>>, vector<1x1x64xf32>
    %454 = vector.shape_cast %453 : vector<1x1x64xf32> to vector<1x64xf32>
    %455 = vector.broadcast %454 : vector<1x64xf32> to vector<16x64xf32>
    %456 = arith.addf %452, %455 : vector<16x64xf32>
    %457 = arith.truncf %456 : vector<16x64xf32> to vector<16x64xbf16>
    %c57 = arith.constant 57 : index
    %c0_343 = arith.constant 0 : index
    %c0_344 = arith.constant 0 : index
    %458 = vector.load %arg2[%c57, %c0_343, %c0_344] : memref<73x64x64xbf16, #tpu.memory_space<vmem>>, vector<1x64x64xbf16>
    %459 = vector.shape_cast %458 : vector<1x64x64xbf16> to vector<64x64xbf16>
    %cst_345 = arith.constant dense<0.000000e+00> : vector<16x64xf32>
    %460 = tpu.matmul %457, %459, %cst_345 {dimension_numbers = #tpu.dot_dimension_numbers<[1], [0], [0], [1], [0, 0, 1, 1], [], []>} : vector<16x64xbf16>, vector<64x64xbf16>, vector<16x64xf32> -> vector<16x64xf32>
    %c57_346 = arith.constant 57 : index
    %c0_347 = arith.constant 0 : index
    %c0_348 = arith.constant 0 : index
    %461 = vector.load %arg3[%c57_346, %c0_347, %c0_348] : memref<73x1x64xf32, #tpu.memory_space<vmem>>, vector<1x1x64xf32>
    %462 = vector.shape_cast %461 : vector<1x1x64xf32> to vector<1x64xf32>
    %463 = vector.broadcast %462 : vector<1x64xf32> to vector<16x64xf32>
    %464 = arith.addf %460, %463 : vector<16x64xf32>
    %465 = arith.truncf %464 : vector<16x64xf32> to vector<16x64xbf16>
    %c58 = arith.constant 58 : index
    %c0_349 = arith.constant 0 : index
    %c0_350 = arith.constant 0 : index
    %466 = vector.load %arg2[%c58, %c0_349, %c0_350] : memref<73x64x64xbf16, #tpu.memory_space<vmem>>, vector<1x64x64xbf16>
    %467 = vector.shape_cast %466 : vector<1x64x64xbf16> to vector<64x64xbf16>
    %cst_351 = arith.constant dense<0.000000e+00> : vector<16x64xf32>
    %468 = tpu.matmul %465, %467, %cst_351 {dimension_numbers = #tpu.dot_dimension_numbers<[1], [0], [0], [1], [0, 0, 1, 1], [], []>} : vector<16x64xbf16>, vector<64x64xbf16>, vector<16x64xf32> -> vector<16x64xf32>
    %c58_352 = arith.constant 58 : index
    %c0_353 = arith.constant 0 : index
    %c0_354 = arith.constant 0 : index
    %469 = vector.load %arg3[%c58_352, %c0_353, %c0_354] : memref<73x1x64xf32, #tpu.memory_space<vmem>>, vector<1x1x64xf32>
    %470 = vector.shape_cast %469 : vector<1x1x64xf32> to vector<1x64xf32>
    %471 = vector.broadcast %470 : vector<1x64xf32> to vector<16x64xf32>
    %472 = arith.addf %468, %471 : vector<16x64xf32>
    %473 = arith.truncf %472 : vector<16x64xf32> to vector<16x64xbf16>
    %c59 = arith.constant 59 : index
    %c0_355 = arith.constant 0 : index
    %c0_356 = arith.constant 0 : index
    %474 = vector.load %arg2[%c59, %c0_355, %c0_356] : memref<73x64x64xbf16, #tpu.memory_space<vmem>>, vector<1x64x64xbf16>
    %475 = vector.shape_cast %474 : vector<1x64x64xbf16> to vector<64x64xbf16>
    %cst_357 = arith.constant dense<0.000000e+00> : vector<16x64xf32>
    %476 = tpu.matmul %473, %475, %cst_357 {dimension_numbers = #tpu.dot_dimension_numbers<[1], [0], [0], [1], [0, 0, 1, 1], [], []>} : vector<16x64xbf16>, vector<64x64xbf16>, vector<16x64xf32> -> vector<16x64xf32>
    %c59_358 = arith.constant 59 : index
    %c0_359 = arith.constant 0 : index
    %c0_360 = arith.constant 0 : index
    %477 = vector.load %arg3[%c59_358, %c0_359, %c0_360] : memref<73x1x64xf32, #tpu.memory_space<vmem>>, vector<1x1x64xf32>
    %478 = vector.shape_cast %477 : vector<1x1x64xf32> to vector<1x64xf32>
    %479 = vector.broadcast %478 : vector<1x64xf32> to vector<16x64xf32>
    %480 = arith.addf %476, %479 : vector<16x64xf32>
    %481 = arith.truncf %480 : vector<16x64xf32> to vector<16x64xbf16>
    %c60 = arith.constant 60 : index
    %c0_361 = arith.constant 0 : index
    %c0_362 = arith.constant 0 : index
    %482 = vector.load %arg2[%c60, %c0_361, %c0_362] : memref<73x64x64xbf16, #tpu.memory_space<vmem>>, vector<1x64x64xbf16>
    %483 = vector.shape_cast %482 : vector<1x64x64xbf16> to vector<64x64xbf16>
    %cst_363 = arith.constant dense<0.000000e+00> : vector<16x64xf32>
    %484 = tpu.matmul %481, %483, %cst_363 {dimension_numbers = #tpu.dot_dimension_numbers<[1], [0], [0], [1], [0, 0, 1, 1], [], []>} : vector<16x64xbf16>, vector<64x64xbf16>, vector<16x64xf32> -> vector<16x64xf32>
    %c60_364 = arith.constant 60 : index
    %c0_365 = arith.constant 0 : index
    %c0_366 = arith.constant 0 : index
    %485 = vector.load %arg3[%c60_364, %c0_365, %c0_366] : memref<73x1x64xf32, #tpu.memory_space<vmem>>, vector<1x1x64xf32>
    %486 = vector.shape_cast %485 : vector<1x1x64xf32> to vector<1x64xf32>
    %487 = vector.broadcast %486 : vector<1x64xf32> to vector<16x64xf32>
    %488 = arith.addf %484, %487 : vector<16x64xf32>
    %489 = arith.truncf %488 : vector<16x64xf32> to vector<16x64xbf16>
    %c61 = arith.constant 61 : index
    %c0_367 = arith.constant 0 : index
    %c0_368 = arith.constant 0 : index
    %490 = vector.load %arg2[%c61, %c0_367, %c0_368] : memref<73x64x64xbf16, #tpu.memory_space<vmem>>, vector<1x64x64xbf16>
    %491 = vector.shape_cast %490 : vector<1x64x64xbf16> to vector<64x64xbf16>
    %cst_369 = arith.constant dense<0.000000e+00> : vector<16x64xf32>
    %492 = tpu.matmul %489, %491, %cst_369 {dimension_numbers = #tpu.dot_dimension_numbers<[1], [0], [0], [1], [0, 0, 1, 1], [], []>} : vector<16x64xbf16>, vector<64x64xbf16>, vector<16x64xf32> -> vector<16x64xf32>
    %c61_370 = arith.constant 61 : index
    %c0_371 = arith.constant 0 : index
    %c0_372 = arith.constant 0 : index
    %493 = vector.load %arg3[%c61_370, %c0_371, %c0_372] : memref<73x1x64xf32, #tpu.memory_space<vmem>>, vector<1x1x64xf32>
    %494 = vector.shape_cast %493 : vector<1x1x64xf32> to vector<1x64xf32>
    %495 = vector.broadcast %494 : vector<1x64xf32> to vector<16x64xf32>
    %496 = arith.addf %492, %495 : vector<16x64xf32>
    %497 = arith.truncf %496 : vector<16x64xf32> to vector<16x64xbf16>
    %c62 = arith.constant 62 : index
    %c0_373 = arith.constant 0 : index
    %c0_374 = arith.constant 0 : index
    %498 = vector.load %arg2[%c62, %c0_373, %c0_374] : memref<73x64x64xbf16, #tpu.memory_space<vmem>>, vector<1x64x64xbf16>
    %499 = vector.shape_cast %498 : vector<1x64x64xbf16> to vector<64x64xbf16>
    %cst_375 = arith.constant dense<0.000000e+00> : vector<16x64xf32>
    %500 = tpu.matmul %497, %499, %cst_375 {dimension_numbers = #tpu.dot_dimension_numbers<[1], [0], [0], [1], [0, 0, 1, 1], [], []>} : vector<16x64xbf16>, vector<64x64xbf16>, vector<16x64xf32> -> vector<16x64xf32>
    %c62_376 = arith.constant 62 : index
    %c0_377 = arith.constant 0 : index
    %c0_378 = arith.constant 0 : index
    %501 = vector.load %arg3[%c62_376, %c0_377, %c0_378] : memref<73x1x64xf32, #tpu.memory_space<vmem>>, vector<1x1x64xf32>
    %502 = vector.shape_cast %501 : vector<1x1x64xf32> to vector<1x64xf32>
    %503 = vector.broadcast %502 : vector<1x64xf32> to vector<16x64xf32>
    %504 = arith.addf %500, %503 : vector<16x64xf32>
    %505 = arith.truncf %504 : vector<16x64xf32> to vector<16x64xbf16>
    %c63 = arith.constant 63 : index
    %c0_379 = arith.constant 0 : index
    %c0_380 = arith.constant 0 : index
    %506 = vector.load %arg2[%c63, %c0_379, %c0_380] : memref<73x64x64xbf16, #tpu.memory_space<vmem>>, vector<1x64x64xbf16>
    %507 = vector.shape_cast %506 : vector<1x64x64xbf16> to vector<64x64xbf16>
    %cst_381 = arith.constant dense<0.000000e+00> : vector<16x64xf32>
    %508 = tpu.matmul %505, %507, %cst_381 {dimension_numbers = #tpu.dot_dimension_numbers<[1], [0], [0], [1], [0, 0, 1, 1], [], []>} : vector<16x64xbf16>, vector<64x64xbf16>, vector<16x64xf32> -> vector<16x64xf32>
    %c63_382 = arith.constant 63 : index
    %c0_383 = arith.constant 0 : index
    %c0_384 = arith.constant 0 : index
    %509 = vector.load %arg3[%c63_382, %c0_383, %c0_384] : memref<73x1x64xf32, #tpu.memory_space<vmem>>, vector<1x1x64xf32>
    %510 = vector.shape_cast %509 : vector<1x1x64xf32> to vector<1x64xf32>
    %511 = vector.broadcast %510 : vector<1x64xf32> to vector<16x64xf32>
    %512 = arith.addf %508, %511 : vector<16x64xf32>
    %513 = arith.truncf %512 : vector<16x64xf32> to vector<16x64xbf16>
    %c64 = arith.constant 64 : index
    %c0_385 = arith.constant 0 : index
    %c0_386 = arith.constant 0 : index
    %514 = vector.load %arg2[%c64, %c0_385, %c0_386] : memref<73x64x64xbf16, #tpu.memory_space<vmem>>, vector<1x64x64xbf16>
    %515 = vector.shape_cast %514 : vector<1x64x64xbf16> to vector<64x64xbf16>
    %cst_387 = arith.constant dense<0.000000e+00> : vector<16x64xf32>
    %516 = tpu.matmul %513, %515, %cst_387 {dimension_numbers = #tpu.dot_dimension_numbers<[1], [0], [0], [1], [0, 0, 1, 1], [], []>} : vector<16x64xbf16>, vector<64x64xbf16>, vector<16x64xf32> -> vector<16x64xf32>
    %c64_388 = arith.constant 64 : index
    %c0_389 = arith.constant 0 : index
    %c0_390 = arith.constant 0 : index
    %517 = vector.load %arg3[%c64_388, %c0_389, %c0_390] : memref<73x1x64xf32, #tpu.memory_space<vmem>>, vector<1x1x64xf32>
    %518 = vector.shape_cast %517 : vector<1x1x64xf32> to vector<1x64xf32>
    %519 = vector.broadcast %518 : vector<1x64xf32> to vector<16x64xf32>
    %520 = arith.addf %516, %519 : vector<16x64xf32>
    %521 = arith.truncf %520 : vector<16x64xf32> to vector<16x64xbf16>
    %c65 = arith.constant 65 : index
    %c0_391 = arith.constant 0 : index
    %c0_392 = arith.constant 0 : index
    %522 = vector.load %arg2[%c65, %c0_391, %c0_392] : memref<73x64x64xbf16, #tpu.memory_space<vmem>>, vector<1x64x64xbf16>
    %523 = vector.shape_cast %522 : vector<1x64x64xbf16> to vector<64x64xbf16>
    %cst_393 = arith.constant dense<0.000000e+00> : vector<16x64xf32>
    %524 = tpu.matmul %521, %523, %cst_393 {dimension_numbers = #tpu.dot_dimension_numbers<[1], [0], [0], [1], [0, 0, 1, 1], [], []>} : vector<16x64xbf16>, vector<64x64xbf16>, vector<16x64xf32> -> vector<16x64xf32>
    %c65_394 = arith.constant 65 : index
    %c0_395 = arith.constant 0 : index
    %c0_396 = arith.constant 0 : index
    %525 = vector.load %arg3[%c65_394, %c0_395, %c0_396] : memref<73x1x64xf32, #tpu.memory_space<vmem>>, vector<1x1x64xf32>
    %526 = vector.shape_cast %525 : vector<1x1x64xf32> to vector<1x64xf32>
    %527 = vector.broadcast %526 : vector<1x64xf32> to vector<16x64xf32>
    %528 = arith.addf %524, %527 : vector<16x64xf32>
    %529 = arith.truncf %528 : vector<16x64xf32> to vector<16x64xbf16>
    %c66 = arith.constant 66 : index
    %c0_397 = arith.constant 0 : index
    %c0_398 = arith.constant 0 : index
    %530 = vector.load %arg2[%c66, %c0_397, %c0_398] : memref<73x64x64xbf16, #tpu.memory_space<vmem>>, vector<1x64x64xbf16>
    %531 = vector.shape_cast %530 : vector<1x64x64xbf16> to vector<64x64xbf16>
    %cst_399 = arith.constant dense<0.000000e+00> : vector<16x64xf32>
    %532 = tpu.matmul %529, %531, %cst_399 {dimension_numbers = #tpu.dot_dimension_numbers<[1], [0], [0], [1], [0, 0, 1, 1], [], []>} : vector<16x64xbf16>, vector<64x64xbf16>, vector<16x64xf32> -> vector<16x64xf32>
    %c66_400 = arith.constant 66 : index
    %c0_401 = arith.constant 0 : index
    %c0_402 = arith.constant 0 : index
    %533 = vector.load %arg3[%c66_400, %c0_401, %c0_402] : memref<73x1x64xf32, #tpu.memory_space<vmem>>, vector<1x1x64xf32>
    %534 = vector.shape_cast %533 : vector<1x1x64xf32> to vector<1x64xf32>
    %535 = vector.broadcast %534 : vector<1x64xf32> to vector<16x64xf32>
    %536 = arith.addf %532, %535 : vector<16x64xf32>
    %537 = arith.truncf %536 : vector<16x64xf32> to vector<16x64xbf16>
    %c67 = arith.constant 67 : index
    %c0_403 = arith.constant 0 : index
    %c0_404 = arith.constant 0 : index
    %538 = vector.load %arg2[%c67, %c0_403, %c0_404] : memref<73x64x64xbf16, #tpu.memory_space<vmem>>, vector<1x64x64xbf16>
    %539 = vector.shape_cast %538 : vector<1x64x64xbf16> to vector<64x64xbf16>
    %cst_405 = arith.constant dense<0.000000e+00> : vector<16x64xf32>
    %540 = tpu.matmul %537, %539, %cst_405 {dimension_numbers = #tpu.dot_dimension_numbers<[1], [0], [0], [1], [0, 0, 1, 1], [], []>} : vector<16x64xbf16>, vector<64x64xbf16>, vector<16x64xf32> -> vector<16x64xf32>
    %c67_406 = arith.constant 67 : index
    %c0_407 = arith.constant 0 : index
    %c0_408 = arith.constant 0 : index
    %541 = vector.load %arg3[%c67_406, %c0_407, %c0_408] : memref<73x1x64xf32, #tpu.memory_space<vmem>>, vector<1x1x64xf32>
    %542 = vector.shape_cast %541 : vector<1x1x64xf32> to vector<1x64xf32>
    %543 = vector.broadcast %542 : vector<1x64xf32> to vector<16x64xf32>
    %544 = arith.addf %540, %543 : vector<16x64xf32>
    %545 = arith.truncf %544 : vector<16x64xf32> to vector<16x64xbf16>
    %c68 = arith.constant 68 : index
    %c0_409 = arith.constant 0 : index
    %c0_410 = arith.constant 0 : index
    %546 = vector.load %arg2[%c68, %c0_409, %c0_410] : memref<73x64x64xbf16, #tpu.memory_space<vmem>>, vector<1x64x64xbf16>
    %547 = vector.shape_cast %546 : vector<1x64x64xbf16> to vector<64x64xbf16>
    %cst_411 = arith.constant dense<0.000000e+00> : vector<16x64xf32>
    %548 = tpu.matmul %545, %547, %cst_411 {dimension_numbers = #tpu.dot_dimension_numbers<[1], [0], [0], [1], [0, 0, 1, 1], [], []>} : vector<16x64xbf16>, vector<64x64xbf16>, vector<16x64xf32> -> vector<16x64xf32>
    %c68_412 = arith.constant 68 : index
    %c0_413 = arith.constant 0 : index
    %c0_414 = arith.constant 0 : index
    %549 = vector.load %arg3[%c68_412, %c0_413, %c0_414] : memref<73x1x64xf32, #tpu.memory_space<vmem>>, vector<1x1x64xf32>
    %550 = vector.shape_cast %549 : vector<1x1x64xf32> to vector<1x64xf32>
    %551 = vector.broadcast %550 : vector<1x64xf32> to vector<16x64xf32>
    %552 = arith.addf %548, %551 : vector<16x64xf32>
    %553 = arith.truncf %552 : vector<16x64xf32> to vector<16x64xbf16>
    %c69 = arith.constant 69 : index
    %c0_415 = arith.constant 0 : index
    %c0_416 = arith.constant 0 : index
    %554 = vector.load %arg2[%c69, %c0_415, %c0_416] : memref<73x64x64xbf16, #tpu.memory_space<vmem>>, vector<1x64x64xbf16>
    %555 = vector.shape_cast %554 : vector<1x64x64xbf16> to vector<64x64xbf16>
    %cst_417 = arith.constant dense<0.000000e+00> : vector<16x64xf32>
    %556 = tpu.matmul %553, %555, %cst_417 {dimension_numbers = #tpu.dot_dimension_numbers<[1], [0], [0], [1], [0, 0, 1, 1], [], []>} : vector<16x64xbf16>, vector<64x64xbf16>, vector<16x64xf32> -> vector<16x64xf32>
    %c69_418 = arith.constant 69 : index
    %c0_419 = arith.constant 0 : index
    %c0_420 = arith.constant 0 : index
    %557 = vector.load %arg3[%c69_418, %c0_419, %c0_420] : memref<73x1x64xf32, #tpu.memory_space<vmem>>, vector<1x1x64xf32>
    %558 = vector.shape_cast %557 : vector<1x1x64xf32> to vector<1x64xf32>
    %559 = vector.broadcast %558 : vector<1x64xf32> to vector<16x64xf32>
    %560 = arith.addf %556, %559 : vector<16x64xf32>
    %561 = arith.truncf %560 : vector<16x64xf32> to vector<16x64xbf16>
    %c70 = arith.constant 70 : index
    %c0_421 = arith.constant 0 : index
    %c0_422 = arith.constant 0 : index
    %562 = vector.load %arg2[%c70, %c0_421, %c0_422] : memref<73x64x64xbf16, #tpu.memory_space<vmem>>, vector<1x64x64xbf16>
    %563 = vector.shape_cast %562 : vector<1x64x64xbf16> to vector<64x64xbf16>
    %cst_423 = arith.constant dense<0.000000e+00> : vector<16x64xf32>
    %564 = tpu.matmul %561, %563, %cst_423 {dimension_numbers = #tpu.dot_dimension_numbers<[1], [0], [0], [1], [0, 0, 1, 1], [], []>} : vector<16x64xbf16>, vector<64x64xbf16>, vector<16x64xf32> -> vector<16x64xf32>
    %c70_424 = arith.constant 70 : index
    %c0_425 = arith.constant 0 : index
    %c0_426 = arith.constant 0 : index
    %565 = vector.load %arg3[%c70_424, %c0_425, %c0_426] : memref<73x1x64xf32, #tpu.memory_space<vmem>>, vector<1x1x64xf32>
    %566 = vector.shape_cast %565 : vector<1x1x64xf32> to vector<1x64xf32>
    %567 = vector.broadcast %566 : vector<1x64xf32> to vector<16x64xf32>
    %568 = arith.addf %564, %567 : vector<16x64xf32>
    %569 = arith.truncf %568 : vector<16x64xf32> to vector<16x64xbf16>
    %c71 = arith.constant 71 : index
    %c0_427 = arith.constant 0 : index
    %c0_428 = arith.constant 0 : index
    %570 = vector.load %arg2[%c71, %c0_427, %c0_428] : memref<73x64x64xbf16, #tpu.memory_space<vmem>>, vector<1x64x64xbf16>
    %571 = vector.shape_cast %570 : vector<1x64x64xbf16> to vector<64x64xbf16>
    %cst_429 = arith.constant dense<0.000000e+00> : vector<16x64xf32>
    %572 = tpu.matmul %569, %571, %cst_429 {dimension_numbers = #tpu.dot_dimension_numbers<[1], [0], [0], [1], [0, 0, 1, 1], [], []>} : vector<16x64xbf16>, vector<64x64xbf16>, vector<16x64xf32> -> vector<16x64xf32>
    %c71_430 = arith.constant 71 : index
    %c0_431 = arith.constant 0 : index
    %c0_432 = arith.constant 0 : index
    %573 = vector.load %arg3[%c71_430, %c0_431, %c0_432] : memref<73x1x64xf32, #tpu.memory_space<vmem>>, vector<1x1x64xf32>
    %574 = vector.shape_cast %573 : vector<1x1x64xf32> to vector<1x64xf32>
    %575 = vector.broadcast %574 : vector<1x64xf32> to vector<16x64xf32>
    %576 = arith.addf %572, %575 : vector<16x64xf32>
    %577 = arith.truncf %576 : vector<16x64xf32> to vector<16x64xbf16>
    %c72 = arith.constant 72 : index
    %c0_433 = arith.constant 0 : index
    %c0_434 = arith.constant 0 : index
    %578 = vector.load %arg2[%c72, %c0_433, %c0_434] : memref<73x64x64xbf16, #tpu.memory_space<vmem>>, vector<1x64x64xbf16>
    %579 = vector.shape_cast %578 : vector<1x64x64xbf16> to vector<64x64xbf16>
    %cst_435 = arith.constant dense<0.000000e+00> : vector<16x64xf32>
    %580 = tpu.matmul %577, %579, %cst_435 {dimension_numbers = #tpu.dot_dimension_numbers<[1], [0], [0], [1], [0, 0, 1, 1], [], []>} : vector<16x64xbf16>, vector<64x64xbf16>, vector<16x64xf32> -> vector<16x64xf32>
    %c72_436 = arith.constant 72 : index
    %c0_437 = arith.constant 0 : index
    %c0_438 = arith.constant 0 : index
    %581 = vector.load %arg3[%c72_436, %c0_437, %c0_438] : memref<73x1x64xf32, #tpu.memory_space<vmem>>, vector<1x1x64xf32>
    %582 = vector.shape_cast %581 : vector<1x1x64xf32> to vector<1x64xf32>
    %583 = vector.broadcast %582 : vector<1x64xf32> to vector<16x64xf32>
    %584 = arith.addf %580, %583 : vector<16x64xf32>
    %c0_439 = arith.constant 0 : index
    %c0_440 = arith.constant 0 : index
    %585 = vector.load %arg4[%c0_439, %c0_440] : memref<16x64xf32, #tpu.memory_space<vmem>>, vector<16x64xf32>
    tpu.vector_store %arg4[%c0_439, %c0_440], %584 {strides = array<i32>} : memref<16x64xf32, #tpu.memory_space<vmem>>, vector<16x64xf32>,
    return
  }
  func.func @transform_0(%arg0: i32) -> (i32, i32) {
    %c0_i32 = arith.constant 0 : i32
    %c0_i32_0 = arith.constant 0 : i32
    %c0_i32_1 = arith.constant 0 : i32
    return %c0_i32, %c0_i32_0 : i32, i32
  }
  func.func @transform_1(%arg0: i32) -> (i32, i32, i32) {
    %c0_i32 = arith.constant 0 : i32
    %c0_i32_0 = arith.constant 0 : i32
    %c0_i32_1 = arith.constant 0 : i32
    %c0_i32_2 = arith.constant 0 : i32
    return %c0_i32, %c0_i32_0, %c0_i32_1 : i32, i32, i32
  }
  func.func @transform_2(%arg0: i32) -> (i32, i32, i32) {
    %c0_i32 = arith.constant 0 : i32
    %c0_i32_0 = arith.constant 0 : i32
    %c0_i32_1 = arith.constant 0 : i32
    %c0_i32_2 = arith.constant 0 : i32
    return %c0_i32, %c0_i32_0, %c0_i32_1 : i32, i32, i32
  }
  func.func @transform_3(%arg0: i32) -> (i32, i32) {
    %c0_i32 = arith.constant 0 : i32
    %c0_i32_0 = arith.constant 0 : i32
    %c0_i32_1 = arith.constant 0 : i32
    return %c0_i32, %c0_i32_0 : i32, i32
  }
}

</mosaic_0001>

<bundles_post_ra>
// kernel: run_layer_stack.1
= control target key start
LH: loop header
LB: loop body
LE: loop exit
PB: predicated region body
PF: predicated region fallthrough
CT: control target
= control target key end

     0   :  { %v8961_v1 = vmov 0.0   ;;  %vm8962_vm0 = vmmov 0   ;;  %vm58_vm1 = vcmask 523264   ;;  %s10612_s0 = inlined_call_operand.vmem [shape: f32[16,64], index: 0, kind: input, shape index: {}]   ;;  %s10613_s1 = inlined_call_operand.vmem [shape: bf16[73,64,64], index: 1, kind: input, shape index: {}]   ;;  %s10614_s2 = inlined_call_operand.vmem [shape: f32[73,1,64], index: 2, kind: input, shape index: {}]   ;;  %s10615_s3 = inlined_call_operand.hbm [shape: f32[16,64], index: 3, kind: output, shape index: {}]  }
   0x1   :  { %v8645_v0 = vld [vmem:[%s10613_s1] sm:$0xff]   ;;  %7764 = vmatprep.subr.bf16.mxu0 %v8961_v1  ;;  %7776 = vmatprep.subr.bf16.mxu1 %v8961_v1  ;;  %v8646_v2 = vld [vmem:[%s10613_s1 + $0x8] sm:$0xff]   ;;  %v8647_v4 = vld [vmem:[%s10613_s1 + $0x10] sm:$0xff]  }
   0x2   :  { %7765 = vmatpush3.bf16.msra.mxu0 %v8645_v0  ;;  %7772 = vmatprep.mubr.msk.bf16.mxu0 %vm8962_vm0, %v8961_v1  ;;  %v8649_v3 = vld [vmem:[%s10613_s1 + $0x20] sm:$0xff]   ;;  %v8650_v5 = vld [vmem:[%s10613_s1 + $0x28] sm:$0xff]   ;;  %v8648_v6 = vld [vmem:[%s10613_s1 + $0x18] sm:$0xff]  }
   0x3   :  { %7766 = vmatprep.subr.bf16.mxu0 %v8961_v1  ;;  %7784 = vmatprep.mubr.msk.bf16.mxu1 %vm8962_vm0, %v8961_v1  ;;  %v16_v7 = vld [vmem:[%s10612_s0] sm:$0xff]  ;;  %v17_v8 = vld [vmem:[%s10612_s0 + $0x8] sm:$0xff]  ;;  %v8651_v10 = vld [vmem:[%s10613_s1 + $0x30] sm:$0xff]  }
   0x4   :  { %7777 = vmatpush3.bf16.msra.mxu1 %v8649_v3  ;;  %v18_v9 = vpack.c.bf16 %v17_v8, %v16_v7  ;;  %v8652_v11 = vld [vmem:[%s10613_s1 + $0x38] sm:$0xff]   ;;  %v8653_v12 = vld [vmem:[%s10613_s1 + $0x40] sm:$0xff]   ;;  %v8654_v13 = vld [vmem:[%s10613_s1 + $0x48] sm:$0xff]  }
   0x5   :  { %7778 = vmatprep.subr.bf16.mxu1 %v8961_v1 }
   0x6   :  { %7767 = vmatpush3.bf16.msra.mxu0 %v8646_v2 }
   0x7   :  { %7768 = vmatprep.subr.bf16.mxu0 %v8961_v1 }
   0x8   :  { %7779 = vmatpush3.bf16.msra.mxu1 %v8650_v5 }
   0x9   :  { %7780 = vmatprep.subr.bf16.mxu1 %v8961_v1 }
   0xa   :  { %7769 = vmatpush3.bf16.msra.mxu0 %v8647_v4 }
   0xb   :  { %7770 = vmatprep.subr.bf16.mxu0 %v8961_v1 }
   0xc   :  { %7781 = vmatpush3.bf16.msra.mxu1 %v8651_v10 }
   0xd   :  { %7782 = vmatprep.subr.bf16.mxu1 %v8961_v1 }
   0xe   :  { %7771 = vmatpush3.bf16.msra.mxu0 %v8648_v6 }
   0xf   :  { %7788 = vmatprep.subr.bf16.mxu0 %v8961_v1 }
  0x10   :  { %7783 = vmatpush3.bf16.msra.mxu1 %v8652_v11 }
  0x11   :  { %7773 = vmatmul.mubr.msk.bf16.vlgmr.msra.gmra.mrb[0].mxu0 %vm58_vm1, %v18_v9  ;;  %7800 = vmatprep.subr.bf16.mxu1 %v8961_v1 }
  0x12   :  { %7796 = vmatprep.mubr.msk.bf16.mxu0 %vm8962_vm0, %v8961_v1  ;;  %7789 = vmatpush3.bf16.msra.mxu0 %v8653_v12 }
  0x13   :  { %7790 = vmatprep.subr.bf16.mxu0 %v8961_v1 }
  0x16   :  { %7791 = vmatpush3.bf16.msra.mxu0 %v8654_v13 }
  0x17   :  { %7792 = vmatprep.subr.bf16.mxu0 %v8961_v1 }
  0x18   :  { %8 = vsyncpa [#allocation3], 0  ;;  %v6313_v14 = vld [vmem:[%s10614_s2] ss:$0 sm:$0xff]  ;;  %v8655_v22 = vld [vmem:[%s10613_s1 + $0x50] sm:$0xff]   ;;  %s8963_s18 = smov [#allocation2]  }
  0x19   :  { %v8656_v23 = vld [vmem:[%s10613_s1 + $0x58] sm:$0xff]   ;;  %v8657_v24 = vld [vmem:[%s10613_s1 + $0x60] sm:$0xff]   ;;  %v8658_v25 = vld [vmem:[%s10613_s1 + $0x68] sm:$0xff]  }
  0x1a   :  { %7793 = vmatpush3.bf16.msra.mxu0 %v8655_v22  ;;  %v6328_v26 = vld [vmem:[%s10614_s2 + $0x1] ss:$0 sm:$0xff]  ;;  %v8659_v34 = vld [vmem:[%s10613_s1 + $0x70] sm:$0xff]   ;;  %v8660_v35 = vld [vmem:[%s10613_s1 + $0x78] sm:$0xff]  }
  0x1b   :  { %7794 = vmatprep.subr.bf16.mxu0 %v8961_v1  ;;  %v8661_v36 = vld [vmem:[%s10613_s1 + $0x80] sm:$0xff]   ;;  %v8662_v37 = vld [vmem:[%s10613_s1 + $0x88] sm:$0xff]   ;;  %v8663_v46 = vld [vmem:[%s10613_s1 + $0x90] sm:$0xff]  }
  0x1c   :  { %v6343_v38 = vld [vmem:[%s10614_s2 + $0x2] ss:$0 sm:$0xff]  ;;  %v8664_v47 = vld [vmem:[%s10613_s1 + $0x98] sm:$0xff]   ;;  %v8666_v49 = vld [vmem:[%s10613_s1 + $0xa8] sm:$0xff]  }
  0x1d   :  { %v8665_v48 = vld [vmem:[%s10613_s1 + $0xa0] sm:$0xff]   ;;  %v8667_v58 = vld [vmem:[%s10613_s1 + $0xb0] sm:$0xff]   ;;  %v8668_v59 = vld [vmem:[%s10613_s1 + $0xb8] sm:$0xff]  }
  0x1e   :  { %7795 = vmatpush3.bf16.msra.mxu0 %v8656_v23  ;;  %v6358_v50 = vld [vmem:[%s10614_s2 + $0x3] ss:$0 sm:$0xff]  ;;  %v8670_v61 = vld [vmem:[%s10613_s1 + $0xc8] sm:$0xff]   ;;  %v6373_v62 = vld [vmem:[%s10614_s2 + $0x4] ss:$0 sm:$0xff] }
  0x1f   :  { %7812 = vmatprep.subr.bf16.mxu0 %v8961_v1  ;;  %v8669_v60 = vld [vmem:[%s10613_s1 + $0xc0] sm:$0xff]   ;;  %v8671_v7 = vld [vmem:[%s10613_s1 + $0xd0] sm:$0xff]   ;;  %v8672_v8 = vld [vmem:[%s10613_s1 + $0xd8] sm:$0xff]  }
  0x20   :  { %v8673_v9 = vld [vmem:[%s10613_s1 + $0xe0] sm:$0xff]   ;;  %v8674_v10 = vld [vmem:[%s10613_s1 + $0xe8] sm:$0xff]  }
  0x21   :  { %v6388_v11 = vld [vmem:[%s10614_s2 + $0x5] ss:$0 sm:$0xff]  ;;  %v8678_v22 = vld [vmem:[%s10613_s1 + $0x108] sm:$0xff]   ;;  %v6403_v23 = vld [vmem:[%s10614_s2 + $0x6] ss:$0 sm:$0xff] }
  0xe4   :  { %v96_v15 = vpop.f32.mrb[0].mxu0 }
  0xe5   :  { %v7774_v16 = vpop.f32.mrb[1].mxu0  ;;  %v97_v18 = vadd.f32 %v6313_v14, %v96_v15 }
  0xe6   :  { %v99_v17 = vpop.f32.mrb[2].mxu0 }
  0xe7   :  { %v100_v19 = vadd.f32 %v6313_v14, %v99_v17  ;;  %v7775_v20 = vpop.f32.mrb[3].mxu0 }
  0xe8   :  { %v8676_v20 = vld [vmem:[%s10613_s1 + $0xf8] sm:$0xff]  }
  0xe9   :  { %v103_v21 = vpack.c.bf16 %v100_v19, %v97_v18  ;;  %v8675_v19 = vld [vmem:[%s10613_s1 + $0xf0] sm:$0xff]  }
  0xeb   :  { %7785 = vmatmul.mubr.msk.bf16.vlgmr.msra.gmra.mrb[0].mxu1 %vm58_vm1, %v103_v21  ;;  %v8677_v21 = vld [vmem:[%s10613_s1 + $0x100] sm:$0xff]  }
  0xec   :  { %7808 = vmatprep.mubr.msk.bf16.mxu1 %vm8962_vm0, %v8961_v1  ;;  %7801 = vmatpush3.bf16.msra.mxu1 %v8657_v24 }
  0xed   :  { %7802 = vmatprep.subr.bf16.mxu1 %v8961_v1 }
  0xf0   :  { %7803 = vmatpush3.bf16.msra.mxu1 %v8658_v25 }
  0xf1   :  { %7804 = vmatprep.subr.bf16.mxu1 %v8961_v1 }
  0xf4   :  { %7805 = vmatpush3.bf16.msra.mxu1 %v8659_v34  ;;  %v8682_v34 = vld [vmem:[%s10613_s1 + $0x128] sm:$0xff]  }
  0xf5   :  { %7806 = vmatprep.subr.bf16.mxu1 %v8961_v1 }
  0xf8   :  { %7807 = vmatpush3.bf16.msra.mxu1 %v8660_v35  ;;  %v6418_v35 = vld [vmem:[%s10614_s2 + $0x7] ss:$0 sm:$0xff] }
  0xf9   :  { %7824 = vmatprep.subr.bf16.mxu1 %v8961_v1 }
 0x1be   :  { %v182_v27 = vpop.f32.mrb[0].mxu1 }
 0x1bf   :  { %v7786_v28 = vpop.f32.mrb[1].mxu1  ;;  %v183_v30 = vadd.f32 %v6328_v26, %v182_v27 }
 0x1c0   :  { %v185_v29 = vpop.f32.mrb[2].mxu1 }
 0x1c1   :  { %v186_v31 = vadd.f32 %v6328_v26, %v185_v29  ;;  %v7787_v32 = vpop.f32.mrb[3].mxu1 }
 0x1c2   :  { %v8680_v32 = vld [vmem:[%s10613_s1 + $0x118] sm:$0xff]  }
 0x1c3   :  { %v189_v33 = vpack.c.bf16 %v186_v31, %v183_v30  ;;  %v8679_v31 = vld [vmem:[%s10613_s1 + $0x110] sm:$0xff]  }
 0x1c5   :  { %7797 = vmatmul.mubr.msk.bf16.vlgmr.msra.gmra.mrb[4].mxu0 %vm58_vm1, %v189_v33  ;;  %v8681_v33 = vld [vmem:[%s10613_s1 + $0x120] sm:$0xff]  }
 0x1c6   :  { %7820 = vmatprep.mubr.msk.bf16.mxu0 %vm8962_vm0, %v8961_v1  ;;  %7813 = vmatpush3.bf16.msra.mxu0 %v8661_v36 }
 0x1c7   :  { %7814 = vmatprep.subr.bf16.mxu0 %v8961_v1 }
 0x1ca   :  { %7815 = vmatpush3.bf16.msra.mxu0 %v8662_v37 }
 0x1cb   :  { %7816 = vmatprep.subr.bf16.mxu0 %v8961_v1 }
 0x1ce   :  { %7817 = vmatpush3.bf16.msra.mxu0 %v8663_v46  ;;  %v8686_v46 = vld [vmem:[%s10613_s1 + $0x148] sm:$0xff]  }
 0x1cf   :  { %7818 = vmatprep.subr.bf16.mxu0 %v8961_v1 }
 0x1d2   :  { %7819 = vmatpush3.bf16.msra.mxu0 %v8664_v47  ;;  %v6433_v47 = vld [vmem:[%s10614_s2 + $0x8] ss:$0 sm:$0xff] }
 0x1d3   :  { %7836 = vmatprep.subr.bf16.mxu0 %v8961_v1 }
 0x298   :  { %v268_v39 = vpop.f32.mrb[4].mxu0 }
 0x299   :  { %v7798_v40 = vpop.f32.mrb[5].mxu0  ;;  %v269_v42 = vadd.f32 %v6343_v38, %v268_v39 }
 0x29a   :  { %v271_v41 = vpop.f32.mrb[6].mxu0 }
 0x29b   :  { %v272_v43 = vadd.f32 %v6343_v38, %v271_v41  ;;  %v7799_v44 = vpop.f32.mrb[7].mxu0 }
 0x29c   :  { %v8684_v44 = vld [vmem:[%s10613_s1 + $0x138] sm:$0xff]  }
 0x29d   :  { %v275_v45 = vpack.c.bf16 %v272_v43, %v269_v42  ;;  %v8683_v43 = vld [vmem:[%s10613_s1 + $0x130] sm:$0xff]  }
 0x29f   :  { %7809 = vmatmul.mubr.msk.bf16.vlgmr.msra.gmra.mrb[4].mxu1 %vm58_vm1, %v275_v45  ;;  %v8685_v45 = vld [vmem:[%s10613_s1 + $0x140] sm:$0xff]  }
 0x2a0   :  { %7832 = vmatprep.mubr.msk.bf16.mxu1 %vm8962_vm0, %v8961_v1  ;;  %7825 = vmatpush3.bf16.msra.mxu1 %v8665_v48 }
 0x2a1   :  { %7826 = vmatprep.subr.bf16.mxu1 %v8961_v1 }
 0x2a4   :  { %7827 = vmatpush3.bf16.msra.mxu1 %v8666_v49 }
 0x2a5   :  { %7828 = vmatprep.subr.bf16.mxu1 %v8961_v1 }
 0x2a8   :  { %7829 = vmatpush3.bf16.msra.mxu1 %v8667_v58  ;;  %v8690_v58 = vld [vmem:[%s10613_s1 + $0x168] sm:$0xff]  }
 0x2a9   :  { %7830 = vmatprep.subr.bf16.mxu1 %v8961_v1 }
 0x2ac   :  { %7831 = vmatpush3.bf16.msra.mxu1 %v8668_v59  ;;  %v6448_v59 = vld [vmem:[%s10614_s2 + $0x9] ss:$0 sm:$0xff] }
 0x2ad   :  { %7848 = vmatprep.subr.bf16.mxu1 %v8961_v1 }
 0x372   :  { %v354_v51 = vpop.f32.mrb[4].mxu1 }
 0x373   :  { %v7810_v52 = vpop.f32.mrb[5].mxu1  ;;  %v355_v54 = vadd.f32 %v6358_v50, %v354_v51 }
 0x374   :  { %v357_v53 = vpop.f32.mrb[6].mxu1 }
 0x375   :  { %v358_v55 = vadd.f32 %v6358_v50, %v357_v53  ;;  %v7811_v56 = vpop.f32.mrb[7].mxu1 }
 0x376   :  { %v8688_v56 = vld [vmem:[%s10613_s1 + $0x158] sm:$0xff]  }
 0x377   :  { %v361_v57 = vpack.c.bf16 %v358_v55, %v355_v54  ;;  %v8687_v55 = vld [vmem:[%s10613_s1 + $0x150] sm:$0xff]  }
 0x379   :  { %7821 = vmatmul.mubr.msk.bf16.vlgmr.msra.gmra.mrb[8].mxu0 %vm58_vm1, %v361_v57  ;;  %v8689_v57 = vld [vmem:[%s10613_s1 + $0x160] sm:$0xff]  }
 0x37a   :  { %7844 = vmatprep.mubr.msk.bf16.mxu0 %vm8962_vm0, %v8961_v1  ;;  %7837 = vmatpush3.bf16.msra.mxu0 %v8669_v60 }
 0x37b   :  { %7838 = vmatprep.subr.bf16.mxu0 %v8961_v1 }
 0x37e   :  { %7839 = vmatpush3.bf16.msra.mxu0 %v8670_v61 }
 0x37f   :  { %7840 = vmatprep.subr.bf16.mxu0 %v8961_v1 }
 0x382   :  { %7841 = vmatpush3.bf16.msra.mxu0 %v8671_v7  ;;  %v8694_v7 = vld [vmem:[%s10613_s1 + $0x188] sm:$0xff]  }
 0x383   :  { %7842 = vmatprep.subr.bf16.mxu0 %v8961_v1 }
 0x386   :  { %7843 = vmatpush3.bf16.msra.mxu0 %v8672_v8  ;;  %v6463_v8 = vld [vmem:[%s10614_s2 + $0xa] ss:$0 sm:$0xff] }
 0x387   :  { %7860 = vmatprep.subr.bf16.mxu0 %v8961_v1 }
 0x44c   :  { %v440_v63 = vpop.f32.mrb[8].mxu0 }
 0x44d   :  { %v7822_v0 = vpop.f32.mrb[9].mxu0  ;;  %v441_v3 = vadd.f32 %v6373_v62, %v440_v63 }
 0x44e   :  { %v443_v2 = vpop.f32.mrb[10].mxu0 }
 0x44f   :  { %v444_v4 = vadd.f32 %v6373_v62, %v443_v2  ;;  %v7823_v5 = vpop.f32.mrb[11].mxu0 }
 0x450   :  { %v8692_v5 = vld [vmem:[%s10613_s1 + $0x178] sm:$0xff]  }
 0x451   :  { %v447_v6 = vpack.c.bf16 %v444_v4, %v441_v3  ;;  %v8691_v4 = vld [vmem:[%s10613_s1 + $0x170] sm:$0xff]  }
 0x453   :  { %7833 = vmatmul.mubr.msk.bf16.vlgmr.msra.gmra.mrb[8].mxu1 %vm58_vm1, %v447_v6  ;;  %v8693_v6 = vld [vmem:[%s10613_s1 + $0x180] sm:$0xff]  }
 0x454   :  { %7856 = vmatprep.mubr.msk.bf16.mxu1 %vm8962_vm0, %v8961_v1  ;;  %7849 = vmatpush3.bf16.msra.mxu1 %v8673_v9 }
 0x455   :  { %7850 = vmatprep.subr.bf16.mxu1 %v8961_v1 }
 0x458   :  { %7851 = vmatpush3.bf16.msra.mxu1 %v8674_v10 }
 0x459   :  { %7852 = vmatprep.subr.bf16.mxu1 %v8961_v1 }
 0x45c   :  { %7853 = vmatpush3.bf16.msra.mxu1 %v8675_v19  ;;  %v8698_v19 = vld [vmem:[%s10613_s1 + $0x1a8] sm:$0xff]  }
 0x45d   :  { %7854 = vmatprep.subr.bf16.mxu1 %v8961_v1 }
 0x460   :  { %7855 = vmatpush3.bf16.msra.mxu1 %v8676_v20  ;;  %v6478_v20 = vld [vmem:[%s10614_s2 + $0xb] ss:$0 sm:$0xff] }
 0x461   :  { %7872 = vmatprep.subr.bf16.mxu1 %v8961_v1 }
 0x526   :  { %v526_v12 = vpop.f32.mrb[8].mxu1 }
 0x527   :  { %v7834_v13 = vpop.f32.mrb[9].mxu1  ;;  %v527_v15 = vadd.f32 %v6388_v11, %v526_v12 }
 0x528   :  { %v529_v14 = vpop.f32.mrb[10].mxu1 }
 0x529   :  { %v530_v16 = vadd.f32 %v6388_v11, %v529_v14  ;;  %v7835_v17 = vpop.f32.mrb[11].mxu1 }
 0x52a   :  { %v8696_v17 = vld [vmem:[%s10613_s1 + $0x198] sm:$0xff]  }
 0x52b   :  { %v533_v18 = vpack.c.bf16 %v530_v16, %v527_v15  ;;  %v8695_v16 = vld [vmem:[%s10613_s1 + $0x190] sm:$0xff]  }
 0x52d   :  { %7845 = vmatmul.mubr.msk.bf16.vlgmr.msra.gmra.mrb[12].mxu0 %vm58_vm1, %v533_v18  ;;  %v8697_v18 = vld [vmem:[%s10613_s1 + $0x1a0] sm:$0xff]  }
 0x52e   :  { %7868 = vmatprep.mubr.msk.bf16.mxu0 %vm8962_vm0, %v8961_v1  ;;  %7861 = vmatpush3.bf16.msra.mxu0 %v8677_v21 }
 0x52f   :  { %7862 = vmatprep.subr.bf16.mxu0 %v8961_v1 }
 0x532   :  { %7863 = vmatpush3.bf16.msra.mxu0 %v8678_v22 }
 0x533   :  { %7864 = vmatprep.subr.bf16.mxu0 %v8961_v1 }
 0x536   :  { %7865 = vmatpush3.bf16.msra.mxu0 %v8679_v31  ;;  %v8702_v31 = vld [vmem:[%s10613_s1 + $0x1c8] sm:$0xff]  }
 0x537   :  { %7866 = vmatprep.subr.bf16.mxu0 %v8961_v1 }
 0x53a   :  { %7867 = vmatpush3.bf16.msra.mxu0 %v8680_v32  ;;  %v6493_v32 = vld [vmem:[%s10614_s2 + $0xc] ss:$0 sm:$0xff] }
 0x53b   :  { %7884 = vmatprep.subr.bf16.mxu0 %v8961_v1 }
 0x600   :  { %v612_v24 = vpop.f32.mrb[12].mxu0 }
 0x601   :  { %v7846_v25 = vpop.f32.mrb[13].mxu0  ;;  %v613_v27 = vadd.f32 %v6403_v23, %v612_v24 }
 0x602   :  { %v615_v26 = vpop.f32.mrb[14].mxu0 }
 0x603   :  { %v616_v28 = vadd.f32 %v6403_v23, %v615_v26  ;;  %v7847_v29 = vpop.f32.mrb[15].mxu0 }
 0x604   :  { %v8700_v29 = vld [vmem:[%s10613_s1 + $0x1b8] sm:$0xff]  }
 0x605   :  { %v619_v30 = vpack.c.bf16 %v616_v28, %v613_v27  ;;  %v8699_v28 = vld [vmem:[%s10613_s1 + $0x1b0] sm:$0xff]  }
 0x607   :  { %7857 = vmatmul.mubr.msk.bf16.vlgmr.msra.gmra.mrb[12].mxu1 %vm58_vm1, %v619_v30  ;;  %v8701_v30 = vld [vmem:[%s10613_s1 + $0x1c0] sm:$0xff]  }
 0x608   :  { %7880 = vmatprep.mubr.msk.bf16.mxu1 %vm8962_vm0, %v8961_v1  ;;  %7873 = vmatpush3.bf16.msra.mxu1 %v8681_v33 }
 0x609   :  { %7874 = vmatprep.subr.bf16.mxu1 %v8961_v1 }
 0x60c   :  { %7875 = vmatpush3.bf16.msra.mxu1 %v8682_v34 }
 0x60d   :  { %7876 = vmatprep.subr.bf16.mxu1 %v8961_v1 }
 0x610   :  { %7877 = vmatpush3.bf16.msra.mxu1 %v8683_v43  ;;  %v8706_v43 = vld [vmem:[%s10613_s1 + $0x1e8] sm:$0xff]  }
 0x611   :  { %7878 = vmatprep.subr.bf16.mxu1 %v8961_v1 }
 0x614   :  { %7879 = vmatpush3.bf16.msra.mxu1 %v8684_v44  ;;  %v6508_v44 = vld [vmem:[%s10614_s2 + $0xd] ss:$0 sm:$0xff] }
 0x615   :  { %7896 = vmatprep.subr.bf16.mxu1 %v8961_v1 }
 0x6da   :  { %v698_v36 = vpop.f32.mrb[12].mxu1 }
 0x6db   :  { %v7858_v37 = vpop.f32.mrb[13].mxu1  ;;  %v699_v39 = vadd.f32 %v6418_v35, %v698_v36 }
 0x6dc   :  { %v701_v38 = vpop.f32.mrb[14].mxu1 }
 0x6dd   :  { %v702_v40 = vadd.f32 %v6418_v35, %v701_v38  ;;  %v7859_v41 = vpop.f32.mrb[15].mxu1 }
 0x6de   :  { %v8704_v41 = vld [vmem:[%s10613_s1 + $0x1d8] sm:$0xff]  }
 0x6df   :  { %v705_v42 = vpack.c.bf16 %v702_v40, %v699_v39  ;;  %v8703_v40 = vld [vmem:[%s10613_s1 + $0x1d0] sm:$0xff]  }
 0x6e1   :  { %7869 = vmatmul.mubr.msk.bf16.vlgmr.msra.gmra.mrb[16].mxu0 %vm58_vm1, %v705_v42  ;;  %v8705_v42 = vld [vmem:[%s10613_s1 + $0x1e0] sm:$0xff]  }
 0x6e2   :  { %7892 = vmatprep.mubr.msk.bf16.mxu0 %vm8962_vm0, %v8961_v1  ;;  %7885 = vmatpush3.bf16.msra.mxu0 %v8685_v45 }
 0x6e3   :  { %7886 = vmatprep.subr.bf16.mxu0 %v8961_v1 }
 0x6e6   :  { %7887 = vmatpush3.bf16.msra.mxu0 %v8686_v46 }
 0x6e7   :  { %7888 = vmatprep.subr.bf16.mxu0 %v8961_v1 }
 0x6ea   :  { %7889 = vmatpush3.bf16.msra.mxu0 %v8687_v55  ;;  %v8710_v55 = vld [vmem:[%s10613_s1 + $0x208] sm:$0xff]  }
 0x6eb   :  { %7890 = vmatprep.subr.bf16.mxu0 %v8961_v1 }
 0x6ee   :  { %7891 = vmatpush3.bf16.msra.mxu0 %v8688_v56  ;;  %v6523_v56 = vld [vmem:[%s10614_s2 + $0xe] ss:$0 sm:$0xff] }
 0x6ef   :  { %7908 = vmatprep.subr.bf16.mxu0 %v8961_v1 }
 0x7b4   :  { %v784_v48 = vpop.f32.mrb[16].mxu0 }
 0x7b5   :  { %v7870_v49 = vpop.f32.mrb[17].mxu0  ;;  %v785_v51 = vadd.f32 %v6433_v47, %v784_v48 }
 0x7b6   :  { %v787_v50 = vpop.f32.mrb[18].mxu0 }
 0x7b7   :  { %v788_v52 = vadd.f32 %v6433_v47, %v787_v50  ;;  %v7871_v53 = vpop.f32.mrb[19].mxu0 }
 0x7b8   :  { %v8708_v53 = vld [vmem:[%s10613_s1 + $0x1f8] sm:$0xff]  }
 0x7b9   :  { %v791_v54 = vpack.c.bf16 %v788_v52, %v785_v51  ;;  %v8707_v52 = vld [vmem:[%s10613_s1 + $0x1f0] sm:$0xff]  }
 0x7bb   :  { %7881 = vmatmul.mubr.msk.bf16.vlgmr.msra.gmra.mrb[16].mxu1 %vm58_vm1, %v791_v54  ;;  %v8709_v54 = vld [vmem:[%s10613_s1 + $0x200] sm:$0xff]  }
 0x7bc   :  { %7904 = vmatprep.mubr.msk.bf16.mxu1 %vm8962_vm0, %v8961_v1  ;;  %7897 = vmatpush3.bf16.msra.mxu1 %v8689_v57 }
 0x7bd   :  { %7898 = vmatprep.subr.bf16.mxu1 %v8961_v1 }
 0x7c0   :  { %7899 = vmatpush3.bf16.msra.mxu1 %v8690_v58 }
 0x7c1   :  { %7900 = vmatprep.subr.bf16.mxu1 %v8961_v1 }
 0x7c4   :  { %7901 = vmatpush3.bf16.msra.mxu1 %v8691_v4  ;;  %v8714_v4 = vld [vmem:[%s10613_s1 + $0x228] sm:$0xff]  }
 0x7c5   :  { %7902 = vmatprep.subr.bf16.mxu1 %v8961_v1 }
 0x7c8   :  { %7903 = vmatpush3.bf16.msra.mxu1 %v8692_v5  ;;  %v6538_v5 = vld [vmem:[%s10614_s2 + $0xf] ss:$0 sm:$0xff] }
 0x7c9   :  { %7920 = vmatprep.subr.bf16.mxu1 %v8961_v1 }
 0x88e   :  { %v870_v60 = vpop.f32.mrb[16].mxu1 }
 0x88f   :  { %v7882_v61 = vpop.f32.mrb[17].mxu1  ;;  %v871_v63 = vadd.f32 %v6448_v59, %v870_v60 }
 0x890   :  { %v873_v62 = vpop.f32.mrb[18].mxu1 }
 0x891   :  { %v874_v0 = vadd.f32 %v6448_v59, %v873_v62  ;;  %v7883_v2 = vpop.f32.mrb[19].mxu1 }
 0x892   :  { %v8712_v2 = vld [vmem:[%s10613_s1 + $0x218] sm:$0xff]  }
 0x893   :  { %v877_v3 = vpack.c.bf16 %v874_v0, %v871_v63  ;;  %v8711_v0 = vld [vmem:[%s10613_s1 + $0x210] sm:$0xff]  }
 0x895   :  { %7893 = vmatmul.mubr.msk.bf16.vlgmr.msra.gmra.mrb[20].mxu0 %vm58_vm1, %v877_v3  ;;  %v8713_v3 = vld [vmem:[%s10613_s1 + $0x220] sm:$0xff]  }
 0x896   :  { %7916 = vmatprep.mubr.msk.bf16.mxu0 %vm8962_vm0, %v8961_v1  ;;  %7909 = vmatpush3.bf16.msra.mxu0 %v8693_v6 }
 0x897   :  { %7910 = vmatprep.subr.bf16.mxu0 %v8961_v1 }
 0x89a   :  { %7911 = vmatpush3.bf16.msra.mxu0 %v8694_v7 }
 0x89b   :  { %7912 = vmatprep.subr.bf16.mxu0 %v8961_v1 }
 0x89e   :  { %7913 = vmatpush3.bf16.msra.mxu0 %v8695_v16  ;;  %v8718_v16 = vld [vmem:[%s10613_s1 + $0x248] sm:$0xff]  }
 0x89f   :  { %7914 = vmatprep.subr.bf16.mxu0 %v8961_v1 }
 0x8a2   :  { %7915 = vmatpush3.bf16.msra.mxu0 %v8696_v17  ;;  %v6553_v17 = vld [vmem:[%s10614_s2 + $0x10] ss:$0 sm:$0xff] }
 0x8a3   :  { %7932 = vmatprep.subr.bf16.mxu0 %v8961_v1 }
 0x968   :  { %v956_v9 = vpop.f32.mrb[20].mxu0 }
 0x969   :  { %v7894_v10 = vpop.f32.mrb[21].mxu0  ;;  %v957_v12 = vadd.f32 %v6463_v8, %v956_v9 }
 0x96a   :  { %v959_v11 = vpop.f32.mrb[22].mxu0 }
 0x96b   :  { %v960_v13 = vadd.f32 %v6463_v8, %v959_v11  ;;  %v7895_v14 = vpop.f32.mrb[23].mxu0 }
 0x96c   :  { %v8716_v14 = vld [vmem:[%s10613_s1 + $0x238] sm:$0xff]  }
 0x96d   :  { %v963_v15 = vpack.c.bf16 %v960_v13, %v957_v12  ;;  %v8715_v13 = vld [vmem:[%s10613_s1 + $0x230] sm:$0xff]  }
 0x96f   :  { %7905 = vmatmul.mubr.msk.bf16.vlgmr.msra.gmra.mrb[20].mxu1 %vm58_vm1, %v963_v15  ;;  %v8717_v15 = vld [vmem:[%s10613_s1 + $0x240] sm:$0xff]  }
 0x970   :  { %7928 = vmatprep.mubr.msk.bf16.mxu1 %vm8962_vm0, %v8961_v1  ;;  %7921 = vmatpush3.bf16.msra.mxu1 %v8697_v18 }
 0x971   :  { %7922 = vmatprep.subr.bf16.mxu1 %v8961_v1 }
 0x974   :  { %7923 = vmatpush3.bf16.msra.mxu1 %v8698_v19 }
 0x975   :  { %7924 = vmatprep.subr.bf16.mxu1 %v8961_v1 }
 0x978   :  { %7925 = vmatpush3.bf16.msra.mxu1 %v8699_v28  ;;  %v8722_v28 = vld [vmem:[%s10613_s1 + $0x268] sm:$0xff]  }
 0x979   :  { %7926 = vmatprep.subr.bf16.mxu1 %v8961_v1 }
 0x97c   :  { %7927 = vmatpush3.bf16.msra.mxu1 %v8700_v29  ;;  %v6568_v29 = vld [vmem:[%s10614_s2 + $0x11] ss:$0 sm:$0xff] }
 0x97d   :  { %7944 = vmatprep.subr.bf16.mxu1 %v8961_v1 }
 0xa42   :  { %v1042_v21 = vpop.f32.mrb[20].mxu1 }
 0xa43   :  { %v7906_v22 = vpop.f32.mrb[21].mxu1  ;;  %v1043_v24 = vadd.f32 %v6478_v20, %v1042_v21 }
 0xa44   :  { %v1045_v23 = vpop.f32.mrb[22].mxu1 }
 0xa45   :  { %v1046_v25 = vadd.f32 %v6478_v20, %v1045_v23  ;;  %v7907_v26 = vpop.f32.mrb[23].mxu1 }
 0xa46   :  { %v8720_v26 = vld [vmem:[%s10613_s1 + $0x258] sm:$0xff]  }
 0xa47   :  { %v1049_v27 = vpack.c.bf16 %v1046_v25, %v1043_v24  ;;  %v8719_v25 = vld [vmem:[%s10613_s1 + $0x250] sm:$0xff]  }
 0xa49   :  { %7917 = vmatmul.mubr.msk.bf16.vlgmr.msra.gmra.mrb[24].mxu0 %vm58_vm1, %v1049_v27  ;;  %v8721_v27 = vld [vmem:[%s10613_s1 + $0x260] sm:$0xff]  }
 0xa4a   :  { %7940 = vmatprep.mubr.msk.bf16.mxu0 %vm8962_vm0, %v8961_v1  ;;  %7933 = vmatpush3.bf16.msra.mxu0 %v8701_v30 }
 0xa4b   :  { %7934 = vmatprep.subr.bf16.mxu0 %v8961_v1 }
 0xa4e   :  { %7935 = vmatpush3.bf16.msra.mxu0 %v8702_v31 }
 0xa4f   :  { %7936 = vmatprep.subr.bf16.mxu0 %v8961_v1 }
 0xa52   :  { %7937 = vmatpush3.bf16.msra.mxu0 %v8703_v40  ;;  %v8726_v40 = vld [vmem:[%s10613_s1 + $0x288] sm:$0xff]  }
 0xa53   :  { %7938 = vmatprep.subr.bf16.mxu0 %v8961_v1 }
 0xa56   :  { %7939 = vmatpush3.bf16.msra.mxu0 %v8704_v41  ;;  %v6583_v41 = vld [vmem:[%s10614_s2 + $0x12] ss:$0 sm:$0xff] }
 0xa57   :  { %7956 = vmatprep.subr.bf16.mxu0 %v8961_v1 }
 0xb1c   :  { %v1128_v33 = vpop.f32.mrb[24].mxu0 }
 0xb1d   :  { %v7918_v34 = vpop.f32.mrb[25].mxu0  ;;  %v1129_v36 = vadd.f32 %v6493_v32, %v1128_v33 }
 0xb1e   :  { %v1131_v35 = vpop.f32.mrb[26].mxu0 }
 0xb1f   :  { %v1132_v37 = vadd.f32 %v6493_v32, %v1131_v35  ;;  %v7919_v38 = vpop.f32.mrb[27].mxu0 }
 0xb20   :  { %v8724_v38 = vld [vmem:[%s10613_s1 + $0x278] sm:$0xff]  }
 0xb21   :  { %v1135_v39 = vpack.c.bf16 %v1132_v37, %v1129_v36  ;;  %v8723_v37 = vld [vmem:[%s10613_s1 + $0x270] sm:$0xff]  }
 0xb23   :  { %7929 = vmatmul.mubr.msk.bf16.vlgmr.msra.gmra.mrb[24].mxu1 %vm58_vm1, %v1135_v39  ;;  %v8725_v39 = vld [vmem:[%s10613_s1 + $0x280] sm:$0xff]  }
 0xb24   :  { %7952 = vmatprep.mubr.msk.bf16.mxu1 %vm8962_vm0, %v8961_v1  ;;  %7945 = vmatpush3.bf16.msra.mxu1 %v8705_v42 }
 0xb25   :  { %7946 = vmatprep.subr.bf16.mxu1 %v8961_v1 }
 0xb28   :  { %7947 = vmatpush3.bf16.msra.mxu1 %v8706_v43 }
 0xb29   :  { %7948 = vmatprep.subr.bf16.mxu1 %v8961_v1 }
 0xb2c   :  { %7949 = vmatpush3.bf16.msra.mxu1 %v8707_v52  ;;  %v8730_v52 = vld [vmem:[%s10613_s1 + $0x2a8] sm:$0xff]  }
 0xb2d   :  { %7950 = vmatprep.subr.bf16.mxu1 %v8961_v1 }
 0xb30   :  { %7951 = vmatpush3.bf16.msra.mxu1 %v8708_v53  ;;  %v6598_v53 = vld [vmem:[%s10614_s2 + $0x13] ss:$0 sm:$0xff] }
 0xb31   :  { %7968 = vmatprep.subr.bf16.mxu1 %v8961_v1 }
 0xbf6   :  { %v1214_v45 = vpop.f32.mrb[24].mxu1 }
 0xbf7   :  { %v7930_v46 = vpop.f32.mrb[25].mxu1  ;;  %v1215_v48 = vadd.f32 %v6508_v44, %v1214_v45 }
 0xbf8   :  { %v1217_v47 = vpop.f32.mrb[26].mxu1 }
 0xbf9   :  { %v1218_v49 = vadd.f32 %v6508_v44, %v1217_v47  ;;  %v7931_v50 = vpop.f32.mrb[27].mxu1 }
 0xbfa   :  { %v8728_v50 = vld [vmem:[%s10613_s1 + $0x298] sm:$0xff]  }
 0xbfb   :  { %v1221_v51 = vpack.c.bf16 %v1218_v49, %v1215_v48  ;;  %v8727_v49 = vld [vmem:[%s10613_s1 + $0x290] sm:$0xff]  }
 0xbfd   :  { %7941 = vmatmul.mubr.msk.bf16.vlgmr.msra.gmra.mrb[28].mxu0 %vm58_vm1, %v1221_v51  ;;  %v8729_v51 = vld [vmem:[%s10613_s1 + $0x2a0] sm:$0xff]  }
 0xbfe   :  { %7964 = vmatprep.mubr.msk.bf16.mxu0 %vm8962_vm0, %v8961_v1  ;;  %7957 = vmatpush3.bf16.msra.mxu0 %v8709_v54 }
 0xbff   :  { %7958 = vmatprep.subr.bf16.mxu0 %v8961_v1 }
 0xc02   :  { %7959 = vmatpush3.bf16.msra.mxu0 %v8710_v55 }
 0xc03   :  { %7960 = vmatprep.subr.bf16.mxu0 %v8961_v1 }
 0xc06   :  { %7961 = vmatpush3.bf16.msra.mxu0 %v8711_v0  ;;  %v8734_v0 = vld [vmem:[%s10613_s1 + $0x2c8] sm:$0xff]  }
 0xc07   :  { %7962 = vmatprep.subr.bf16.mxu0 %v8961_v1 }
 0xc0a   :  { %7963 = vmatpush3.bf16.msra.mxu0 %v8712_v2  ;;  %v6613_v2 = vld [vmem:[%s10614_s2 + $0x14] ss:$0 sm:$0xff] }
 0xc0b   :  { %7980 = vmatprep.subr.bf16.mxu0 %v8961_v1 }
 0xcd0   :  { %v1300_v57 = vpop.f32.mrb[28].mxu0 }
 0xcd1   :  { %v7942_v58 = vpop.f32.mrb[29].mxu0  ;;  %v1301_v60 = vadd.f32 %v6523_v56, %v1300_v57 }
 0xcd2   :  { %v1303_v59 = vpop.f32.mrb[30].mxu0 }
 0xcd3   :  { %v1304_v61 = vadd.f32 %v6523_v56, %v1303_v59  ;;  %v7943_v62 = vpop.f32.mrb[31].mxu0 }
 0xcd4   :  { %v8732_v62 = vld [vmem:[%s10613_s1 + $0x2b8] sm:$0xff]  }
 0xcd5   :  { %v1307_v63 = vpack.c.bf16 %v1304_v61, %v1301_v60  ;;  %v8731_v61 = vld [vmem:[%s10613_s1 + $0x2b0] sm:$0xff]  }
 0xcd7   :  { %7953 = vmatmul.mubr.msk.bf16.vlgmr.msra.gmra.mrb[28].mxu1 %vm58_vm1, %v1307_v63  ;;  %v8733_v63 = vld [vmem:[%s10613_s1 + $0x2c0] sm:$0xff]  }
 0xcd8   :  { %7976 = vmatprep.mubr.msk.bf16.mxu1 %vm8962_vm0, %v8961_v1  ;;  %7969 = vmatpush3.bf16.msra.mxu1 %v8713_v3 }
 0xcd9   :  { %7970 = vmatprep.subr.bf16.mxu1 %v8961_v1 }
 0xcdc   :  { %7971 = vmatpush3.bf16.msra.mxu1 %v8714_v4 }
 0xcdd   :  { %7972 = vmatprep.subr.bf16.mxu1 %v8961_v1 }
 0xce0   :  { %7973 = vmatpush3.bf16.msra.mxu1 %v8715_v13  ;;  %v8738_v13 = vld [vmem:[%s10613_s1 + $0x2e8] sm:$0xff]  }
 0xce1   :  { %7974 = vmatprep.subr.bf16.mxu1 %v8961_v1 }
 0xce4   :  { %7975 = vmatpush3.bf16.msra.mxu1 %v8716_v14  ;;  %v6628_v14 = vld [vmem:[%s10614_s2 + $0x15] ss:$0 sm:$0xff] }
 0xce5   :  { %7992 = vmatprep.subr.bf16.mxu1 %v8961_v1 }
 0xdaa   :  { %v1386_v6 = vpop.f32.mrb[28].mxu1 }
 0xdab   :  { %v7954_v7 = vpop.f32.mrb[29].mxu1  ;;  %v1387_v9 = vadd.f32 %v6538_v5, %v1386_v6 }
 0xdac   :  { %v1389_v8 = vpop.f32.mrb[30].mxu1 }
 0xdad   :  { %v1390_v10 = vadd.f32 %v6538_v5, %v1389_v8  ;;  %v7955_v11 = vpop.f32.mrb[31].mxu1 }
 0xdae   :  { %v8736_v11 = vld [vmem:[%s10613_s1 + $0x2d8] sm:$0xff]  }
 0xdaf   :  { %v1393_v12 = vpack.c.bf16 %v1390_v10, %v1387_v9  ;;  %v8735_v10 = vld [vmem:[%s10613_s1 + $0x2d0] sm:$0xff]  }
 0xdb1   :  { %7965 = vmatmul.mubr.msk.bf16.vlgmr.msra.gmra.mrb[32].mxu0 %vm58_vm1, %v1393_v12  ;;  %v8737_v12 = vld [vmem:[%s10613_s1 + $0x2e0] sm:$0xff]  }
 0xdb2   :  { %7988 = vmatprep.mubr.msk.bf16.mxu0 %vm8962_vm0, %v8961_v1  ;;  %7981 = vmatpush3.bf16.msra.mxu0 %v8717_v15 }
 0xdb3   :  { %7982 = vmatprep.subr.bf16.mxu0 %v8961_v1 }
 0xdb6   :  { %7983 = vmatpush3.bf16.msra.mxu0 %v8718_v16 }
 0xdb7   :  { %7984 = vmatprep.subr.bf16.mxu0 %v8961_v1 }
 0xdba   :  { %7985 = vmatpush3.bf16.msra.mxu0 %v8719_v25  ;;  %v8742_v25 = vld [vmem:[%s10613_s1 + $0x308] sm:$0xff]  }
 0xdbb   :  { %7986 = vmatprep.subr.bf16.mxu0 %v8961_v1 }
 0xdbe   :  { %7987 = vmatpush3.bf16.msra.mxu0 %v8720_v26  ;;  %v6643_v26 = vld [vmem:[%s10614_s2 + $0x16] ss:$0 sm:$0xff] }
 0xdbf   :  { %8004 = vmatprep.subr.bf16.mxu0 %v8961_v1 }
 0xe84   :  { %v1472_v18 = vpop.f32.mrb[32].mxu0 }
 0xe85   :  { %v7966_v19 = vpop.f32.mrb[33].mxu0  ;;  %v1473_v21 = vadd.f32 %v6553_v17, %v1472_v18 }
 0xe86   :  { %v1475_v20 = vpop.f32.mrb[34].mxu0 }
 0xe87   :  { %v1476_v22 = vadd.f32 %v6553_v17, %v1475_v20  ;;  %v7967_v23 = vpop.f32.mrb[35].mxu0 }
 0xe88   :  { %v8740_v23 = vld [vmem:[%s10613_s1 + $0x2f8] sm:$0xff]  }
 0xe89   :  { %v1479_v24 = vpack.c.bf16 %v1476_v22, %v1473_v21  ;;  %v8739_v22 = vld [vmem:[%s10613_s1 + $0x2f0] sm:$0xff]  }
 0xe8b   :  { %7977 = vmatmul.mubr.msk.bf16.vlgmr.msra.gmra.mrb[32].mxu1 %vm58_vm1, %v1479_v24  ;;  %v8741_v24 = vld [vmem:[%s10613_s1 + $0x300] sm:$0xff]  }
 0xe8c   :  { %8000 = vmatprep.mubr.msk.bf16.mxu1 %vm8962_vm0, %v8961_v1  ;;  %7993 = vmatpush3.bf16.msra.mxu1 %v8721_v27 }
 0xe8d   :  { %7994 = vmatprep.subr.bf16.mxu1 %v8961_v1 }
 0xe90   :  { %7995 = vmatpush3.bf16.msra.mxu1 %v8722_v28 }
 0xe91   :  { %7996 = vmatprep.subr.bf16.mxu1 %v8961_v1 }
 0xe94   :  { %7997 = vmatpush3.bf16.msra.mxu1 %v8723_v37  ;;  %v8746_v37 = vld [vmem:[%s10613_s1 + $0x328] sm:$0xff]  }
 0xe95   :  { %7998 = vmatprep.subr.bf16.mxu1 %v8961_v1 }
 0xe98   :  { %7999 = vmatpush3.bf16.msra.mxu1 %v8724_v38  ;;  %v6658_v38 = vld [vmem:[%s10614_s2 + $0x17] ss:$0 sm:$0xff] }
 0xe99   :  { %8016 = vmatprep.subr.bf16.mxu1 %v8961_v1 }
 0xf5e   :  { %v1558_v30 = vpop.f32.mrb[32].mxu1 }
 0xf5f   :  { %v7978_v31 = vpop.f32.mrb[33].mxu1  ;;  %v1559_v33 = vadd.f32 %v6568_v29, %v1558_v30 }
 0xf60   :  { %v1561_v32 = vpop.f32.mrb[34].mxu1 }
 0xf61   :  { %v1562_v34 = vadd.f32 %v6568_v29, %v1561_v32  ;;  %v7979_v35 = vpop.f32.mrb[35].mxu1 }
 0xf62   :  { %v8744_v35 = vld [vmem:[%s10613_s1 + $0x318] sm:$0xff]  }
 0xf63   :  { %v1565_v36 = vpack.c.bf16 %v1562_v34, %v1559_v33  ;;  %v8743_v34 = vld [vmem:[%s10613_s1 + $0x310] sm:$0xff]  }
 0xf65   :  { %7989 = vmatmul.mubr.msk.bf16.vlgmr.msra.gmra.mrb[36].mxu0 %vm58_vm1, %v1565_v36  ;;  %v8745_v36 = vld [vmem:[%s10613_s1 + $0x320] sm:$0xff]  }
 0xf66   :  { %8012 = vmatprep.mubr.msk.bf16.mxu0 %vm8962_vm0, %v8961_v1  ;;  %8005 = vmatpush3.bf16.msra.mxu0 %v8725_v39 }
 0xf67   :  { %8006 = vmatprep.subr.bf16.mxu0 %v8961_v1 }
 0xf6a   :  { %8007 = vmatpush3.bf16.msra.mxu0 %v8726_v40 }
 0xf6b   :  { %8008 = vmatprep.subr.bf16.mxu0 %v8961_v1 }
 0xf6e   :  { %8009 = vmatpush3.bf16.msra.mxu0 %v8727_v49  ;;  %v8750_v49 = vld [vmem:[%s10613_s1 + $0x348] sm:$0xff]  }
 0xf6f   :  { %8010 = vmatprep.subr.bf16.mxu0 %v8961_v1 }
 0xf72   :  { %8011 = vmatpush3.bf16.msra.mxu0 %v8728_v50  ;;  %v6673_v50 = vld [vmem:[%s10614_s2 + $0x18] ss:$0 sm:$0xff] }
 0xf73   :  { %8028 = vmatprep.subr.bf16.mxu0 %v8961_v1 }
0x1038   :  { %v1644_v42 = vpop.f32.mrb[36].mxu0 }
0x1039   :  { %v7990_v43 = vpop.f32.mrb[37].mxu0  ;;  %v1645_v45 = vadd.f32 %v6583_v41, %v1644_v42 }
0x103a   :  { %v1647_v44 = vpop.f32.mrb[38].mxu0 }
0x103b   :  { %v1648_v46 = vadd.f32 %v6583_v41, %v1647_v44  ;;  %v7991_v47 = vpop.f32.mrb[39].mxu0 }
0x103c   :  { %v8748_v47 = vld [vmem:[%s10613_s1 + $0x338] sm:$0xff]  }
0x103d   :  { %v1651_v48 = vpack.c.bf16 %v1648_v46, %v1645_v45  ;;  %v8747_v46 = vld [vmem:[%s10613_s1 + $0x330] sm:$0xff]  }
0x103f   :  { %8001 = vmatmul.mubr.msk.bf16.vlgmr.msra.gmra.mrb[36].mxu1 %vm58_vm1, %v1651_v48  ;;  %v8749_v48 = vld [vmem:[%s10613_s1 + $0x340] sm:$0xff]  }
0x1040   :  { %8024 = vmatprep.mubr.msk.bf16.mxu1 %vm8962_vm0, %v8961_v1  ;;  %8017 = vmatpush3.bf16.msra.mxu1 %v8729_v51 }
0x1041   :  { %8018 = vmatprep.subr.bf16.mxu1 %v8961_v1 }
0x1044   :  { %8019 = vmatpush3.bf16.msra.mxu1 %v8730_v52 }
0x1045   :  { %8020 = vmatprep.subr.bf16.mxu1 %v8961_v1 }
0x1048   :  { %8021 = vmatpush3.bf16.msra.mxu1 %v8731_v61  ;;  %v8754_v61 = vld [vmem:[%s10613_s1 + $0x368] sm:$0xff]  }
0x1049   :  { %8022 = vmatprep.subr.bf16.mxu1 %v8961_v1 }
0x104c   :  { %8023 = vmatpush3.bf16.msra.mxu1 %v8732_v62  ;;  %v6688_v62 = vld [vmem:[%s10614_s2 + $0x19] ss:$0 sm:$0xff] }
0x104d   :  { %8040 = vmatprep.subr.bf16.mxu1 %v8961_v1 }
0x1112   :  { %v1730_v54 = vpop.f32.mrb[36].mxu1 }
0x1113   :  { %v8002_v55 = vpop.f32.mrb[37].mxu1  ;;  %v1731_v57 = vadd.f32 %v6598_v53, %v1730_v54 }
0x1114   :  { %v1733_v56 = vpop.f32.mrb[38].mxu1 }
0x1115   :  { %v1734_v58 = vadd.f32 %v6598_v53, %v1733_v56  ;;  %v8003_v59 = vpop.f32.mrb[39].mxu1 }
0x1116   :  { %v8752_v59 = vld [vmem:[%s10613_s1 + $0x358] sm:$0xff]  }
0x1117   :  { %v1737_v60 = vpack.c.bf16 %v1734_v58, %v1731_v57  ;;  %v8751_v58 = vld [vmem:[%s10613_s1 + $0x350] sm:$0xff]  }
0x1119   :  { %8013 = vmatmul.mubr.msk.bf16.vlgmr.msra.gmra.mrb[40].mxu0 %vm58_vm1, %v1737_v60  ;;  %v8753_v60 = vld [vmem:[%s10613_s1 + $0x360] sm:$0xff]  }
0x111a   :  { %8036 = vmatprep.mubr.msk.bf16.mxu0 %vm8962_vm0, %v8961_v1  ;;  %8029 = vmatpush3.bf16.msra.mxu0 %v8733_v63 }
0x111b   :  { %8030 = vmatprep.subr.bf16.mxu0 %v8961_v1 }
0x111e   :  { %8031 = vmatpush3.bf16.msra.mxu0 %v8734_v0 }
0x111f   :  { %8032 = vmatprep.subr.bf16.mxu0 %v8961_v1 }
0x1122   :  { %8033 = vmatpush3.bf16.msra.mxu0 %v8735_v10  ;;  %v8758_v10 = vld [vmem:[%s10613_s1 + $0x388] sm:$0xff]  }
0x1123   :  { %8034 = vmatprep.subr.bf16.mxu0 %v8961_v1 }
0x1126   :  { %8035 = vmatpush3.bf16.msra.mxu0 %v8736_v11  ;;  %v6703_v11 = vld [vmem:[%s10614_s2 + $0x1a] ss:$0 sm:$0xff] }
0x1127   :  { %8052 = vmatprep.subr.bf16.mxu0 %v8961_v1 }
0x11ec   :  { %v1816_v3 = vpop.f32.mrb[40].mxu0 }
0x11ed   :  { %v8014_v4 = vpop.f32.mrb[41].mxu0  ;;  %v1817_v6 = vadd.f32 %v6613_v2, %v1816_v3 }
0x11ee   :  { %v1819_v5 = vpop.f32.mrb[42].mxu0 }
0x11ef   :  { %v1820_v7 = vadd.f32 %v6613_v2, %v1819_v5  ;;  %v8015_v8 = vpop.f32.mrb[43].mxu0 }
0x11f0   :  { %v8756_v8 = vld [vmem:[%s10613_s1 + $0x378] sm:$0xff]  }
0x11f1   :  { %v1823_v9 = vpack.c.bf16 %v1820_v7, %v1817_v6  ;;  %v8755_v7 = vld [vmem:[%s10613_s1 + $0x370] sm:$0xff]  }
0x11f3   :  { %8025 = vmatmul.mubr.msk.bf16.vlgmr.msra.gmra.mrb[40].mxu1 %vm58_vm1, %v1823_v9  ;;  %v8757_v9 = vld [vmem:[%s10613_s1 + $0x380] sm:$0xff]  }
0x11f4   :  { %8048 = vmatprep.mubr.msk.bf16.mxu1 %vm8962_vm0, %v8961_v1  ;;  %8041 = vmatpush3.bf16.msra.mxu1 %v8737_v12 }
0x11f5   :  { %8042 = vmatprep.subr.bf16.mxu1 %v8961_v1 }
0x11f8   :  { %8043 = vmatpush3.bf16.msra.mxu1 %v8738_v13 }
0x11f9   :  { %8044 = vmatprep.subr.bf16.mxu1 %v8961_v1 }
0x11fc   :  { %8045 = vmatpush3.bf16.msra.mxu1 %v8739_v22  ;;  %v8762_v22 = vld [vmem:[%s10613_s1 + $0x3a8] sm:$0xff]  }
0x11fd   :  { %8046 = vmatprep.subr.bf16.mxu1 %v8961_v1 }
0x1200   :  { %8047 = vmatpush3.bf16.msra.mxu1 %v8740_v23  ;;  %v6718_v23 = vld [vmem:[%s10614_s2 + $0x1b] ss:$0 sm:$0xff] }
0x1201   :  { %8064 = vmatprep.subr.bf16.mxu1 %v8961_v1 }
0x12c6   :  { %v1902_v15 = vpop.f32.mrb[40].mxu1 }
0x12c7   :  { %v8026_v16 = vpop.f32.mrb[41].mxu1  ;;  %v1903_v18 = vadd.f32 %v6628_v14, %v1902_v15 }
0x12c8   :  { %v1905_v17 = vpop.f32.mrb[42].mxu1 }
0x12c9   :  { %v1906_v19 = vadd.f32 %v6628_v14, %v1905_v17  ;;  %v8027_v20 = vpop.f32.mrb[43].mxu1 }
0x12ca   :  { %v8760_v20 = vld [vmem:[%s10613_s1 + $0x398] sm:$0xff]  }
0x12cb   :  { %v1909_v21 = vpack.c.bf16 %v1906_v19, %v1903_v18  ;;  %v8759_v19 = vld [vmem:[%s10613_s1 + $0x390] sm:$0xff]  }
0x12cd   :  { %8037 = vmatmul.mubr.msk.bf16.vlgmr.msra.gmra.mrb[44].mxu0 %vm58_vm1, %v1909_v21  ;;  %v8761_v21 = vld [vmem:[%s10613_s1 + $0x3a0] sm:$0xff]  }
0x12ce   :  { %8060 = vmatprep.mubr.msk.bf16.mxu0 %vm8962_vm0, %v8961_v1  ;;  %8053 = vmatpush3.bf16.msra.mxu0 %v8741_v24 }
0x12cf   :  { %8054 = vmatprep.subr.bf16.mxu0 %v8961_v1 }
0x12d2   :  { %8055 = vmatpush3.bf16.msra.mxu0 %v8742_v25 }
0x12d3   :  { %8056 = vmatprep.subr.bf16.mxu0 %v8961_v1 }
0x12d6   :  { %8057 = vmatpush3.bf16.msra.mxu0 %v8743_v34  ;;  %v8766_v34 = vld [vmem:[%s10613_s1 + $0x3c8] sm:$0xff]  }
0x12d7   :  { %8058 = vmatprep.subr.bf16.mxu0 %v8961_v1 }
0x12da   :  { %8059 = vmatpush3.bf16.msra.mxu0 %v8744_v35  ;;  %v6733_v35 = vld [vmem:[%s10614_s2 + $0x1c] ss:$0 sm:$0xff] }
0x12db   :  { %8076 = vmatprep.subr.bf16.mxu0 %v8961_v1 }
0x13a0   :  { %v1988_v27 = vpop.f32.mrb[44].mxu0 }
0x13a1   :  { %v8038_v28 = vpop.f32.mrb[45].mxu0  ;;  %v1989_v30 = vadd.f32 %v6643_v26, %v1988_v27 }
0x13a2   :  { %v1991_v29 = vpop.f32.mrb[46].mxu0 }
0x13a3   :  { %v1992_v31 = vadd.f32 %v6643_v26, %v1991_v29  ;;  %v8039_v32 = vpop.f32.mrb[47].mxu0 }
0x13a4   :  { %v8764_v32 = vld [vmem:[%s10613_s1 + $0x3b8] sm:$0xff]  }
0x13a5   :  { %v1995_v33 = vpack.c.bf16 %v1992_v31, %v1989_v30  ;;  %v8763_v31 = vld [vmem:[%s10613_s1 + $0x3b0] sm:$0xff]  }
0x13a7   :  { %8049 = vmatmul.mubr.msk.bf16.vlgmr.msra.gmra.mrb[44].mxu1 %vm58_vm1, %v1995_v33  ;;  %v8765_v33 = vld [vmem:[%s10613_s1 + $0x3c0] sm:$0xff]  }
0x13a8   :  { %8072 = vmatprep.mubr.msk.bf16.mxu1 %vm8962_vm0, %v8961_v1  ;;  %8065 = vmatpush3.bf16.msra.mxu1 %v8745_v36 }
0x13a9   :  { %8066 = vmatprep.subr.bf16.mxu1 %v8961_v1 }
0x13ac   :  { %8067 = vmatpush3.bf16.msra.mxu1 %v8746_v37 }
0x13ad   :  { %8068 = vmatprep.subr.bf16.mxu1 %v8961_v1 }
0x13b0   :  { %8069 = vmatpush3.bf16.msra.mxu1 %v8747_v46  ;;  %v8770_v46 = vld [vmem:[%s10613_s1 + $0x3e8] sm:$0xff]  }
0x13b1   :  { %8070 = vmatprep.subr.bf16.mxu1 %v8961_v1 }
0x13b4   :  { %8071 = vmatpush3.bf16.msra.mxu1 %v8748_v47  ;;  %v6748_v47 = vld [vmem:[%s10614_s2 + $0x1d] ss:$0 sm:$0xff] }
0x13b5   :  { %8088 = vmatprep.subr.bf16.mxu1 %v8961_v1 }
0x147a   :  { %v2074_v39 = vpop.f32.mrb[44].mxu1 }
0x147b   :  { %v8050_v40 = vpop.f32.mrb[45].mxu1  ;;  %v2075_v42 = vadd.f32 %v6658_v38, %v2074_v39 }
0x147c   :  { %v2077_v41 = vpop.f32.mrb[46].mxu1 }
0x147d   :  { %v2078_v43 = vadd.f32 %v6658_v38, %v2077_v41  ;;  %v8051_v44 = vpop.f32.mrb[47].mxu1 }
0x147e   :  { %v8768_v44 = vld [vmem:[%s10613_s1 + $0x3d8] sm:$0xff]  }
0x147f   :  { %v2081_v45 = vpack.c.bf16 %v2078_v43, %v2075_v42  ;;  %v8767_v43 = vld [vmem:[%s10613_s1 + $0x3d0] sm:$0xff]  }
0x1481   :  { %8061 = vmatmul.mubr.msk.bf16.vlgmr.msra.gmra.mrb[48].mxu0 %vm58_vm1, %v2081_v45  ;;  %v8769_v45 = vld [vmem:[%s10613_s1 + $0x3e0] sm:$0xff]  }
0x1482   :  { %8084 = vmatprep.mubr.msk.bf16.mxu0 %vm8962_vm0, %v8961_v1  ;;  %8077 = vmatpush3.bf16.msra.mxu0 %v8749_v48 }
0x1483   :  { %8078 = vmatprep.subr.bf16.mxu0 %v8961_v1 }
0x1486   :  { %8079 = vmatpush3.bf16.msra.mxu0 %v8750_v49 }
0x1487   :  { %8080 = vmatprep.subr.bf16.mxu0 %v8961_v1 }
0x148a   :  { %8081 = vmatpush3.bf16.msra.mxu0 %v8751_v58  ;;  %v8774_v58 = vld [vmem:[%s10613_s1 + $0x408] sm:$0xff]  }
0x148b   :  { %8082 = vmatprep.subr.bf16.mxu0 %v8961_v1 }
0x148e   :  { %8083 = vmatpush3.bf16.msra.mxu0 %v8752_v59  ;;  %v6763_v59 = vld [vmem:[%s10614_s2 + $0x1e] ss:$0 sm:$0xff] }
0x148f   :  { %8100 = vmatprep.subr.bf16.mxu0 %v8961_v1 }
0x1554   :  { %v2160_v51 = vpop.f32.mrb[48].mxu0 }
0x1555   :  { %v8062_v52 = vpop.f32.mrb[49].mxu0  ;;  %v2161_v54 = vadd.f32 %v6673_v50, %v2160_v51 }
0x1556   :  { %v2163_v53 = vpop.f32.mrb[50].mxu0 }
0x1557   :  { %v2164_v55 = vadd.f32 %v6673_v50, %v2163_v53  ;;  %v8063_v56 = vpop.f32.mrb[51].mxu0 }
0x1558   :  { %v8772_v56 = vld [vmem:[%s10613_s1 + $0x3f8] sm:$0xff]  }
0x1559   :  { %v2167_v57 = vpack.c.bf16 %v2164_v55, %v2161_v54  ;;  %v8771_v55 = vld [vmem:[%s10613_s1 + $0x3f0] sm:$0xff]  }
0x155b   :  { %8073 = vmatmul.mubr.msk.bf16.vlgmr.msra.gmra.mrb[48].mxu1 %vm58_vm1, %v2167_v57  ;;  %v8773_v57 = vld [vmem:[%s10613_s1 + $0x400] sm:$0xff]  }
0x155c   :  { %8096 = vmatprep.mubr.msk.bf16.mxu1 %vm8962_vm0, %v8961_v1  ;;  %8089 = vmatpush3.bf16.msra.mxu1 %v8753_v60 }
0x155d   :  { %8090 = vmatprep.subr.bf16.mxu1 %v8961_v1 }
0x1560   :  { %8091 = vmatpush3.bf16.msra.mxu1 %v8754_v61 }
0x1561   :  { %8092 = vmatprep.subr.bf16.mxu1 %v8961_v1 }
0x1564   :  { %8093 = vmatpush3.bf16.msra.mxu1 %v8755_v7  ;;  %v8778_v7 = vld [vmem:[%s10613_s1 + $0x428] sm:$0xff]  }
0x1565   :  { %8094 = vmatprep.subr.bf16.mxu1 %v8961_v1 }
0x1568   :  { %8095 = vmatpush3.bf16.msra.mxu1 %v8756_v8  ;;  %v6778_v8 = vld [vmem:[%s10614_s2 + $0x1f] ss:$0 sm:$0xff] }
0x1569   :  { %8112 = vmatprep.subr.bf16.mxu1 %v8961_v1 }
0x162e   :  { %v2246_v63 = vpop.f32.mrb[48].mxu1 }
0x162f   :  { %v8074_v0 = vpop.f32.mrb[49].mxu1  ;;  %v2247_v3 = vadd.f32 %v6688_v62, %v2246_v63 }
0x1630   :  { %v2249_v2 = vpop.f32.mrb[50].mxu1 }
0x1631   :  { %v2250_v4 = vadd.f32 %v6688_v62, %v2249_v2  ;;  %v8075_v5 = vpop.f32.mrb[51].mxu1 }
0x1632   :  { %v8776_v5 = vld [vmem:[%s10613_s1 + $0x418] sm:$0xff]  }
0x1633   :  { %v2253_v6 = vpack.c.bf16 %v2250_v4, %v2247_v3  ;;  %v8775_v4 = vld [vmem:[%s10613_s1 + $0x410] sm:$0xff]  }
0x1635   :  { %8085 = vmatmul.mubr.msk.bf16.vlgmr.msra.gmra.mrb[52].mxu0 %vm58_vm1, %v2253_v6  ;;  %v8777_v6 = vld [vmem:[%s10613_s1 + $0x420] sm:$0xff]  }
0x1636   :  { %8108 = vmatprep.mubr.msk.bf16.mxu0 %vm8962_vm0, %v8961_v1  ;;  %8101 = vmatpush3.bf16.msra.mxu0 %v8757_v9 }
0x1637   :  { %8102 = vmatprep.subr.bf16.mxu0 %v8961_v1 }
0x163a   :  { %8103 = vmatpush3.bf16.msra.mxu0 %v8758_v10 }
0x163b   :  { %8104 = vmatprep.subr.bf16.mxu0 %v8961_v1 }
0x163e   :  { %8105 = vmatpush3.bf16.msra.mxu0 %v8759_v19  ;;  %v8782_v19 = vld [vmem:[%s10613_s1 + $0x448] sm:$0xff]  }
0x163f   :  { %8106 = vmatprep.subr.bf16.mxu0 %v8961_v1 }
0x1642   :  { %8107 = vmatpush3.bf16.msra.mxu0 %v8760_v20  ;;  %v6793_v20 = vld [vmem:[%s10614_s2 + $0x20] ss:$0 sm:$0xff] }
0x1643   :  { %8124 = vmatprep.subr.bf16.mxu0 %v8961_v1 }
0x1708   :  { %v2332_v12 = vpop.f32.mrb[52].mxu0 }
0x1709   :  { %v8086_v13 = vpop.f32.mrb[53].mxu0  ;;  %v2333_v15 = vadd.f32 %v6703_v11, %v2332_v12 }
0x170a   :  { %v2335_v14 = vpop.f32.mrb[54].mxu0 }
0x170b   :  { %v2336_v16 = vadd.f32 %v6703_v11, %v2335_v14  ;;  %v8087_v17 = vpop.f32.mrb[55].mxu0 }
0x170c   :  { %v8780_v17 = vld [vmem:[%s10613_s1 + $0x438] sm:$0xff]  }
0x170d   :  { %v2339_v18 = vpack.c.bf16 %v2336_v16, %v2333_v15  ;;  %v8779_v16 = vld [vmem:[%s10613_s1 + $0x430] sm:$0xff]  }
0x170f   :  { %8097 = vmatmul.mubr.msk.bf16.vlgmr.msra.gmra.mrb[52].mxu1 %vm58_vm1, %v2339_v18  ;;  %v8781_v18 = vld [vmem:[%s10613_s1 + $0x440] sm:$0xff]  }
0x1710   :  { %8120 = vmatprep.mubr.msk.bf16.mxu1 %vm8962_vm0, %v8961_v1  ;;  %8113 = vmatpush3.bf16.msra.mxu1 %v8761_v21 }
0x1711   :  { %8114 = vmatprep.subr.bf16.mxu1 %v8961_v1 }
0x1714   :  { %8115 = vmatpush3.bf16.msra.mxu1 %v8762_v22 }
0x1715   :  { %8116 = vmatprep.subr.bf16.mxu1 %v8961_v1 }
0x1718   :  { %8117 = vmatpush3.bf16.msra.mxu1 %v8763_v31  ;;  %v8786_v31 = vld [vmem:[%s10613_s1 + $0x468] sm:$0xff]  }
0x1719   :  { %8118 = vmatprep.subr.bf16.mxu1 %v8961_v1 }
0x171c   :  { %8119 = vmatpush3.bf16.msra.mxu1 %v8764_v32  ;;  %v6808_v32 = vld [vmem:[%s10614_s2 + $0x21] ss:$0 sm:$0xff] }
0x171d   :  { %8136 = vmatprep.subr.bf16.mxu1 %v8961_v1 }
0x17e2   :  { %v2418_v24 = vpop.f32.mrb[52].mxu1 }
0x17e3   :  { %v8098_v25 = vpop.f32.mrb[53].mxu1  ;;  %v2419_v27 = vadd.f32 %v6718_v23, %v2418_v24 }
0x17e4   :  { %v2421_v26 = vpop.f32.mrb[54].mxu1 }
0x17e5   :  { %v2422_v28 = vadd.f32 %v6718_v23, %v2421_v26  ;;  %v8099_v29 = vpop.f32.mrb[55].mxu1 }
0x17e6   :  { %v8784_v29 = vld [vmem:[%s10613_s1 + $0x458] sm:$0xff]  }
0x17e7   :  { %v2425_v30 = vpack.c.bf16 %v2422_v28, %v2419_v27  ;;  %v8783_v28 = vld [vmem:[%s10613_s1 + $0x450] sm:$0xff]  }
0x17e9   :  { %8109 = vmatmul.mubr.msk.bf16.vlgmr.msra.gmra.mrb[56].mxu0 %vm58_vm1, %v2425_v30  ;;  %v8785_v30 = vld [vmem:[%s10613_s1 + $0x460] sm:$0xff]  }
0x17ea   :  { %8132 = vmatprep.mubr.msk.bf16.mxu0 %vm8962_vm0, %v8961_v1  ;;  %8125 = vmatpush3.bf16.msra.mxu0 %v8765_v33 }
0x17eb   :  { %8126 = vmatprep.subr.bf16.mxu0 %v8961_v1 }
0x17ee   :  { %8127 = vmatpush3.bf16.msra.mxu0 %v8766_v34 }
0x17ef   :  { %8128 = vmatprep.subr.bf16.mxu0 %v8961_v1 }
0x17f2   :  { %8129 = vmatpush3.bf16.msra.mxu0 %v8767_v43  ;;  %v8790_v43 = vld [vmem:[%s10613_s1 + $0x488] sm:$0xff]  }
0x17f3   :  { %8130 = vmatprep.subr.bf16.mxu0 %v8961_v1 }
0x17f6   :  { %8131 = vmatpush3.bf16.msra.mxu0 %v8768_v44  ;;  %v6823_v44 = vld [vmem:[%s10614_s2 + $0x22] ss:$0 sm:$0xff] }
0x17f7   :  { %8148 = vmatprep.subr.bf16.mxu0 %v8961_v1 }
0x18bc   :  { %v2504_v36 = vpop.f32.mrb[56].mxu0 }
0x18bd   :  { %v8110_v37 = vpop.f32.mrb[57].mxu0  ;;  %v2505_v39 = vadd.f32 %v6733_v35, %v2504_v36 }
0x18be   :  { %v2507_v38 = vpop.f32.mrb[58].mxu0 }
0x18bf   :  { %v2508_v40 = vadd.f32 %v6733_v35, %v2507_v38  ;;  %v8111_v41 = vpop.f32.mrb[59].mxu0 }
0x18c0   :  { %v8788_v41 = vld [vmem:[%s10613_s1 + $0x478] sm:$0xff]  }
0x18c1   :  { %v2511_v42 = vpack.c.bf16 %v2508_v40, %v2505_v39  ;;  %v8787_v40 = vld [vmem:[%s10613_s1 + $0x470] sm:$0xff]  }
0x18c3   :  { %8121 = vmatmul.mubr.msk.bf16.vlgmr.msra.gmra.mrb[56].mxu1 %vm58_vm1, %v2511_v42  ;;  %v8789_v42 = vld [vmem:[%s10613_s1 + $0x480] sm:$0xff]  }
0x18c4   :  { %8144 = vmatprep.mubr.msk.bf16.mxu1 %vm8962_vm0, %v8961_v1  ;;  %8137 = vmatpush3.bf16.msra.mxu1 %v8769_v45 }
0x18c5   :  { %8138 = vmatprep.subr.bf16.mxu1 %v8961_v1 }
0x18c8   :  { %8139 = vmatpush3.bf16.msra.mxu1 %v8770_v46 }
0x18c9   :  { %8140 = vmatprep.subr.bf16.mxu1 %v8961_v1 }
0x18cc   :  { %8141 = vmatpush3.bf16.msra.mxu1 %v8771_v55  ;;  %v8794_v55 = vld [vmem:[%s10613_s1 + $0x4a8] sm:$0xff]  }
0x18cd   :  { %8142 = vmatprep.subr.bf16.mxu1 %v8961_v1 }
0x18d0   :  { %8143 = vmatpush3.bf16.msra.mxu1 %v8772_v56  ;;  %v6838_v56 = vld [vmem:[%s10614_s2 + $0x23] ss:$0 sm:$0xff] }
0x18d1   :  { %8160 = vmatprep.subr.bf16.mxu1 %v8961_v1 }
0x1996   :  { %v2590_v48 = vpop.f32.mrb[56].mxu1 }
0x1997   :  { %v8122_v49 = vpop.f32.mrb[57].mxu1  ;;  %v2591_v51 = vadd.f32 %v6748_v47, %v2590_v48 }
0x1998   :  { %v2593_v50 = vpop.f32.mrb[58].mxu1 }
0x1999   :  { %v2594_v52 = vadd.f32 %v6748_v47, %v2593_v50  ;;  %v8123_v53 = vpop.f32.mrb[59].mxu1 }
0x199a   :  { %v8792_v53 = vld [vmem:[%s10613_s1 + $0x498] sm:$0xff]  }
0x199b   :  { %v2597_v54 = vpack.c.bf16 %v2594_v52, %v2591_v51  ;;  %v8791_v52 = vld [vmem:[%s10613_s1 + $0x490] sm:$0xff]  }
0x199d   :  { %8133 = vmatmul.mubr.msk.bf16.vlgmr.msra.gmra.mrb[60].mxu0 %vm58_vm1, %v2597_v54  ;;  %v8793_v54 = vld [vmem:[%s10613_s1 + $0x4a0] sm:$0xff]  }
0x199e   :  { %8156 = vmatprep.mubr.msk.bf16.mxu0 %vm8962_vm0, %v8961_v1  ;;  %8149 = vmatpush3.bf16.msra.mxu0 %v8773_v57 }
0x199f   :  { %8150 = vmatprep.subr.bf16.mxu0 %v8961_v1 }
0x19a2   :  { %8151 = vmatpush3.bf16.msra.mxu0 %v8774_v58 }
0x19a3   :  { %8152 = vmatprep.subr.bf16.mxu0 %v8961_v1 }
0x19a6   :  { %8153 = vmatpush3.bf16.msra.mxu0 %v8775_v4  ;;  %v8798_v4 = vld [vmem:[%s10613_s1 + $0x4c8] sm:$0xff]  }
0x19a7   :  { %8154 = vmatprep.subr.bf16.mxu0 %v8961_v1 }
0x19aa   :  { %8155 = vmatpush3.bf16.msra.mxu0 %v8776_v5  ;;  %v6853_v5 = vld [vmem:[%s10614_s2 + $0x24] ss:$0 sm:$0xff] }
0x19ab   :  { %8172 = vmatprep.subr.bf16.mxu0 %v8961_v1 }
0x1a70   :  { %v2676_v60 = vpop.f32.mrb[60].mxu0 }
0x1a71   :  { %v8134_v61 = vpop.f32.mrb[61].mxu0  ;;  %v2677_v63 = vadd.f32 %v6763_v59, %v2676_v60 }
0x1a72   :  { %v2679_v62 = vpop.f32.mrb[62].mxu0 }
0x1a73   :  { %v2680_v0 = vadd.f32 %v6763_v59, %v2679_v62  ;;  %v8135_v2 = vpop.f32.mrb[63].mxu0 }
0x1a74   :  { %v8796_v2 = vld [vmem:[%s10613_s1 + $0x4b8] sm:$0xff]  }
0x1a75   :  { %v2683_v3 = vpack.c.bf16 %v2680_v0, %v2677_v63  ;;  %v8795_v0 = vld [vmem:[%s10613_s1 + $0x4b0] sm:$0xff]  }
0x1a77   :  { %8145 = vmatmul.mubr.msk.bf16.vlgmr.msra.gmra.mrb[60].mxu1 %vm58_vm1, %v2683_v3  ;;  %v8797_v3 = vld [vmem:[%s10613_s1 + $0x4c0] sm:$0xff]  }
0x1a78   :  { %8168 = vmatprep.mubr.msk.bf16.mxu1 %vm8962_vm0, %v8961_v1  ;;  %8161 = vmatpush3.bf16.msra.mxu1 %v8777_v6 }
0x1a79   :  { %8162 = vmatprep.subr.bf16.mxu1 %v8961_v1 }
0x1a7c   :  { %8163 = vmatpush3.bf16.msra.mxu1 %v8778_v7 }
0x1a7d   :  { %8164 = vmatprep.subr.bf16.mxu1 %v8961_v1 }
0x1a80   :  { %8165 = vmatpush3.bf16.msra.mxu1 %v8779_v16  ;;  %v8802_v16 = vld [vmem:[%s10613_s1 + $0x4e8] sm:$0xff]  }
0x1a81   :  { %8166 = vmatprep.subr.bf16.mxu1 %v8961_v1 }
0x1a84   :  { %8167 = vmatpush3.bf16.msra.mxu1 %v8780_v17  ;;  %v6868_v17 = vld [vmem:[%s10614_s2 + $0x25] ss:$0 sm:$0xff] }
0x1a85   :  { %8184 = vmatprep.subr.bf16.mxu1 %v8961_v1 }
0x1b4a   :  { %v2762_v9 = vpop.f32.mrb[60].mxu1 }
0x1b4b   :  { %v8146_v10 = vpop.f32.mrb[61].mxu1  ;;  %v2763_v12 = vadd.f32 %v6778_v8, %v2762_v9 }
0x1b4c   :  { %v2765_v11 = vpop.f32.mrb[62].mxu1 }
0x1b4d   :  { %v2766_v13 = vadd.f32 %v6778_v8, %v2765_v11  ;;  %v8147_v14 = vpop.f32.mrb[63].mxu1 }
0x1b4e   :  { %v8800_v14 = vld [vmem:[%s10613_s1 + $0x4d8] sm:$0xff]  }
0x1b4f   :  { %v2769_v15 = vpack.c.bf16 %v2766_v13, %v2763_v12  ;;  %v8799_v13 = vld [vmem:[%s10613_s1 + $0x4d0] sm:$0xff]  }
0x1b51   :  { %8157 = vmatmul.mubr.msk.bf16.vlgmr.msra.gmra.mrb[64].mxu0 %vm58_vm1, %v2769_v15  ;;  %v8801_v15 = vld [vmem:[%s10613_s1 + $0x4e0] sm:$0xff]  }
0x1b52   :  { %8180 = vmatprep.mubr.msk.bf16.mxu0 %vm8962_vm0, %v8961_v1  ;;  %8173 = vmatpush3.bf16.msra.mxu0 %v8781_v18 }
0x1b53   :  { %8174 = vmatprep.subr.bf16.mxu0 %v8961_v1 }
0x1b56   :  { %8175 = vmatpush3.bf16.msra.mxu0 %v8782_v19 }
0x1b57   :  { %8176 = vmatprep.subr.bf16.mxu0 %v8961_v1 }
0x1b5a   :  { %8177 = vmatpush3.bf16.msra.mxu0 %v8783_v28  ;;  %v8806_v28 = vld [vmem:[%s10613_s1 + $0x508] sm:$0xff]  }
0x1b5b   :  { %8178 = vmatprep.subr.bf16.mxu0 %v8961_v1 }
0x1b5e   :  { %8179 = vmatpush3.bf16.msra.mxu0 %v8784_v29  ;;  %v6883_v29 = vld [vmem:[%s10614_s2 + $0x26] ss:$0 sm:$0xff] }
0x1b5f   :  { %8196 = vmatprep.subr.bf16.mxu0 %v8961_v1 }
0x1c24   :  { %v2848_v21 = vpop.f32.mrb[64].mxu0 }
0x1c25   :  { %v8158_v22 = vpop.f32.mrb[65].mxu0  ;;  %v2849_v24 = vadd.f32 %v6793_v20, %v2848_v21 }
0x1c26   :  { %v2851_v23 = vpop.f32.mrb[66].mxu0 }
0x1c27   :  { %v2852_v25 = vadd.f32 %v6793_v20, %v2851_v23  ;;  %v8159_v26 = vpop.f32.mrb[67].mxu0 }
0x1c28   :  { %v8804_v26 = vld [vmem:[%s10613_s1 + $0x4f8] sm:$0xff]  }
0x1c29   :  { %v2855_v27 = vpack.c.bf16 %v2852_v25, %v2849_v24  ;;  %v8803_v25 = vld [vmem:[%s10613_s1 + $0x4f0] sm:$0xff]  }
0x1c2b   :  { %8169 = vmatmul.mubr.msk.bf16.vlgmr.msra.gmra.mrb[64].mxu1 %vm58_vm1, %v2855_v27  ;;  %v8805_v27 = vld [vmem:[%s10613_s1 + $0x500] sm:$0xff]  }
0x1c2c   :  { %8192 = vmatprep.mubr.msk.bf16.mxu1 %vm8962_vm0, %v8961_v1  ;;  %8185 = vmatpush3.bf16.msra.mxu1 %v8785_v30 }
0x1c2d   :  { %8186 = vmatprep.subr.bf16.mxu1 %v8961_v1 }
0x1c30   :  { %8187 = vmatpush3.bf16.msra.mxu1 %v8786_v31 }
0x1c31   :  { %8188 = vmatprep.subr.bf16.mxu1 %v8961_v1 }
0x1c34   :  { %8189 = vmatpush3.bf16.msra.mxu1 %v8787_v40  ;;  %v8810_v40 = vld [vmem:[%s10613_s1 + $0x528] sm:$0xff]  }
0x1c35   :  { %8190 = vmatprep.subr.bf16.mxu1 %v8961_v1 }
0x1c38   :  { %8191 = vmatpush3.bf16.msra.mxu1 %v8788_v41  ;;  %v6898_v41 = vld [vmem:[%s10614_s2 + $0x27] ss:$0 sm:$0xff] }
0x1c39   :  { %8208 = vmatprep.subr.bf16.mxu1 %v8961_v1 }
0x1cfe   :  { %v2934_v33 = vpop.f32.mrb[64].mxu1 }
0x1cff   :  { %v8170_v34 = vpop.f32.mrb[65].mxu1  ;;  %v2935_v36 = vadd.f32 %v6808_v32, %v2934_v33 }
0x1d00   :  { %v2937_v35 = vpop.f32.mrb[66].mxu1 }
0x1d01   :  { %v2938_v37 = vadd.f32 %v6808_v32, %v2937_v35  ;;  %v8171_v38 = vpop.f32.mrb[67].mxu1 }
0x1d02   :  { %v8808_v38 = vld [vmem:[%s10613_s1 + $0x518] sm:$0xff]  }
0x1d03   :  { %v2941_v39 = vpack.c.bf16 %v2938_v37, %v2935_v36  ;;  %v8807_v37 = vld [vmem:[%s10613_s1 + $0x510] sm:$0xff]  }
0x1d05   :  { %8181 = vmatmul.mubr.msk.bf16.vlgmr.msra.gmra.mrb[68].mxu0 %vm58_vm1, %v2941_v39  ;;  %v8809_v39 = vld [vmem:[%s10613_s1 + $0x520] sm:$0xff]  }
0x1d06   :  { %8204 = vmatprep.mubr.msk.bf16.mxu0 %vm8962_vm0, %v8961_v1  ;;  %8197 = vmatpush3.bf16.msra.mxu0 %v8789_v42 }
0x1d07   :  { %8198 = vmatprep.subr.bf16.mxu0 %v8961_v1 }
0x1d0a   :  { %8199 = vmatpush3.bf16.msra.mxu0 %v8790_v43 }
0x1d0b   :  { %8200 = vmatprep.subr.bf16.mxu0 %v8961_v1 }
0x1d0e   :  { %8201 = vmatpush3.bf16.msra.mxu0 %v8791_v52  ;;  %v8814_v52 = vld [vmem:[%s10613_s1 + $0x548] sm:$0xff]  }
0x1d0f   :  { %8202 = vmatprep.subr.bf16.mxu0 %v8961_v1 }
0x1d12   :  { %8203 = vmatpush3.bf16.msra.mxu0 %v8792_v53  ;;  %v6913_v53 = vld [vmem:[%s10614_s2 + $0x28] ss:$0 sm:$0xff] }
0x1d13   :  { %8220 = vmatprep.subr.bf16.mxu0 %v8961_v1 }
0x1dd8   :  { %v3020_v45 = vpop.f32.mrb[68].mxu0 }
0x1dd9   :  { %v8182_v46 = vpop.f32.mrb[69].mxu0  ;;  %v3021_v48 = vadd.f32 %v6823_v44, %v3020_v45 }
0x1dda   :  { %v3023_v47 = vpop.f32.mrb[70].mxu0 }
0x1ddb   :  { %v3024_v49 = vadd.f32 %v6823_v44, %v3023_v47  ;;  %v8183_v50 = vpop.f32.mrb[71].mxu0 }
0x1ddc   :  { %v8812_v50 = vld [vmem:[%s10613_s1 + $0x538] sm:$0xff]  }
0x1ddd   :  { %v3027_v51 = vpack.c.bf16 %v3024_v49, %v3021_v48  ;;  %v8811_v49 = vld [vmem:[%s10613_s1 + $0x530] sm:$0xff]  }
0x1ddf   :  { %8193 = vmatmul.mubr.msk.bf16.vlgmr.msra.gmra.mrb[68].mxu1 %vm58_vm1, %v3027_v51  ;;  %v8813_v51 = vld [vmem:[%s10613_s1 + $0x540] sm:$0xff]  }
0x1de0   :  { %8216 = vmatprep.mubr.msk.bf16.mxu1 %vm8962_vm0, %v8961_v1  ;;  %8209 = vmatpush3.bf16.msra.mxu1 %v8793_v54 }
0x1de1   :  { %8210 = vmatprep.subr.bf16.mxu1 %v8961_v1 }
0x1de4   :  { %8211 = vmatpush3.bf16.msra.mxu1 %v8794_v55 }
0x1de5   :  { %8212 = vmatprep.subr.bf16.mxu1 %v8961_v1 }
0x1de8   :  { %8213 = vmatpush3.bf16.msra.mxu1 %v8795_v0  ;;  %v8818_v0 = vld [vmem:[%s10613_s1 + $0x568] sm:$0xff]  }
0x1de9   :  { %8214 = vmatprep.subr.bf16.mxu1 %v8961_v1 }
0x1dec   :  { %8215 = vmatpush3.bf16.msra.mxu1 %v8796_v2  ;;  %v6928_v2 = vld [vmem:[%s10614_s2 + $0x29] ss:$0 sm:$0xff] }
0x1ded   :  { %8232 = vmatprep.subr.bf16.mxu1 %v8961_v1 }
0x1eb2   :  { %v3106_v57 = vpop.f32.mrb[68].mxu1 }
0x1eb3   :  { %v8194_v58 = vpop.f32.mrb[69].mxu1  ;;  %v3107_v60 = vadd.f32 %v6838_v56, %v3106_v57 }
0x1eb4   :  { %v3109_v59 = vpop.f32.mrb[70].mxu1 }
0x1eb5   :  { %v3110_v61 = vadd.f32 %v6838_v56, %v3109_v59  ;;  %v8195_v62 = vpop.f32.mrb[71].mxu1 }
0x1eb6   :  { %v8816_v62 = vld [vmem:[%s10613_s1 + $0x558] sm:$0xff]  }
0x1eb7   :  { %v3113_v63 = vpack.c.bf16 %v3110_v61, %v3107_v60  ;;  %v8815_v61 = vld [vmem:[%s10613_s1 + $0x550] sm:$0xff]  }
0x1eb9   :  { %8205 = vmatmul.mubr.msk.bf16.vlgmr.msra.gmra.mrb[72].mxu0 %vm58_vm1, %v3113_v63  ;;  %v8817_v63 = vld [vmem:[%s10613_s1 + $0x560] sm:$0xff]  }
0x1eba   :  { %8228 = vmatprep.mubr.msk.bf16.mxu0 %vm8962_vm0, %v8961_v1  ;;  %8221 = vmatpush3.bf16.msra.mxu0 %v8797_v3 }
0x1ebb   :  { %8222 = vmatprep.subr.bf16.mxu0 %v8961_v1 }
0x1ebe   :  { %8223 = vmatpush3.bf16.msra.mxu0 %v8798_v4 }
0x1ebf   :  { %8224 = vmatprep.subr.bf16.mxu0 %v8961_v1 }
0x1ec2   :  { %8225 = vmatpush3.bf16.msra.mxu0 %v8799_v13  ;;  %v8822_v13 = vld [vmem:[%s10613_s1 + $0x588] sm:$0xff]  }
0x1ec3   :  { %8226 = vmatprep.subr.bf16.mxu0 %v8961_v1 }
0x1ec6   :  { %8227 = vmatpush3.bf16.msra.mxu0 %v8800_v14  ;;  %v6943_v14 = vld [vmem:[%s10614_s2 + $0x2a] ss:$0 sm:$0xff] }
0x1ec7   :  { %8244 = vmatprep.subr.bf16.mxu0 %v8961_v1 }
0x1f8c   :  { %v3192_v6 = vpop.f32.mrb[72].mxu0 }
0x1f8d   :  { %v8206_v7 = vpop.f32.mrb[73].mxu0  ;;  %v3193_v9 = vadd.f32 %v6853_v5, %v3192_v6 }
0x1f8e   :  { %v3195_v8 = vpop.f32.mrb[74].mxu0 }
0x1f8f   :  { %v3196_v10 = vadd.f32 %v6853_v5, %v3195_v8  ;;  %v8207_v11 = vpop.f32.mrb[75].mxu0 }
0x1f90   :  { %v8820_v11 = vld [vmem:[%s10613_s1 + $0x578] sm:$0xff]  }
0x1f91   :  { %v3199_v12 = vpack.c.bf16 %v3196_v10, %v3193_v9  ;;  %v8819_v10 = vld [vmem:[%s10613_s1 + $0x570] sm:$0xff]  }
0x1f93   :  { %8217 = vmatmul.mubr.msk.bf16.vlgmr.msra.gmra.mrb[72].mxu1 %vm58_vm1, %v3199_v12  ;;  %v8821_v12 = vld [vmem:[%s10613_s1 + $0x580] sm:$0xff]  }
0x1f94   :  { %8240 = vmatprep.mubr.msk.bf16.mxu1 %vm8962_vm0, %v8961_v1  ;;  %8233 = vmatpush3.bf16.msra.mxu1 %v8801_v15 }
0x1f95   :  { %8234 = vmatprep.subr.bf16.mxu1 %v8961_v1 }
0x1f98   :  { %8235 = vmatpush3.bf16.msra.mxu1 %v8802_v16 }
0x1f99   :  { %8236 = vmatprep.subr.bf16.mxu1 %v8961_v1 }
0x1f9c   :  { %8237 = vmatpush3.bf16.msra.mxu1 %v8803_v25  ;;  %v8826_v25 = vld [vmem:[%s10613_s1 + $0x5a8] sm:$0xff]  }
0x1f9d   :  { %8238 = vmatprep.subr.bf16.mxu1 %v8961_v1 }
0x1fa0   :  { %8239 = vmatpush3.bf16.msra.mxu1 %v8804_v26  ;;  %v6958_v26 = vld [vmem:[%s10614_s2 + $0x2b] ss:$0 sm:$0xff] }
0x1fa1   :  { %8256 = vmatprep.subr.bf16.mxu1 %v8961_v1 }
0x2066   :  { %v3278_v18 = vpop.f32.mrb[72].mxu1 }
0x2067   :  { %v8218_v19 = vpop.f32.mrb[73].mxu1  ;;  %v3279_v21 = vadd.f32 %v6868_v17, %v3278_v18 }
0x2068   :  { %v3281_v20 = vpop.f32.mrb[74].mxu1 }
0x2069   :  { %v3282_v22 = vadd.f32 %v6868_v17, %v3281_v20  ;;  %v8219_v23 = vpop.f32.mrb[75].mxu1 }
0x206a   :  { %v8824_v23 = vld [vmem:[%s10613_s1 + $0x598] sm:$0xff]  }
0x206b   :  { %v3285_v24 = vpack.c.bf16 %v3282_v22, %v3279_v21  ;;  %v8823_v22 = vld [vmem:[%s10613_s1 + $0x590] sm:$0xff]  }
0x206d   :  { %8229 = vmatmul.mubr.msk.bf16.vlgmr.msra.gmra.mrb[76].mxu0 %vm58_vm1, %v3285_v24  ;;  %v8825_v24 = vld [vmem:[%s10613_s1 + $0x5a0] sm:$0xff]  }
0x206e   :  { %8252 = vmatprep.mubr.msk.bf16.mxu0 %vm8962_vm0, %v8961_v1  ;;  %8245 = vmatpush3.bf16.msra.mxu0 %v8805_v27 }
0x206f   :  { %8246 = vmatprep.subr.bf16.mxu0 %v8961_v1 }
0x2072   :  { %8247 = vmatpush3.bf16.msra.mxu0 %v8806_v28 }
0x2073   :  { %8248 = vmatprep.subr.bf16.mxu0 %v8961_v1 }
0x2076   :  { %8249 = vmatpush3.bf16.msra.mxu0 %v8807_v37  ;;  %v8830_v37 = vld [vmem:[%s10613_s1 + $0x5c8] sm:$0xff]  }
0x2077   :  { %8250 = vmatprep.subr.bf16.mxu0 %v8961_v1 }
0x207a   :  { %8251 = vmatpush3.bf16.msra.mxu0 %v8808_v38  ;;  %v6973_v38 = vld [vmem:[%s10614_s2 + $0x2c] ss:$0 sm:$0xff] }
0x207b   :  { %8268 = vmatprep.subr.bf16.mxu0 %v8961_v1 }
0x2140   :  { %v3364_v30 = vpop.f32.mrb[76].mxu0 }
0x2141   :  { %v8230_v31 = vpop.f32.mrb[77].mxu0  ;;  %v3365_v33 = vadd.f32 %v6883_v29, %v3364_v30 }
0x2142   :  { %v3367_v32 = vpop.f32.mrb[78].mxu0 }
0x2143   :  { %v3368_v34 = vadd.f32 %v6883_v29, %v3367_v32  ;;  %v8231_v35 = vpop.f32.mrb[79].mxu0 }
0x2144   :  { %v8828_v35 = vld [vmem:[%s10613_s1 + $0x5b8] sm:$0xff]  }
0x2145   :  { %v3371_v36 = vpack.c.bf16 %v3368_v34, %v3365_v33  ;;  %v8827_v34 = vld [vmem:[%s10613_s1 + $0x5b0] sm:$0xff]  }
0x2147   :  { %8241 = vmatmul.mubr.msk.bf16.vlgmr.msra.gmra.mrb[76].mxu1 %vm58_vm1, %v3371_v36  ;;  %v8829_v36 = vld [vmem:[%s10613_s1 + $0x5c0] sm:$0xff]  }
0x2148   :  { %8264 = vmatprep.mubr.msk.bf16.mxu1 %vm8962_vm0, %v8961_v1  ;;  %8257 = vmatpush3.bf16.msra.mxu1 %v8809_v39 }
0x2149   :  { %8258 = vmatprep.subr.bf16.mxu1 %v8961_v1 }
0x214c   :  { %8259 = vmatpush3.bf16.msra.mxu1 %v8810_v40 }
0x214d   :  { %8260 = vmatprep.subr.bf16.mxu1 %v8961_v1 }
0x2150   :  { %8261 = vmatpush3.bf16.msra.mxu1 %v8811_v49  ;;  %v8834_v49 = vld [vmem:[%s10613_s1 + $0x5e8] sm:$0xff]  }
0x2151   :  { %8262 = vmatprep.subr.bf16.mxu1 %v8961_v1 }
0x2154   :  { %8263 = vmatpush3.bf16.msra.mxu1 %v8812_v50  ;;  %v6988_v50 = vld [vmem:[%s10614_s2 + $0x2d] ss:$0 sm:$0xff] }
0x2155   :  { %8280 = vmatprep.subr.bf16.mxu1 %v8961_v1 }
0x221a   :  { %v3450_v42 = vpop.f32.mrb[76].mxu1 }
0x221b   :  { %v8242_v43 = vpop.f32.mrb[77].mxu1  ;;  %v3451_v45 = vadd.f32 %v6898_v41, %v3450_v42 }
0x221c   :  { %v3453_v44 = vpop.f32.mrb[78].mxu1 }
0x221d   :  { %v3454_v46 = vadd.f32 %v6898_v41, %v3453_v44  ;;  %v8243_v47 = vpop.f32.mrb[79].mxu1 }
0x221e   :  { %v8832_v47 = vld [vmem:[%s10613_s1 + $0x5d8] sm:$0xff]  }
0x221f   :  { %v3457_v48 = vpack.c.bf16 %v3454_v46, %v3451_v45  ;;  %v8831_v46 = vld [vmem:[%s10613_s1 + $0x5d0] sm:$0xff]  }
0x2221   :  { %8253 = vmatmul.mubr.msk.bf16.vlgmr.msra.gmra.mrb[80].mxu0 %vm58_vm1, %v3457_v48  ;;  %v8833_v48 = vld [vmem:[%s10613_s1 + $0x5e0] sm:$0xff]  }
0x2222   :  { %8276 = vmatprep.mubr.msk.bf16.mxu0 %vm8962_vm0, %v8961_v1  ;;  %8269 = vmatpush3.bf16.msra.mxu0 %v8813_v51 }
0x2223   :  { %8270 = vmatprep.subr.bf16.mxu0 %v8961_v1 }
0x2226   :  { %8271 = vmatpush3.bf16.msra.mxu0 %v8814_v52 }
0x2227   :  { %8272 = vmatprep.subr.bf16.mxu0 %v8961_v1 }
0x222a   :  { %8273 = vmatpush3.bf16.msra.mxu0 %v8815_v61  ;;  %v8838_v61 = vld [vmem:[%s10613_s1 + $0x608] sm:$0xff]  }
0x222b   :  { %8274 = vmatprep.subr.bf16.mxu0 %v8961_v1 }
0x222e   :  { %8275 = vmatpush3.bf16.msra.mxu0 %v8816_v62  ;;  %v7003_v62 = vld [vmem:[%s10614_s2 + $0x2e] ss:$0 sm:$0xff] }
0x222f   :  { %8292 = vmatprep.subr.bf16.mxu0 %v8961_v1 }
0x22f4   :  { %v3536_v54 = vpop.f32.mrb[80].mxu0 }
0x22f5   :  { %v8254_v55 = vpop.f32.mrb[81].mxu0  ;;  %v3537_v57 = vadd.f32 %v6913_v53, %v3536_v54 }
0x22f6   :  { %v3539_v56 = vpop.f32.mrb[82].mxu0 }
0x22f7   :  { %v3540_v58 = vadd.f32 %v6913_v53, %v3539_v56  ;;  %v8255_v59 = vpop.f32.mrb[83].mxu0 }
0x22f8   :  { %v8836_v59 = vld [vmem:[%s10613_s1 + $0x5f8] sm:$0xff]  }
0x22f9   :  { %v3543_v60 = vpack.c.bf16 %v3540_v58, %v3537_v57  ;;  %v8835_v58 = vld [vmem:[%s10613_s1 + $0x5f0] sm:$0xff]  }
0x22fb   :  { %8265 = vmatmul.mubr.msk.bf16.vlgmr.msra.gmra.mrb[80].mxu1 %vm58_vm1, %v3543_v60  ;;  %v8837_v60 = vld [vmem:[%s10613_s1 + $0x600] sm:$0xff]  }
0x22fc   :  { %8288 = vmatprep.mubr.msk.bf16.mxu1 %vm8962_vm0, %v8961_v1  ;;  %8281 = vmatpush3.bf16.msra.mxu1 %v8817_v63 }
0x22fd   :  { %8282 = vmatprep.subr.bf16.mxu1 %v8961_v1 }
0x2300   :  { %8283 = vmatpush3.bf16.msra.mxu1 %v8818_v0 }
0x2301   :  { %8284 = vmatprep.subr.bf16.mxu1 %v8961_v1 }
0x2304   :  { %8285 = vmatpush3.bf16.msra.mxu1 %v8819_v10  ;;  %v8842_v10 = vld [vmem:[%s10613_s1 + $0x628] sm:$0xff]  }
0x2305   :  { %8286 = vmatprep.subr.bf16.mxu1 %v8961_v1 }
0x2308   :  { %8287 = vmatpush3.bf16.msra.mxu1 %v8820_v11  ;;  %v7018_v11 = vld [vmem:[%s10614_s2 + $0x2f] ss:$0 sm:$0xff] }
0x2309   :  { %8304 = vmatprep.subr.bf16.mxu1 %v8961_v1 }
0x23ce   :  { %v3622_v3 = vpop.f32.mrb[80].mxu1 }
0x23cf   :  { %v8266_v4 = vpop.f32.mrb[81].mxu1  ;;  %v3623_v6 = vadd.f32 %v6928_v2, %v3622_v3 }
0x23d0   :  { %v3625_v5 = vpop.f32.mrb[82].mxu1 }
0x23d1   :  { %v3626_v7 = vadd.f32 %v6928_v2, %v3625_v5  ;;  %v8267_v8 = vpop.f32.mrb[83].mxu1 }
0x23d2   :  { %v8840_v8 = vld [vmem:[%s10613_s1 + $0x618] sm:$0xff]  }
0x23d3   :  { %v3629_v9 = vpack.c.bf16 %v3626_v7, %v3623_v6  ;;  %v8839_v7 = vld [vmem:[%s10613_s1 + $0x610] sm:$0xff]  }
0x23d5   :  { %8277 = vmatmul.mubr.msk.bf16.vlgmr.msra.gmra.mrb[84].mxu0 %vm58_vm1, %v3629_v9  ;;  %v8841_v9 = vld [vmem:[%s10613_s1 + $0x620] sm:$0xff]  }
0x23d6   :  { %8300 = vmatprep.mubr.msk.bf16.mxu0 %vm8962_vm0, %v8961_v1  ;;  %8293 = vmatpush3.bf16.msra.mxu0 %v8821_v12 }
0x23d7   :  { %8294 = vmatprep.subr.bf16.mxu0 %v8961_v1 }
0x23da   :  { %8295 = vmatpush3.bf16.msra.mxu0 %v8822_v13 }
0x23db   :  { %8296 = vmatprep.subr.bf16.mxu0 %v8961_v1 }
0x23de   :  { %8297 = vmatpush3.bf16.msra.mxu0 %v8823_v22  ;;  %v8846_v22 = vld [vmem:[%s10613_s1 + $0x648] sm:$0xff]  }
0x23df   :  { %8298 = vmatprep.subr.bf16.mxu0 %v8961_v1 }
0x23e2   :  { %8299 = vmatpush3.bf16.msra.mxu0 %v8824_v23  ;;  %v7033_v23 = vld [vmem:[%s10614_s2 + $0x30] ss:$0 sm:$0xff] }
0x23e3   :  { %8316 = vmatprep.subr.bf16.mxu0 %v8961_v1 }
0x24a8   :  { %v3708_v15 = vpop.f32.mrb[84].mxu0 }
0x24a9   :  { %v8278_v16 = vpop.f32.mrb[85].mxu0  ;;  %v3709_v18 = vadd.f32 %v6943_v14, %v3708_v15 }
0x24aa   :  { %v3711_v17 = vpop.f32.mrb[86].mxu0 }
0x24ab   :  { %v3712_v19 = vadd.f32 %v6943_v14, %v3711_v17  ;;  %v8279_v20 = vpop.f32.mrb[87].mxu0 }
0x24ac   :  { %v8844_v20 = vld [vmem:[%s10613_s1 + $0x638] sm:$0xff]  }
0x24ad   :  { %v3715_v21 = vpack.c.bf16 %v3712_v19, %v3709_v18  ;;  %v8843_v19 = vld [vmem:[%s10613_s1 + $0x630] sm:$0xff]  }
0x24af   :  { %8289 = vmatmul.mubr.msk.bf16.vlgmr.msra.gmra.mrb[84].mxu1 %vm58_vm1, %v3715_v21  ;;  %v8845_v21 = vld [vmem:[%s10613_s1 + $0x640] sm:$0xff]  }
0x24b0   :  { %8312 = vmatprep.mubr.msk.bf16.mxu1 %vm8962_vm0, %v8961_v1  ;;  %8305 = vmatpush3.bf16.msra.mxu1 %v8825_v24 }
0x24b1   :  { %8306 = vmatprep.subr.bf16.mxu1 %v8961_v1 }
0x24b4   :  { %8307 = vmatpush3.bf16.msra.mxu1 %v8826_v25 }
0x24b5   :  { %8308 = vmatprep.subr.bf16.mxu1 %v8961_v1 }
0x24b8   :  { %8309 = vmatpush3.bf16.msra.mxu1 %v8827_v34  ;;  %v8850_v34 = vld [vmem:[%s10613_s1 + $0x668] sm:$0xff]  }
0x24b9   :  { %8310 = vmatprep.subr.bf16.mxu1 %v8961_v1 }
0x24bc   :  { %8311 = vmatpush3.bf16.msra.mxu1 %v8828_v35  ;;  %v7048_v35 = vld [vmem:[%s10614_s2 + $0x31] ss:$0 sm:$0xff] }
0x24bd   :  { %8328 = vmatprep.subr.bf16.mxu1 %v8961_v1 }
0x2582   :  { %v3794_v27 = vpop.f32.mrb[84].mxu1 }
0x2583   :  { %v8290_v28 = vpop.f32.mrb[85].mxu1  ;;  %v3795_v30 = vadd.f32 %v6958_v26, %v3794_v27 }
0x2584   :  { %v3797_v29 = vpop.f32.mrb[86].mxu1 }
0x2585   :  { %v3798_v31 = vadd.f32 %v6958_v26, %v3797_v29  ;;  %v8291_v32 = vpop.f32.mrb[87].mxu1 }
0x2586   :  { %v8848_v32 = vld [vmem:[%s10613_s1 + $0x658] sm:$0xff]  }
0x2587   :  { %v3801_v33 = vpack.c.bf16 %v3798_v31, %v3795_v30  ;;  %v8847_v31 = vld [vmem:[%s10613_s1 + $0x650] sm:$0xff]  }
0x2589   :  { %8301 = vmatmul.mubr.msk.bf16.vlgmr.msra.gmra.mrb[88].mxu0 %vm58_vm1, %v3801_v33  ;;  %v8849_v33 = vld [vmem:[%s10613_s1 + $0x660] sm:$0xff]  }
0x258a   :  { %8324 = vmatprep.mubr.msk.bf16.mxu0 %vm8962_vm0, %v8961_v1  ;;  %8317 = vmatpush3.bf16.msra.mxu0 %v8829_v36 }
0x258b   :  { %8318 = vmatprep.subr.bf16.mxu0 %v8961_v1 }
0x258e   :  { %8319 = vmatpush3.bf16.msra.mxu0 %v8830_v37 }
0x258f   :  { %8320 = vmatprep.subr.bf16.mxu0 %v8961_v1 }
0x2592   :  { %8321 = vmatpush3.bf16.msra.mxu0 %v8831_v46  ;;  %v8854_v46 = vld [vmem:[%s10613_s1 + $0x688] sm:$0xff]  }
0x2593   :  { %8322 = vmatprep.subr.bf16.mxu0 %v8961_v1 }
0x2596   :  { %8323 = vmatpush3.bf16.msra.mxu0 %v8832_v47  ;;  %v7063_v47 = vld [vmem:[%s10614_s2 + $0x32] ss:$0 sm:$0xff] }
0x2597   :  { %8340 = vmatprep.subr.bf16.mxu0 %v8961_v1 }
0x265c   :  { %v3880_v39 = vpop.f32.mrb[88].mxu0 }
0x265d   :  { %v8302_v40 = vpop.f32.mrb[89].mxu0  ;;  %v3881_v42 = vadd.f32 %v6973_v38, %v3880_v39 }
0x265e   :  { %v3883_v41 = vpop.f32.mrb[90].mxu0 }
0x265f   :  { %v3884_v43 = vadd.f32 %v6973_v38, %v3883_v41  ;;  %v8303_v44 = vpop.f32.mrb[91].mxu0 }
0x2660   :  { %v8852_v44 = vld [vmem:[%s10613_s1 + $0x678] sm:$0xff]  }
0x2661   :  { %v3887_v45 = vpack.c.bf16 %v3884_v43, %v3881_v42  ;;  %v8851_v43 = vld [vmem:[%s10613_s1 + $0x670] sm:$0xff]  }
0x2663   :  { %8313 = vmatmul.mubr.msk.bf16.vlgmr.msra.gmra.mrb[88].mxu1 %vm58_vm1, %v3887_v45  ;;  %v8853_v45 = vld [vmem:[%s10613_s1 + $0x680] sm:$0xff]  }
0x2664   :  { %8336 = vmatprep.mubr.msk.bf16.mxu1 %vm8962_vm0, %v8961_v1  ;;  %8329 = vmatpush3.bf16.msra.mxu1 %v8833_v48 }
0x2665   :  { %8330 = vmatprep.subr.bf16.mxu1 %v8961_v1 }
0x2668   :  { %8331 = vmatpush3.bf16.msra.mxu1 %v8834_v49 }
0x2669   :  { %8332 = vmatprep.subr.bf16.mxu1 %v8961_v1 }
0x266c   :  { %8333 = vmatpush3.bf16.msra.mxu1 %v8835_v58  ;;  %v8858_v58 = vld [vmem:[%s10613_s1 + $0x6a8] sm:$0xff]  }
0x266d   :  { %8334 = vmatprep.subr.bf16.mxu1 %v8961_v1 }
0x2670   :  { %8335 = vmatpush3.bf16.msra.mxu1 %v8836_v59  ;;  %v7078_v59 = vld [vmem:[%s10614_s2 + $0x33] ss:$0 sm:$0xff] }
0x2671   :  { %8352 = vmatprep.subr.bf16.mxu1 %v8961_v1 }
0x2736   :  { %v3966_v51 = vpop.f32.mrb[88].mxu1 }
0x2737   :  { %v8314_v52 = vpop.f32.mrb[89].mxu1  ;;  %v3967_v54 = vadd.f32 %v6988_v50, %v3966_v51 }
0x2738   :  { %v3969_v53 = vpop.f32.mrb[90].mxu1 }
0x2739   :  { %v3970_v55 = vadd.f32 %v6988_v50, %v3969_v53  ;;  %v8315_v56 = vpop.f32.mrb[91].mxu1 }
0x273a   :  { %v8856_v56 = vld [vmem:[%s10613_s1 + $0x698] sm:$0xff]  }
0x273b   :  { %v3973_v57 = vpack.c.bf16 %v3970_v55, %v3967_v54  ;;  %v8855_v55 = vld [vmem:[%s10613_s1 + $0x690] sm:$0xff]  }
0x273d   :  { %8325 = vmatmul.mubr.msk.bf16.vlgmr.msra.gmra.mrb[92].mxu0 %vm58_vm1, %v3973_v57  ;;  %v8857_v57 = vld [vmem:[%s10613_s1 + $0x6a0] sm:$0xff]  }
0x273e   :  { %8348 = vmatprep.mubr.msk.bf16.mxu0 %vm8962_vm0, %v8961_v1  ;;  %8341 = vmatpush3.bf16.msra.mxu0 %v8837_v60 }
0x273f   :  { %8342 = vmatprep.subr.bf16.mxu0 %v8961_v1 }
0x2742   :  { %8343 = vmatpush3.bf16.msra.mxu0 %v8838_v61 }
0x2743   :  { %8344 = vmatprep.subr.bf16.mxu0 %v8961_v1 }
0x2746   :  { %8345 = vmatpush3.bf16.msra.mxu0 %v8839_v7  ;;  %v8862_v7 = vld [vmem:[%s10613_s1 + $0x6c8] sm:$0xff]  }
0x2747   :  { %8346 = vmatprep.subr.bf16.mxu0 %v8961_v1 }
0x274a   :  { %8347 = vmatpush3.bf16.msra.mxu0 %v8840_v8  ;;  %v7093_v8 = vld [vmem:[%s10614_s2 + $0x34] ss:$0 sm:$0xff] }
0x274b   :  { %8364 = vmatprep.subr.bf16.mxu0 %v8961_v1 }
0x2810   :  { %v4052_v63 = vpop.f32.mrb[92].mxu0 }
0x2811   :  { %v8326_v0 = vpop.f32.mrb[93].mxu0  ;;  %v4053_v3 = vadd.f32 %v7003_v62, %v4052_v63 }
0x2812   :  { %v4055_v2 = vpop.f32.mrb[94].mxu0 }
0x2813   :  { %v4056_v4 = vadd.f32 %v7003_v62, %v4055_v2  ;;  %v8327_v5 = vpop.f32.mrb[95].mxu0 }
0x2814   :  { %v8860_v5 = vld [vmem:[%s10613_s1 + $0x6b8] sm:$0xff]  }
0x2815   :  { %v4059_v6 = vpack.c.bf16 %v4056_v4, %v4053_v3  ;;  %v8859_v4 = vld [vmem:[%s10613_s1 + $0x6b0] sm:$0xff]  }
0x2817   :  { %8337 = vmatmul.mubr.msk.bf16.vlgmr.msra.gmra.mrb[92].mxu1 %vm58_vm1, %v4059_v6  ;;  %v8861_v6 = vld [vmem:[%s10613_s1 + $0x6c0] sm:$0xff]  }
0x2818   :  { %8360 = vmatprep.mubr.msk.bf16.mxu1 %vm8962_vm0, %v8961_v1  ;;  %8353 = vmatpush3.bf16.msra.mxu1 %v8841_v9 }
0x2819   :  { %8354 = vmatprep.subr.bf16.mxu1 %v8961_v1 }
0x281c   :  { %8355 = vmatpush3.bf16.msra.mxu1 %v8842_v10 }
0x281d   :  { %8356 = vmatprep.subr.bf16.mxu1 %v8961_v1 }
0x2820   :  { %8357 = vmatpush3.bf16.msra.mxu1 %v8843_v19  ;;  %v8866_v19 = vld [vmem:[%s10613_s1 + $0x6e8] sm:$0xff]  }
0x2821   :  { %8358 = vmatprep.subr.bf16.mxu1 %v8961_v1 }
0x2824   :  { %8359 = vmatpush3.bf16.msra.mxu1 %v8844_v20  ;;  %v7108_v20 = vld [vmem:[%s10614_s2 + $0x35] ss:$0 sm:$0xff] }
0x2825   :  { %8376 = vmatprep.subr.bf16.mxu1 %v8961_v1 }
0x28ea   :  { %v4138_v12 = vpop.f32.mrb[92].mxu1 }
0x28eb   :  { %v8338_v13 = vpop.f32.mrb[93].mxu1  ;;  %v4139_v15 = vadd.f32 %v7018_v11, %v4138_v12 }
0x28ec   :  { %v4141_v14 = vpop.f32.mrb[94].mxu1 }
0x28ed   :  { %v4142_v16 = vadd.f32 %v7018_v11, %v4141_v14  ;;  %v8339_v17 = vpop.f32.mrb[95].mxu1 }
0x28ee   :  { %v8864_v17 = vld [vmem:[%s10613_s1 + $0x6d8] sm:$0xff]  }
0x28ef   :  { %v4145_v18 = vpack.c.bf16 %v4142_v16, %v4139_v15  ;;  %v8863_v16 = vld [vmem:[%s10613_s1 + $0x6d0] sm:$0xff]  }
0x28f1   :  { %8349 = vmatmul.mubr.msk.bf16.vlgmr.msra.gmra.mrb[96].mxu0 %vm58_vm1, %v4145_v18  ;;  %v8865_v18 = vld [vmem:[%s10613_s1 + $0x6e0] sm:$0xff]  }
0x28f2   :  { %8372 = vmatprep.mubr.msk.bf16.mxu0 %vm8962_vm0, %v8961_v1  ;;  %8365 = vmatpush3.bf16.msra.mxu0 %v8845_v21 }
0x28f3   :  { %8366 = vmatprep.subr.bf16.mxu0 %v8961_v1 }
0x28f6   :  { %8367 = vmatpush3.bf16.msra.mxu0 %v8846_v22 }
0x28f7   :  { %8368 = vmatprep.subr.bf16.mxu0 %v8961_v1 }
0x28fa   :  { %8369 = vmatpush3.bf16.msra.mxu0 %v8847_v31  ;;  %v8870_v31 = vld [vmem:[%s10613_s1 + $0x708] sm:$0xff]  }
0x28fb   :  { %8370 = vmatprep.subr.bf16.mxu0 %v8961_v1 }
0x28fe   :  { %8371 = vmatpush3.bf16.msra.mxu0 %v8848_v32  ;;  %v7123_v32 = vld [vmem:[%s10614_s2 + $0x36] ss:$0 sm:$0xff] }
0x28ff   :  { %8388 = vmatprep.subr.bf16.mxu0 %v8961_v1 }
0x29c4   :  { %v4224_v24 = vpop.f32.mrb[96].mxu0 }
0x29c5   :  { %v8350_v25 = vpop.f32.mrb[97].mxu0  ;;  %v4225_v27 = vadd.f32 %v7033_v23, %v4224_v24 }
0x29c6   :  { %v4227_v26 = vpop.f32.mrb[98].mxu0 }
0x29c7   :  { %v4228_v28 = vadd.f32 %v7033_v23, %v4227_v26  ;;  %v8351_v29 = vpop.f32.mrb[99].mxu0 }
0x29c8   :  { %v8868_v29 = vld [vmem:[%s10613_s1 + $0x6f8] sm:$0xff]  }
0x29c9   :  { %v4231_v30 = vpack.c.bf16 %v4228_v28, %v4225_v27  ;;  %v8867_v28 = vld [vmem:[%s10613_s1 + $0x6f0] sm:$0xff]  }
0x29cb   :  { %8361 = vmatmul.mubr.msk.bf16.vlgmr.msra.gmra.mrb[96].mxu1 %vm58_vm1, %v4231_v30  ;;  %v8869_v30 = vld [vmem:[%s10613_s1 + $0x700] sm:$0xff]  }
0x29cc   :  { %8384 = vmatprep.mubr.msk.bf16.mxu1 %vm8962_vm0, %v8961_v1  ;;  %8377 = vmatpush3.bf16.msra.mxu1 %v8849_v33 }
0x29cd   :  { %8378 = vmatprep.subr.bf16.mxu1 %v8961_v1 }
0x29d0   :  { %8379 = vmatpush3.bf16.msra.mxu1 %v8850_v34 }
0x29d1   :  { %8380 = vmatprep.subr.bf16.mxu1 %v8961_v1 }
0x29d4   :  { %8381 = vmatpush3.bf16.msra.mxu1 %v8851_v43  ;;  %v8874_v43 = vld [vmem:[%s10613_s1 + $0x728] sm:$0xff]  }
0x29d5   :  { %8382 = vmatprep.subr.bf16.mxu1 %v8961_v1 }
0x29d8   :  { %8383 = vmatpush3.bf16.msra.mxu1 %v8852_v44  ;;  %v7138_v44 = vld [vmem:[%s10614_s2 + $0x37] ss:$0 sm:$0xff] }
0x29d9   :  { %8400 = vmatprep.subr.bf16.mxu1 %v8961_v1 }
0x2a9e   :  { %v4310_v36 = vpop.f32.mrb[96].mxu1 }
0x2a9f   :  { %v8362_v37 = vpop.f32.mrb[97].mxu1  ;;  %v4311_v39 = vadd.f32 %v7048_v35, %v4310_v36 }
0x2aa0   :  { %v4313_v38 = vpop.f32.mrb[98].mxu1 }
0x2aa1   :  { %v4314_v40 = vadd.f32 %v7048_v35, %v4313_v38  ;;  %v8363_v41 = vpop.f32.mrb[99].mxu1 }
0x2aa2   :  { %v8872_v41 = vld [vmem:[%s10613_s1 + $0x718] sm:$0xff]  }
0x2aa3   :  { %v4317_v42 = vpack.c.bf16 %v4314_v40, %v4311_v39  ;;  %v8871_v40 = vld [vmem:[%s10613_s1 + $0x710] sm:$0xff]  }
0x2aa5   :  { %8373 = vmatmul.mubr.msk.bf16.vlgmr.msra.gmra.mrb[100].mxu0 %vm58_vm1, %v4317_v42  ;;  %v8873_v42 = vld [vmem:[%s10613_s1 + $0x720] sm:$0xff]  }
0x2aa6   :  { %8396 = vmatprep.mubr.msk.bf16.mxu0 %vm8962_vm0, %v8961_v1  ;;  %8389 = vmatpush3.bf16.msra.mxu0 %v8853_v45 }
0x2aa7   :  { %8390 = vmatprep.subr.bf16.mxu0 %v8961_v1 }
0x2aaa   :  { %8391 = vmatpush3.bf16.msra.mxu0 %v8854_v46 }
0x2aab   :  { %8392 = vmatprep.subr.bf16.mxu0 %v8961_v1 }
0x2aae   :  { %8393 = vmatpush3.bf16.msra.mxu0 %v8855_v55  ;;  %v8878_v55 = vld [vmem:[%s10613_s1 + $0x748] sm:$0xff]  }
0x2aaf   :  { %8394 = vmatprep.subr.bf16.mxu0 %v8961_v1 }
0x2ab2   :  { %8395 = vmatpush3.bf16.msra.mxu0 %v8856_v56  ;;  %v7153_v56 = vld [vmem:[%s10614_s2 + $0x38] ss:$0 sm:$0xff] }
0x2ab3   :  { %8412 = vmatprep.subr.bf16.mxu0 %v8961_v1 }
0x2b78   :  { %v4396_v48 = vpop.f32.mrb[100].mxu0 }
0x2b79   :  { %v8374_v49 = vpop.f32.mrb[101].mxu0  ;;  %v4397_v51 = vadd.f32 %v7063_v47, %v4396_v48 }
0x2b7a   :  { %v4399_v50 = vpop.f32.mrb[102].mxu0 }
0x2b7b   :  { %v4400_v52 = vadd.f32 %v7063_v47, %v4399_v50  ;;  %v8375_v53 = vpop.f32.mrb[103].mxu0 }
0x2b7c   :  { %v8876_v53 = vld [vmem:[%s10613_s1 + $0x738] sm:$0xff]  }
0x2b7d   :  { %v4403_v54 = vpack.c.bf16 %v4400_v52, %v4397_v51  ;;  %v8875_v52 = vld [vmem:[%s10613_s1 + $0x730] sm:$0xff]  }
0x2b7f   :  { %8385 = vmatmul.mubr.msk.bf16.vlgmr.msra.gmra.mrb[100].mxu1 %vm58_vm1, %v4403_v54  ;;  %v8877_v54 = vld [vmem:[%s10613_s1 + $0x740] sm:$0xff]  }
0x2b80   :  { %8408 = vmatprep.mubr.msk.bf16.mxu1 %vm8962_vm0, %v8961_v1  ;;  %8401 = vmatpush3.bf16.msra.mxu1 %v8857_v57 }
0x2b81   :  { %8402 = vmatprep.subr.bf16.mxu1 %v8961_v1 }
0x2b84   :  { %8403 = vmatpush3.bf16.msra.mxu1 %v8858_v58 }
0x2b85   :  { %8404 = vmatprep.subr.bf16.mxu1 %v8961_v1 }
0x2b88   :  { %8405 = vmatpush3.bf16.msra.mxu1 %v8859_v4  ;;  %v8882_v4 = vld [vmem:[%s10613_s1 + $0x768] sm:$0xff]  }
0x2b89   :  { %8406 = vmatprep.subr.bf16.mxu1 %v8961_v1 }
0x2b8c   :  { %8407 = vmatpush3.bf16.msra.mxu1 %v8860_v5  ;;  %v7168_v5 = vld [vmem:[%s10614_s2 + $0x39] ss:$0 sm:$0xff] }
0x2b8d   :  { %8424 = vmatprep.subr.bf16.mxu1 %v8961_v1 }
0x2c52   :  { %v4482_v60 = vpop.f32.mrb[100].mxu1 }
0x2c53   :  { %v8386_v61 = vpop.f32.mrb[101].mxu1  ;;  %v4483_v63 = vadd.f32 %v7078_v59, %v4482_v60 }
0x2c54   :  { %v4485_v62 = vpop.f32.mrb[102].mxu1 }
0x2c55   :  { %v4486_v0 = vadd.f32 %v7078_v59, %v4485_v62  ;;  %v8387_v2 = vpop.f32.mrb[103].mxu1 }
0x2c56   :  { %v8880_v2 = vld [vmem:[%s10613_s1 + $0x758] sm:$0xff]  }
0x2c57   :  { %v4489_v3 = vpack.c.bf16 %v4486_v0, %v4483_v63  ;;  %v8879_v0 = vld [vmem:[%s10613_s1 + $0x750] sm:$0xff]  }
0x2c59   :  { %8397 = vmatmul.mubr.msk.bf16.vlgmr.msra.gmra.mrb[104].mxu0 %vm58_vm1, %v4489_v3  ;;  %v8881_v3 = vld [vmem:[%s10613_s1 + $0x760] sm:$0xff]  }
0x2c5a   :  { %8420 = vmatprep.mubr.msk.bf16.mxu0 %vm8962_vm0, %v8961_v1  ;;  %8413 = vmatpush3.bf16.msra.mxu0 %v8861_v6 }
0x2c5b   :  { %8414 = vmatprep.subr.bf16.mxu0 %v8961_v1 }
0x2c5e   :  { %8415 = vmatpush3.bf16.msra.mxu0 %v8862_v7 }
0x2c5f   :  { %8416 = vmatprep.subr.bf16.mxu0 %v8961_v1 }
0x2c62   :  { %8417 = vmatpush3.bf16.msra.mxu0 %v8863_v16  ;;  %v8886_v16 = vld [vmem:[%s10613_s1 + $0x788] sm:$0xff]  }
0x2c63   :  { %8418 = vmatprep.subr.bf16.mxu0 %v8961_v1 }
0x2c66   :  { %8419 = vmatpush3.bf16.msra.mxu0 %v8864_v17  ;;  %v7183_v17 = vld [vmem:[%s10614_s2 + $0x3a] ss:$0 sm:$0xff] }
0x2c67   :  { %8436 = vmatprep.subr.bf16.mxu0 %v8961_v1 }
0x2d2c   :  { %v4568_v9 = vpop.f32.mrb[104].mxu0 }
0x2d2d   :  { %v8398_v10 = vpop.f32.mrb[105].mxu0  ;;  %v4569_v12 = vadd.f32 %v7093_v8, %v4568_v9 }
0x2d2e   :  { %v4571_v11 = vpop.f32.mrb[106].mxu0 }
0x2d2f   :  { %v4572_v13 = vadd.f32 %v7093_v8, %v4571_v11  ;;  %v8399_v14 = vpop.f32.mrb[107].mxu0 }
0x2d30   :  { %v8884_v14 = vld [vmem:[%s10613_s1 + $0x778] sm:$0xff]  }
0x2d31   :  { %v4575_v15 = vpack.c.bf16 %v4572_v13, %v4569_v12  ;;  %v8883_v13 = vld [vmem:[%s10613_s1 + $0x770] sm:$0xff]  }
0x2d33   :  { %8409 = vmatmul.mubr.msk.bf16.vlgmr.msra.gmra.mrb[104].mxu1 %vm58_vm1, %v4575_v15  ;;  %v8885_v15 = vld [vmem:[%s10613_s1 + $0x780] sm:$0xff]  }
0x2d34   :  { %8432 = vmatprep.mubr.msk.bf16.mxu1 %vm8962_vm0, %v8961_v1  ;;  %8425 = vmatpush3.bf16.msra.mxu1 %v8865_v18 }
0x2d35   :  { %8426 = vmatprep.subr.bf16.mxu1 %v8961_v1 }
0x2d38   :  { %8427 = vmatpush3.bf16.msra.mxu1 %v8866_v19 }
0x2d39   :  { %8428 = vmatprep.subr.bf16.mxu1 %v8961_v1 }
0x2d3c   :  { %8429 = vmatpush3.bf16.msra.mxu1 %v8867_v28  ;;  %v8890_v28 = vld [vmem:[%s10613_s1 + $0x7a8] sm:$0xff]  }
0x2d3d   :  { %8430 = vmatprep.subr.bf16.mxu1 %v8961_v1 }
0x2d40   :  { %8431 = vmatpush3.bf16.msra.mxu1 %v8868_v29  ;;  %v7198_v29 = vld [vmem:[%s10614_s2 + $0x3b] ss:$0 sm:$0xff] }
0x2d41   :  { %8448 = vmatprep.subr.bf16.mxu1 %v8961_v1 }
0x2e06   :  { %v4654_v21 = vpop.f32.mrb[104].mxu1 }
0x2e07   :  { %v8410_v22 = vpop.f32.mrb[105].mxu1  ;;  %v4655_v24 = vadd.f32 %v7108_v20, %v4654_v21 }
0x2e08   :  { %v4657_v23 = vpop.f32.mrb[106].mxu1 }
0x2e09   :  { %v4658_v25 = vadd.f32 %v7108_v20, %v4657_v23  ;;  %v8411_v26 = vpop.f32.mrb[107].mxu1 }
0x2e0a   :  { %v8888_v26 = vld [vmem:[%s10613_s1 + $0x798] sm:$0xff]  }
0x2e0b   :  { %v4661_v27 = vpack.c.bf16 %v4658_v25, %v4655_v24  ;;  %v8887_v25 = vld [vmem:[%s10613_s1 + $0x790] sm:$0xff]  }
0x2e0d   :  { %8421 = vmatmul.mubr.msk.bf16.vlgmr.msra.gmra.mrb[108].mxu0 %vm58_vm1, %v4661_v27  ;;  %v8889_v27 = vld [vmem:[%s10613_s1 + $0x7a0] sm:$0xff]  }
0x2e0e   :  { %8444 = vmatprep.mubr.msk.bf16.mxu0 %vm8962_vm0, %v8961_v1  ;;  %8437 = vmatpush3.bf16.msra.mxu0 %v8869_v30 }
0x2e0f   :  { %8438 = vmatprep.subr.bf16.mxu0 %v8961_v1 }
0x2e12   :  { %8439 = vmatpush3.bf16.msra.mxu0 %v8870_v31 }
0x2e13   :  { %8440 = vmatprep.subr.bf16.mxu0 %v8961_v1 }
0x2e16   :  { %8441 = vmatpush3.bf16.msra.mxu0 %v8871_v40  ;;  %v8894_v40 = vld [vmem:[%s10613_s1 + $0x7c8] sm:$0xff]  }
0x2e17   :  { %8442 = vmatprep.subr.bf16.mxu0 %v8961_v1 }
0x2e1a   :  { %8443 = vmatpush3.bf16.msra.mxu0 %v8872_v41  ;;  %v7213_v41 = vld [vmem:[%s10614_s2 + $0x3c] ss:$0 sm:$0xff] }
0x2e1b   :  { %8460 = vmatprep.subr.bf16.mxu0 %v8961_v1 }
0x2ee0   :  { %v4740_v33 = vpop.f32.mrb[108].mxu0 }
0x2ee1   :  { %v8422_v34 = vpop.f32.mrb[109].mxu0  ;;  %v4741_v36 = vadd.f32 %v7123_v32, %v4740_v33 }
0x2ee2   :  { %v4743_v35 = vpop.f32.mrb[110].mxu0 }
0x2ee3   :  { %v4744_v37 = vadd.f32 %v7123_v32, %v4743_v35  ;;  %v8423_v38 = vpop.f32.mrb[111].mxu0 }
0x2ee4   :  { %v8892_v38 = vld [vmem:[%s10613_s1 + $0x7b8] sm:$0xff]  }
0x2ee5   :  { %v4747_v39 = vpack.c.bf16 %v4744_v37, %v4741_v36  ;;  %v8891_v37 = vld [vmem:[%s10613_s1 + $0x7b0] sm:$0xff]  }
0x2ee7   :  { %8433 = vmatmul.mubr.msk.bf16.vlgmr.msra.gmra.mrb[108].mxu1 %vm58_vm1, %v4747_v39  ;;  %v8893_v39 = vld [vmem:[%s10613_s1 + $0x7c0] sm:$0xff]  }
0x2ee8   :  { %8456 = vmatprep.mubr.msk.bf16.mxu1 %vm8962_vm0, %v8961_v1  ;;  %8449 = vmatpush3.bf16.msra.mxu1 %v8873_v42 }
0x2ee9   :  { %8450 = vmatprep.subr.bf16.mxu1 %v8961_v1 }
0x2eec   :  { %8451 = vmatpush3.bf16.msra.mxu1 %v8874_v43 }
0x2eed   :  { %8452 = vmatprep.subr.bf16.mxu1 %v8961_v1 }
0x2ef0   :  { %8453 = vmatpush3.bf16.msra.mxu1 %v8875_v52  ;;  %v8898_v52 = vld [vmem:[%s10613_s1 + $0x7e8] sm:$0xff]  }
0x2ef1   :  { %8454 = vmatprep.subr.bf16.mxu1 %v8961_v1 }
0x2ef4   :  { %8455 = vmatpush3.bf16.msra.mxu1 %v8876_v53  ;;  %v7228_v53 = vld [vmem:[%s10614_s2 + $0x3d] ss:$0 sm:$0xff] }
0x2ef5   :  { %8472 = vmatprep.subr.bf16.mxu1 %v8961_v1 }
0x2fba   :  { %v4826_v45 = vpop.f32.mrb[108].mxu1 }
0x2fbb   :  { %v8434_v46 = vpop.f32.mrb[109].mxu1  ;;  %v4827_v48 = vadd.f32 %v7138_v44, %v4826_v45 }
0x2fbc   :  { %v4829_v47 = vpop.f32.mrb[110].mxu1 }
0x2fbd   :  { %v4830_v49 = vadd.f32 %v7138_v44, %v4829_v47  ;;  %v8435_v50 = vpop.f32.mrb[111].mxu1 }
0x2fbe   :  { %v8896_v50 = vld [vmem:[%s10613_s1 + $0x7d8] sm:$0xff]  }
0x2fbf   :  { %v4833_v51 = vpack.c.bf16 %v4830_v49, %v4827_v48  ;;  %v8895_v49 = vld [vmem:[%s10613_s1 + $0x7d0] sm:$0xff]  }
0x2fc1   :  { %8445 = vmatmul.mubr.msk.bf16.vlgmr.msra.gmra.mrb[112].mxu0 %vm58_vm1, %v4833_v51  ;;  %v8897_v51 = vld [vmem:[%s10613_s1 + $0x7e0] sm:$0xff]  }
0x2fc2   :  { %8468 = vmatprep.mubr.msk.bf16.mxu0 %vm8962_vm0, %v8961_v1  ;;  %8461 = vmatpush3.bf16.msra.mxu0 %v8877_v54 }
0x2fc3   :  { %8462 = vmatprep.subr.bf16.mxu0 %v8961_v1 }
0x2fc6   :  { %8463 = vmatpush3.bf16.msra.mxu0 %v8878_v55 }
0x2fc7   :  { %8464 = vmatprep.subr.bf16.mxu0 %v8961_v1 }
0x2fca   :  { %8465 = vmatpush3.bf16.msra.mxu0 %v8879_v0  ;;  %v8902_v0 = vld [vmem:[%s10613_s1 + $0x808] sm:$0xff]  }
0x2fcb   :  { %8466 = vmatprep.subr.bf16.mxu0 %v8961_v1 }
0x2fce   :  { %8467 = vmatpush3.bf16.msra.mxu0 %v8880_v2  ;;  %v7243_v2 = vld [vmem:[%s10614_s2 + $0x3e] ss:$0 sm:$0xff] }
0x2fcf   :  { %8484 = vmatprep.subr.bf16.mxu0 %v8961_v1 }
0x3094   :  { %v4912_v57 = vpop.f32.mrb[112].mxu0 }
0x3095   :  { %v8446_v58 = vpop.f32.mrb[113].mxu0  ;;  %v4913_v60 = vadd.f32 %v7153_v56, %v4912_v57 }
0x3096   :  { %v4915_v59 = vpop.f32.mrb[114].mxu0 }
0x3097   :  { %v4916_v61 = vadd.f32 %v7153_v56, %v4915_v59  ;;  %v8447_v62 = vpop.f32.mrb[115].mxu0 }
0x3098   :  { %v8900_v62 = vld [vmem:[%s10613_s1 + $0x7f8] sm:$0xff]  }
0x3099   :  { %v4919_v63 = vpack.c.bf16 %v4916_v61, %v4913_v60  ;;  %v8899_v61 = vld [vmem:[%s10613_s1 + $0x7f0] sm:$0xff]  }
0x309b   :  { %8457 = vmatmul.mubr.msk.bf16.vlgmr.msra.gmra.mrb[112].mxu1 %vm58_vm1, %v4919_v63  ;;  %v8901_v63 = vld [vmem:[%s10613_s1 + $0x800] sm:$0xff]  }
0x309c   :  { %8480 = vmatprep.mubr.msk.bf16.mxu1 %vm8962_vm0, %v8961_v1  ;;  %8473 = vmatpush3.bf16.msra.mxu1 %v8881_v3 }
0x309d   :  { %8474 = vmatprep.subr.bf16.mxu1 %v8961_v1 }
0x30a0   :  { %8475 = vmatpush3.bf16.msra.mxu1 %v8882_v4 }
0x30a1   :  { %8476 = vmatprep.subr.bf16.mxu1 %v8961_v1 }
0x30a4   :  { %8477 = vmatpush3.bf16.msra.mxu1 %v8883_v13  ;;  %v8906_v13 = vld [vmem:[%s10613_s1 + $0x828] sm:$0xff]  }
0x30a5   :  { %8478 = vmatprep.subr.bf16.mxu1 %v8961_v1 }
0x30a8   :  { %8479 = vmatpush3.bf16.msra.mxu1 %v8884_v14  ;;  %v7258_v14 = vld [vmem:[%s10614_s2 + $0x3f] ss:$0 sm:$0xff] }
0x30a9   :  { %8496 = vmatprep.subr.bf16.mxu1 %v8961_v1 }
0x316e   :  { %v4998_v6 = vpop.f32.mrb[112].mxu1 }
0x316f   :  { %v8458_v7 = vpop.f32.mrb[113].mxu1  ;;  %v4999_v9 = vadd.f32 %v7168_v5, %v4998_v6 }
0x3170   :  { %v5001_v8 = vpop.f32.mrb[114].mxu1 }
0x3171   :  { %v5002_v10 = vadd.f32 %v7168_v5, %v5001_v8  ;;  %v8459_v11 = vpop.f32.mrb[115].mxu1 }
0x3172   :  { %v8904_v11 = vld [vmem:[%s10613_s1 + $0x818] sm:$0xff]  }
0x3173   :  { %v5005_v12 = vpack.c.bf16 %v5002_v10, %v4999_v9  ;;  %v8903_v10 = vld [vmem:[%s10613_s1 + $0x810] sm:$0xff]  }
0x3175   :  { %8469 = vmatmul.mubr.msk.bf16.vlgmr.msra.gmra.mrb[116].mxu0 %vm58_vm1, %v5005_v12  ;;  %v8905_v12 = vld [vmem:[%s10613_s1 + $0x820] sm:$0xff]  }
0x3176   :  { %8492 = vmatprep.mubr.msk.bf16.mxu0 %vm8962_vm0, %v8961_v1  ;;  %8485 = vmatpush3.bf16.msra.mxu0 %v8885_v15 }
0x3177   :  { %8486 = vmatprep.subr.bf16.mxu0 %v8961_v1 }
0x317a   :  { %8487 = vmatpush3.bf16.msra.mxu0 %v8886_v16 }
0x317b   :  { %8488 = vmatprep.subr.bf16.mxu0 %v8961_v1 }
0x317e   :  { %8489 = vmatpush3.bf16.msra.mxu0 %v8887_v25  ;;  %v8910_v25 = vld [vmem:[%s10613_s1 + $0x848] sm:$0xff]  }
0x317f   :  { %8490 = vmatprep.subr.bf16.mxu0 %v8961_v1 }
0x3182   :  { %8491 = vmatpush3.bf16.msra.mxu0 %v8888_v26  ;;  %v7273_v26 = vld [vmem:[%s10614_s2 + $0x40] ss:$0 sm:$0xff] }
0x3183   :  { %8508 = vmatprep.subr.bf16.mxu0 %v8961_v1 }
0x3248   :  { %v5084_v18 = vpop.f32.mrb[116].mxu0 }
0x3249   :  { %v8470_v19 = vpop.f32.mrb[117].mxu0  ;;  %v5085_v21 = vadd.f32 %v7183_v17, %v5084_v18 }
0x324a   :  { %v5087_v20 = vpop.f32.mrb[118].mxu0 }
0x324b   :  { %v5088_v22 = vadd.f32 %v7183_v17, %v5087_v20  ;;  %v8471_v23 = vpop.f32.mrb[119].mxu0 }
0x324c   :  { %v8908_v23 = vld [vmem:[%s10613_s1 + $0x838] sm:$0xff]  }
0x324d   :  { %v5091_v24 = vpack.c.bf16 %v5088_v22, %v5085_v21  ;;  %v8907_v22 = vld [vmem:[%s10613_s1 + $0x830] sm:$0xff]  }
0x324f   :  { %8481 = vmatmul.mubr.msk.bf16.vlgmr.msra.gmra.mrb[116].mxu1 %vm58_vm1, %v5091_v24  ;;  %v8909_v24 = vld [vmem:[%s10613_s1 + $0x840] sm:$0xff]  }
0x3250   :  { %8504 = vmatprep.mubr.msk.bf16.mxu1 %vm8962_vm0, %v8961_v1  ;;  %8497 = vmatpush3.bf16.msra.mxu1 %v8889_v27 }
0x3251   :  { %8498 = vmatprep.subr.bf16.mxu1 %v8961_v1 }
0x3254   :  { %8499 = vmatpush3.bf16.msra.mxu1 %v8890_v28 }
0x3255   :  { %8500 = vmatprep.subr.bf16.mxu1 %v8961_v1 }
0x3258   :  { %8501 = vmatpush3.bf16.msra.mxu1 %v8891_v37  ;;  %v8914_v37 = vld [vmem:[%s10613_s1 + $0x868] sm:$0xff]  }
0x3259   :  { %8502 = vmatprep.subr.bf16.mxu1 %v8961_v1 }
0x325c   :  { %8503 = vmatpush3.bf16.msra.mxu1 %v8892_v38  ;;  %v7288_v38 = vld [vmem:[%s10614_s2 + $0x41] ss:$0 sm:$0xff] }
0x325d   :  { %8520 = vmatprep.subr.bf16.mxu1 %v8961_v1 }
0x3322   :  { %v5170_v30 = vpop.f32.mrb[116].mxu1 }
0x3323   :  { %v8482_v31 = vpop.f32.mrb[117].mxu1  ;;  %v5171_v33 = vadd.f32 %v7198_v29, %v5170_v30 }
0x3324   :  { %v5173_v32 = vpop.f32.mrb[118].mxu1 }
0x3325   :  { %v5174_v34 = vadd.f32 %v7198_v29, %v5173_v32  ;;  %v8483_v35 = vpop.f32.mrb[119].mxu1 }
0x3326   :  { %v8912_v35 = vld [vmem:[%s10613_s1 + $0x858] sm:$0xff]  }
0x3327   :  { %v5177_v36 = vpack.c.bf16 %v5174_v34, %v5171_v33  ;;  %v8911_v34 = vld [vmem:[%s10613_s1 + $0x850] sm:$0xff]  }
0x3329   :  { %8493 = vmatmul.mubr.msk.bf16.vlgmr.msra.gmra.mrb[120].mxu0 %vm58_vm1, %v5177_v36  ;;  %v8913_v36 = vld [vmem:[%s10613_s1 + $0x860] sm:$0xff]  }
0x332a   :  { %8516 = vmatprep.mubr.msk.bf16.mxu0 %vm8962_vm0, %v8961_v1  ;;  %8509 = vmatpush3.bf16.msra.mxu0 %v8893_v39 }
0x332b   :  { %8510 = vmatprep.subr.bf16.mxu0 %v8961_v1 }
0x332e   :  { %8511 = vmatpush3.bf16.msra.mxu0 %v8894_v40 }
0x332f   :  { %8512 = vmatprep.subr.bf16.mxu0 %v8961_v1 }
0x3332   :  { %8513 = vmatpush3.bf16.msra.mxu0 %v8895_v49  ;;  %v8918_v49 = vld [vmem:[%s10613_s1 + $0x888] sm:$0xff]  }
0x3333   :  { %8514 = vmatprep.subr.bf16.mxu0 %v8961_v1 }
0x3336   :  { %8515 = vmatpush3.bf16.msra.mxu0 %v8896_v50  ;;  %v7303_v50 = vld [vmem:[%s10614_s2 + $0x42] ss:$0 sm:$0xff] }
0x3337   :  { %8532 = vmatprep.subr.bf16.mxu0 %v8961_v1 }
0x33fc   :  { %v5256_v42 = vpop.f32.mrb[120].mxu0 }
0x33fd   :  { %v8494_v43 = vpop.f32.mrb[121].mxu0  ;;  %v5257_v45 = vadd.f32 %v7213_v41, %v5256_v42 }
0x33fe   :  { %v5259_v44 = vpop.f32.mrb[122].mxu0 }
0x33ff   :  { %v5260_v46 = vadd.f32 %v7213_v41, %v5259_v44  ;;  %v8495_v47 = vpop.f32.mrb[123].mxu0 }
0x3400   :  { %v8916_v47 = vld [vmem:[%s10613_s1 + $0x878] sm:$0xff]  }
0x3401   :  { %v5263_v48 = vpack.c.bf16 %v5260_v46, %v5257_v45  ;;  %v8915_v46 = vld [vmem:[%s10613_s1 + $0x870] sm:$0xff]  }
0x3403   :  { %8505 = vmatmul.mubr.msk.bf16.vlgmr.msra.gmra.mrb[120].mxu1 %vm58_vm1, %v5263_v48  ;;  %v8917_v48 = vld [vmem:[%s10613_s1 + $0x880] sm:$0xff]  }
0x3404   :  { %8528 = vmatprep.mubr.msk.bf16.mxu1 %vm8962_vm0, %v8961_v1  ;;  %8521 = vmatpush3.bf16.msra.mxu1 %v8897_v51 }
0x3405   :  { %8522 = vmatprep.subr.bf16.mxu1 %v8961_v1 }
0x3408   :  { %8523 = vmatpush3.bf16.msra.mxu1 %v8898_v52 }
0x3409   :  { %8524 = vmatprep.subr.bf16.mxu1 %v8961_v1 }
0x340c   :  { %8525 = vmatpush3.bf16.msra.mxu1 %v8899_v61  ;;  %v8922_v61 = vld [vmem:[%s10613_s1 + $0x8a8] sm:$0xff]  }
0x340d   :  { %8526 = vmatprep.subr.bf16.mxu1 %v8961_v1 }
0x3410   :  { %8527 = vmatpush3.bf16.msra.mxu1 %v8900_v62  ;;  %v7318_v62 = vld [vmem:[%s10614_s2 + $0x43] ss:$0 sm:$0xff] }
0x3411   :  { %8544 = vmatprep.subr.bf16.mxu1 %v8961_v1 }
0x34d6   :  { %v5342_v54 = vpop.f32.mrb[120].mxu1 }
0x34d7   :  { %v8506_v55 = vpop.f32.mrb[121].mxu1  ;;  %v5343_v57 = vadd.f32 %v7228_v53, %v5342_v54 }
0x34d8   :  { %v5345_v56 = vpop.f32.mrb[122].mxu1 }
0x34d9   :  { %v5346_v58 = vadd.f32 %v7228_v53, %v5345_v56  ;;  %v8507_v59 = vpop.f32.mrb[123].mxu1 }
0x34da   :  { %v8920_v59 = vld [vmem:[%s10613_s1 + $0x898] sm:$0xff]  }
0x34db   :  { %v5349_v60 = vpack.c.bf16 %v5346_v58, %v5343_v57  ;;  %v8919_v58 = vld [vmem:[%s10613_s1 + $0x890] sm:$0xff]  }
0x34dd   :  { %8517 = vmatmul.mubr.msk.bf16.vlgmr.msra.gmra.mrb[124].mxu0 %vm58_vm1, %v5349_v60  ;;  %v8921_v60 = vld [vmem:[%s10613_s1 + $0x8a0] sm:$0xff]  }
0x34de   :  { %8540 = vmatprep.mubr.msk.bf16.mxu0 %vm8962_vm0, %v8961_v1  ;;  %8533 = vmatpush3.bf16.msra.mxu0 %v8901_v63 }
0x34df   :  { %8534 = vmatprep.subr.bf16.mxu0 %v8961_v1 }
0x34e2   :  { %8535 = vmatpush3.bf16.msra.mxu0 %v8902_v0 }
0x34e3   :  { %8536 = vmatprep.subr.bf16.mxu0 %v8961_v1 }
0x34e6   :  { %8537 = vmatpush3.bf16.msra.mxu0 %v8903_v10  ;;  %v8926_v10 = vld [vmem:[%s10613_s1 + $0x8c8] sm:$0xff]  }
0x34e7   :  { %8538 = vmatprep.subr.bf16.mxu0 %v8961_v1 }
0x34ea   :  { %8539 = vmatpush3.bf16.msra.mxu0 %v8904_v11  ;;  %v7333_v11 = vld [vmem:[%s10614_s2 + $0x44] ss:$0 sm:$0xff] }
0x34eb   :  { %8556 = vmatprep.subr.bf16.mxu0 %v8961_v1 }
0x35b0   :  { %v5428_v3 = vpop.f32.mrb[124].mxu0 }
0x35b1   :  { %v8518_v4 = vpop.f32.mrb[125].mxu0  ;;  %v5429_v6 = vadd.f32 %v7243_v2, %v5428_v3 }
0x35b2   :  { %v5431_v5 = vpop.f32.mrb[126].mxu0 }
0x35b3   :  { %v5432_v7 = vadd.f32 %v7243_v2, %v5431_v5  ;;  %v8519_v8 = vpop.f32.mrb[127].mxu0 }
0x35b4   :  { %v8924_v8 = vld [vmem:[%s10613_s1 + $0x8b8] sm:$0xff]  }
0x35b5   :  { %v5435_v9 = vpack.c.bf16 %v5432_v7, %v5429_v6  ;;  %v8923_v7 = vld [vmem:[%s10613_s1 + $0x8b0] sm:$0xff]  }
0x35b7   :  { %8529 = vmatmul.mubr.msk.bf16.vlgmr.msra.gmra.mrb[124].mxu1 %vm58_vm1, %v5435_v9  ;;  %v8925_v9 = vld [vmem:[%s10613_s1 + $0x8c0] sm:$0xff]  }
0x35b8   :  { %8552 = vmatprep.mubr.msk.bf16.mxu1 %vm8962_vm0, %v8961_v1  ;;  %8545 = vmatpush3.bf16.msra.mxu1 %v8905_v12 }
0x35b9   :  { %8546 = vmatprep.subr.bf16.mxu1 %v8961_v1 }
0x35bc   :  { %8547 = vmatpush3.bf16.msra.mxu1 %v8906_v13 }
0x35bd   :  { %8548 = vmatprep.subr.bf16.mxu1 %v8961_v1 }
0x35c0   :  { %8549 = vmatpush3.bf16.msra.mxu1 %v8907_v22  ;;  %v8930_v22 = vld [vmem:[%s10613_s1 + $0x8e8] sm:$0xff]  }
0x35c1   :  { %8550 = vmatprep.subr.bf16.mxu1 %v8961_v1 }
0x35c4   :  { %8551 = vmatpush3.bf16.msra.mxu1 %v8908_v23  ;;  %v7348_v23 = vld [vmem:[%s10614_s2 + $0x45] ss:$0 sm:$0xff] }
0x35c5   :  { %8568 = vmatprep.subr.bf16.mxu1 %v8961_v1 }
0x368a   :  { %v5514_v15 = vpop.f32.mrb[124].mxu1 }
0x368b   :  { %v8530_v16 = vpop.f32.mrb[125].mxu1  ;;  %v5515_v18 = vadd.f32 %v7258_v14, %v5514_v15 }
0x368c   :  { %v5517_v17 = vpop.f32.mrb[126].mxu1 }
0x368d   :  { %v5518_v19 = vadd.f32 %v7258_v14, %v5517_v17  ;;  %v8531_v20 = vpop.f32.mrb[127].mxu1 }
0x368e   :  { %v8928_v20 = vld [vmem:[%s10613_s1 + $0x8d8] sm:$0xff]  }
0x368f   :  { %v5521_v21 = vpack.c.bf16 %v5518_v19, %v5515_v18  ;;  %v8927_v19 = vld [vmem:[%s10613_s1 + $0x8d0] sm:$0xff]  }
0x3691   :  { %8541 = vmatmul.mubr.msk.bf16.vlgmr.msra.gmra.mrb[128].mxu0 %vm58_vm1, %v5521_v21  ;;  %v8929_v21 = vld [vmem:[%s10613_s1 + $0x8e0] sm:$0xff]  }
0x3692   :  { %8564 = vmatprep.mubr.msk.bf16.mxu0 %vm8962_vm0, %v8961_v1  ;;  %8557 = vmatpush3.bf16.msra.mxu0 %v8909_v24 }
0x3693   :  { %8558 = vmatprep.subr.bf16.mxu0 %v8961_v1 }
0x3696   :  { %8559 = vmatpush3.bf16.msra.mxu0 %v8910_v25 }
0x3697   :  { %8560 = vmatprep.subr.bf16.mxu0 %v8961_v1 }
0x369a   :  { %8561 = vmatpush3.bf16.msra.mxu0 %v8911_v34  ;;  %v8934_v34 = vld [vmem:[%s10613_s1 + $0x908] sm:$0xff]  }
0x369b   :  { %8562 = vmatprep.subr.bf16.mxu0 %v8961_v1 }
0x369e   :  { %8563 = vmatpush3.bf16.msra.mxu0 %v8912_v35  ;;  %v7363_v35 = vld [vmem:[%s10614_s2 + $0x46] ss:$0 sm:$0xff] }
0x369f   :  { %8580 = vmatprep.subr.bf16.mxu0 %v8961_v1 }
0x3764   :  { %v5600_v27 = vpop.f32.mrb[128].mxu0 }
0x3765   :  { %v8542_v28 = vpop.f32.mrb[129].mxu0  ;;  %v5601_v30 = vadd.f32 %v7273_v26, %v5600_v27 }
0x3766   :  { %v5603_v29 = vpop.f32.mrb[130].mxu0 }
0x3767   :  { %v5604_v31 = vadd.f32 %v7273_v26, %v5603_v29  ;;  %v8543_v32 = vpop.f32.mrb[131].mxu0 }
0x3768   :  { %v8932_v32 = vld [vmem:[%s10613_s1 + $0x8f8] sm:$0xff]  }
0x3769   :  { %v5607_v33 = vpack.c.bf16 %v5604_v31, %v5601_v30  ;;  %v8931_v31 = vld [vmem:[%s10613_s1 + $0x8f0] sm:$0xff]  }
0x376b   :  { %8553 = vmatmul.mubr.msk.bf16.vlgmr.msra.gmra.mrb[128].mxu1 %vm58_vm1, %v5607_v33  ;;  %v8933_v33 = vld [vmem:[%s10613_s1 + $0x900] sm:$0xff]  }
0x376c   :  { %8576 = vmatprep.mubr.msk.bf16.mxu1 %vm8962_vm0, %v8961_v1  ;;  %8569 = vmatpush3.bf16.msra.mxu1 %v8913_v36 }
0x376d   :  { %8570 = vmatprep.subr.bf16.mxu1 %v8961_v1 }
0x3770   :  { %8571 = vmatpush3.bf16.msra.mxu1 %v8914_v37 }
0x3771   :  { %8572 = vmatprep.subr.bf16.mxu1 %v8961_v1 }
0x3774   :  { %8573 = vmatpush3.bf16.msra.mxu1 %v8915_v46 }
0x3775   :  { %8574 = vmatprep.subr.bf16.mxu1 %v8961_v1 }
0x3778   :  { %8575 = vmatpush3.bf16.msra.mxu1 %v8916_v47 }
0x3779   :  { %8592 = vmatprep.subr.bf16.mxu1 %v8961_v1 }
0x383e   :  { %v5686_v39 = vpop.f32.mrb[128].mxu1 }
0x383f   :  { %v8554_v40 = vpop.f32.mrb[129].mxu1  ;;  %v5687_v42 = vadd.f32 %v7288_v38, %v5686_v39 }
0x3840   :  { %v5689_v41 = vpop.f32.mrb[130].mxu1 }
0x3841   :  { %v5690_v43 = vadd.f32 %v7288_v38, %v5689_v41  ;;  %v8555_v44 = vpop.f32.mrb[131].mxu1 }
0x3842   :  { %v8936_v44 = vld [vmem:[%s10613_s1 + $0x918] sm:$0xff]  }
0x3843   :  { %v5693_v45 = vpack.c.bf16 %v5690_v43, %v5687_v42  ;;  %v8935_v43 = vld [vmem:[%s10613_s1 + $0x910] sm:$0xff]   ;;  %s6302_s1 = sshll.u32 %s8963_s18, 4  ;;  %s6303_s1 = int_to_ptr.vmem [resolvable:$true] %s6302_s1 }
0x3844   :  { %s8937_s19 = scalar_lea.vmem %s6303_s1, 256  ;;  %p8942_p1 = scmp.lt.s32.totalorder %s6303_s1, %s6303_s1 }
0x3845   :  { %8565 = vmatmul.mubr.msk.bf16.vlgmr.msra.gmra.mrb[132].mxu0 %vm58_vm1, %v5693_v45  ;;  %v7378_v45 = vld [vmem:[%s10614_s2 + $0x47] ss:$0 sm:$0xff]  ;;  %p8938_p0 = scmp.ne.s32.totalorder %s6303_s1, %s8937_s19  ;;  %p8943_p2 = scmp.lt.s32.totalorder %s8937_s19, %s8937_s19 }
0x3846   :  { %8588 = vmatprep.mubr.msk.bf16.mxu0 %vm8962_vm0, %v8961_v1  ;;  %8581 = vmatpush3.bf16.msra.mxu0 %v8917_v48 }
0x3847   :  { %8582 = vmatprep.subr.bf16.mxu0 %v8961_v1  ;;  %p8944_p3 = por %p8943_p2, %p8942_p1 }
0x3849   :  { %p8945_p4 = pnand %p8944_p3, %p8938_p0 }
0x384a   :  { %8583 = vmatpush3.bf16.msra.mxu0 %v8918_v49 }
0x384b   :  { %8584 = vmatprep.subr.bf16.mxu0 %v8961_v1 }
0x384e   :  { %8585 = vmatpush3.bf16.msra.mxu0 %v8919_v58 }
0x384f   :  { %8586 = vmatprep.subr.bf16.mxu0 %v8961_v1 }
0x3852   :  { %8587 = vmatpush3.bf16.msra.mxu0 %v8920_v59 }
0x3853   :  { %8604 = vmatprep.subr.bf16.mxu0 %v8961_v1 }
0x3918   :  { %v5772_v51 = vpop.f32.mrb[132].mxu0 }
0x3919   :  { %v8566_v52 = vpop.f32.mrb[133].mxu0  ;;  %v5773_v54 = vadd.f32 %v7303_v50, %v5772_v51 }
0x391a   :  { %v5775_v53 = vpop.f32.mrb[134].mxu0 }
0x391b   :  { %v5776_v55 = vadd.f32 %v7303_v50, %v5775_v53  ;;  %v8567_v56 = vpop.f32.mrb[135].mxu0 }
0x391d   :  { %v5779_v57 = vpack.c.bf16 %v5776_v55, %v5773_v54 }
0x391f   :  { %8577 = vmatmul.mubr.msk.bf16.vlgmr.msra.gmra.mrb[132].mxu1 %vm58_vm1, %v5779_v57 }
0x3920   :  { %8600 = vmatprep.mubr.msk.bf16.mxu1 %vm8962_vm0, %v8961_v1  ;;  %8593 = vmatpush3.bf16.msra.mxu1 %v8921_v60 }
0x3921   :  { %8594 = vmatprep.subr.bf16.mxu1 %v8961_v1 }
0x3924   :  { %8595 = vmatpush3.bf16.msra.mxu1 %v8922_v61 }
0x3925   :  { %8596 = vmatprep.subr.bf16.mxu1 %v8961_v1 }
0x3928   :  { %8597 = vmatpush3.bf16.msra.mxu1 %v8923_v7 }
0x3929   :  { %8598 = vmatprep.subr.bf16.mxu1 %v8961_v1 }
0x392c   :  { %8599 = vmatpush3.bf16.msra.mxu1 %v8924_v8 }
0x392d   :  { %8616 = vmatprep.subr.bf16.mxu1 %v8961_v1 }
0x39f2   :  { %v5858_v63 = vpop.f32.mrb[132].mxu1 }
0x39f3   :  { %v8578_v0 = vpop.f32.mrb[133].mxu1  ;;  %v5859_v3 = vadd.f32 %v7318_v62, %v5858_v63 }
0x39f4   :  { %v5861_v2 = vpop.f32.mrb[134].mxu1 }
0x39f5   :  { %v5862_v4 = vadd.f32 %v7318_v62, %v5861_v2  ;;  %v8579_v5 = vpop.f32.mrb[135].mxu1 }
0x39f7   :  { %v5865_v6 = vpack.c.bf16 %v5862_v4, %v5859_v3 }
0x39f9   :  { %8589 = vmatmul.mubr.msk.bf16.vlgmr.msra.gmra.mrb[136].mxu0 %vm58_vm1, %v5865_v6 }
0x39fa   :  { %8612 = vmatprep.mubr.msk.bf16.mxu0 %vm8962_vm0, %v8961_v1  ;;  %8605 = vmatpush3.bf16.msra.mxu0 %v8925_v9 }
0x39fb   :  { %8606 = vmatprep.subr.bf16.mxu0 %v8961_v1 }
0x39fe   :  { %8607 = vmatpush3.bf16.msra.mxu0 %v8926_v10 }
0x39ff   :  { %8608 = vmatprep.subr.bf16.mxu0 %v8961_v1 }
0x3a02   :  { %8609 = vmatpush3.bf16.msra.mxu0 %v8927_v19 }
0x3a03   :  { %8610 = vmatprep.subr.bf16.mxu0 %v8961_v1 }
0x3a06   :  { %8611 = vmatpush3.bf16.msra.mxu0 %v8928_v20 }
0x3a07   :  { %8628 = vmatprep.subr.bf16.mxu0 %v8961_v1 }
0x3acc   :  { %v5944_v12 = vpop.f32.mrb[136].mxu0 }
0x3acd   :  { %v8590_v13 = vpop.f32.mrb[137].mxu0  ;;  %v5945_v15 = vadd.f32 %v7333_v11, %v5944_v12 }
0x3ace   :  { %v5947_v14 = vpop.f32.mrb[138].mxu0 }
0x3acf   :  { %v5948_v16 = vadd.f32 %v7333_v11, %v5947_v14  ;;  %v8591_v17 = vpop.f32.mrb[139].mxu0 }
0x3ad1   :  { %v5951_v18 = vpack.c.bf16 %v5948_v16, %v5945_v15 }
0x3ad3   :  { %8601 = vmatmul.mubr.msk.bf16.vlgmr.msra.gmra.mrb[136].mxu1 %vm58_vm1, %v5951_v18 }
0x3ad4   :  { %8624 = vmatprep.mubr.msk.bf16.mxu1 %vm8962_vm0, %v8961_v1  ;;  %8617 = vmatpush3.bf16.msra.mxu1 %v8929_v21 }
0x3ad5   :  { %8618 = vmatprep.subr.bf16.mxu1 %v8961_v1 }
0x3ad8   :  { %8619 = vmatpush3.bf16.msra.mxu1 %v8930_v22 }
0x3ad9   :  { %8620 = vmatprep.subr.bf16.mxu1 %v8961_v1 }
0x3adc   :  { %8621 = vmatpush3.bf16.msra.mxu1 %v8931_v31 }
0x3add   :  { %8622 = vmatprep.subr.bf16.mxu1 %v8961_v1 }
0x3ae0   :  { %8623 = vmatpush3.bf16.msra.mxu1 %v8932_v32 }
0x3ba6   :  { %v6030_v24 = vpop.f32.mrb[136].mxu1 }
0x3ba7   :  { %v8602_v25 = vpop.f32.mrb[137].mxu1  ;;  %v6031_v27 = vadd.f32 %v7348_v23, %v6030_v24 }
0x3ba8   :  { %v6033_v26 = vpop.f32.mrb[138].mxu1 }
0x3ba9   :  { %v6034_v28 = vadd.f32 %v7348_v23, %v6033_v26  ;;  %v8603_v29 = vpop.f32.mrb[139].mxu1 }
0x3bab   :  { %v6037_v30 = vpack.c.bf16 %v6034_v28, %v6031_v27 }
0x3bad   :  { %8613 = vmatmul.mubr.msk.bf16.vlgmr.msra.gmra.mrb[140].mxu0 %vm58_vm1, %v6037_v30 }
0x3bae   :  { %8636 = vmatprep.mubr.msk.bf16.mxu0 %vm8962_vm0, %v8961_v1  ;;  %8629 = vmatpush3.bf16.msra.mxu0 %v8933_v33 }
0x3baf   :  { %8630 = vmatprep.subr.bf16.mxu0 %v8961_v1 }
0x3bb2   :  { %8631 = vmatpush3.bf16.msra.mxu0 %v8934_v34 }
0x3bb3   :  { %8632 = vmatprep.subr.bf16.mxu0 %v8961_v1 }
0x3bb6   :  { %8633 = vmatpush3.bf16.msra.mxu0 %v8935_v43 }
0x3bb7   :  { %8634 = vmatprep.subr.bf16.mxu0 %v8961_v1  ;;  %v7393_v1 = vld [vmem:[%s10614_s2 + $0x48] ss:$0 sm:$0xff] }
0x3bba   :  { %8635 = vmatpush3.bf16.msra.mxu0 %v8936_v44 }
0x3c80   :  { %v6116_v36 = vpop.f32.mrb[140].mxu0 }
0x3c81   :  { %v8614_v37 = vpop.f32.mrb[141].mxu0  ;;  %v6117_v39 = vadd.f32 %v7363_v35, %v6116_v36 }
0x3c82   :  { %v6119_v38 = vpop.f32.mrb[142].mxu0 }
0x3c83   :  { %v6120_v40 = vadd.f32 %v7363_v35, %v6119_v38  ;;  %v8615_v41 = vpop.f32.mrb[143].mxu0 }
0x3c85   :  { %v6123_v42 = vpack.c.bf16 %v6120_v40, %v6117_v39 }
0x3c87   :  { %8625 = vmatmul.mubr.msk.bf16.vlgmr.msra.gmra.mrb[140].mxu1 %vm58_vm1, %v6123_v42 }
0x3d5a   :  { %v6202_v46 = vpop.f32.mrb[140].mxu1 }
0x3d5b   :  { %v8626_v47 = vpop.f32.mrb[141].mxu1  ;;  %v6203_v49 = vadd.f32 %v7378_v45, %v6202_v46 }
0x3d5c   :  { %v6205_v48 = vpop.f32.mrb[142].mxu1 }
0x3d5d   :  { %v6206_v50 = vadd.f32 %v7378_v45, %v6205_v48  ;;  %v8627_v51 = vpop.f32.mrb[143].mxu1 }
0x3d5f   :  { %v6209_v52 = vpack.c.bf16 %v6206_v50, %v6203_v49 }
0x3d61   :  { %8637 = vmatmul.mubr.msk.bf16.vlgmr.msra.gmra.mrb[144].mxu0 %vm58_vm1, %v6209_v52 }
0x3e34   :  { %v6288_v53 = vpop.f32.mrb[144].mxu0 }
0x3e35   :  { %v6289_v54 = vadd.f32 %v7393_v1, %v6288_v53  ;;  %v8638_v55 = vpop.f32.mrb[145].mxu0 }
0x3e36   :  { %v6291_v56 = vpop.f32.mrb[146].mxu0 }
0x3e37   :  { %6295 = vst.msk [vmem:[#allocation2] sm:$0xff] %vm58_vm1, %v6289_v54  ;;  %v6292_v57 = vadd.f32 %v7393_v1, %v6291_v56  ;;  %v8639_v58 = vpop.f32.mrb[147].mxu0 }
0x3e39   :  { %6296 = vst.msk [vmem:[#allocation2 + $0x8] sm:$0xff] %vm58_vm1, %v6292_v57 }
0x3e3a   :  { %8948 = shalt.err (!%p8945_p4)
}
0x3e3b   :  { %s8949_s21 = scalar_lea.hbm %s10615_s3, 256 }
0x3e3c   :  { %p8950_p5 = scmp.ne.s32.totalorder %s10615_s3, %s8949_s21  ;;  %p8953_p6 = scmp.lt.u32.totalorder %s8949_s21, %s10615_s3 }
0x3e3e   :  { %p8955_p7 = pnand %p8953_p6, %p8950_p5 }
0x3e40   :  { %8958 = shalt.err (!%p8955_p7)
}
0x3e41   :  { %s8964_s26 = smov 128   ;;  %s8965_s27 = smov 8  }
0x3e42   :  { %6308 = dma.vmem_to_hbm [thread:$0]  %s6303_s1, 256, %s10615_s3, [#allocation3], %s8964_s26, %s8964_s26, %s8965_s27  }
0x3e43   :  { %8959 = dma.done.wait [#allocation3], 256  }
0x3e44   :  { %8960 = vsyncadd [#allocation3], 4294967040 }
0x3e45   :  { %6312 = vsyncpa [#allocation3], 1 }

</bundles_post_ra>
